<compile_context>
chip_gen: v7x
topology: tpu7x:2x2x1
jax: 0.10.0
libtpu: 0.0.40
codegen_flags: <defaults>
</compile_context>

<pallas_src>
import functools

import jax
import jax.numpy as jnp
from jax.experimental import pallas as pl
from jax.experimental.pallas import tpu as pltpu


# ---------------------------------------------------------------------------
# Pass 1: conv (tap-loop MXU matmuls) + ReLU + per-tile BN partial statistics
# ---------------------------------------------------------------------------
def _conv_relu_stats_kernel(x_main_ref, x_top_ref, x_bot_ref, w_ref,
                            y_ref, stats_ref, xwin_ref, *,
                            kh, kw, ph, hp, th, w_cols, n_row_tiles):
    # x_main_ref: (1, TH, Wp, Cin)   bf16 row tile (W already zero-padded in wrapper)
    # x_top_ref:  (1, hp, Wp, Cin)   bf16 rows just above the tile (clamped at top)
    # x_bot_ref:  (1, hp, Wp, Cin)   bf16 rows just below the tile (clamped at bottom)
    # w_ref:      (kh, kw*Cin, Cout) bf16 weights, ordered [dy][dx*Cin + ci][co]
    # y_ref:      (TH*W, Cout)       bf16 conv+ReLU output rows
    # stats_ref:  (1, 2, Cout)       f32 per-tile [sum, centered sum-of-squares]
    # xwin_ref:   (TH+2*hp, Wp, Cin) bf16 haloed window scratch
    r = pl.program_id(1)
    cin = x_main_ref.shape[-1]
    cout = w_ref.shape[-1]
    rows = th * w_cols

    # Assemble the haloed window.  Every row of the scratch is rewritten each step, so the
    # kernel is correct under "parallel" grid scheduling; only hp boundary rows get zeroed.
    xwin_ref[hp:hp + th] = x_main_ref[0]
    xwin_ref[0:hp] = x_top_ref[0]
    xwin_ref[hp + th:hp + th + hp] = x_bot_ref[0]

    @pl.when(r == 0)
    def _zero_top():
        xwin_ref[0:hp] = jnp.zeros((hp,) + xwin_ref.shape[1:], xwin_ref.dtype)

    @pl.when(r == n_row_tiles - 1)
    def _zero_bot():
        xwin_ref[hp + th:hp + th + hp] = jnp.zeros(
            (hp,) + xwin_ref.shape[1:], xwin_ref.dtype)

    # Tap-loop conv: one MXU matmul per kernel row (K = kw*Cin), f32 accumulation.  This
    # replaces the full (HW, kh*kw*Cin) im2col materialization (same FLOPs, far less VMEM).
    off = hp - ph
    acc = jnp.zeros((rows, cout), jnp.float32)
    for dy in range(kh):
        slab = jnp.concatenate(
            [xwin_ref[off + dy:off + dy + th, dx:dx + w_cols, :] for dx in range(kw)],
            axis=-1,
        ).reshape(rows, kw * cin)
        acc = acc + jnp.dot(slab, w_ref[dy], preferred_element_type=jnp.float32)

    acc = jnp.maximum(acc, 0.0)                   # fused ReLU
    y_ref[...] = acc.astype(y_ref.dtype)          # bf16 intermediate (halves y HBM traffic)

    # Per-tile centered partial stats (combined with Chan's parallel-variance formula in the
    # wrapper) computed from the f32 accumulator -> numerically safe vs E[x^2] - mean^2.
    s = jnp.sum(acc, axis=0, keepdims=True)                        # (1, Cout)
    m = s * (1.0 / rows)
    css = jnp.sum((acc - m) * (acc - m), axis=0, keepdims=True)    # (1, Cout)
    stats_ref[...] = jnp.concatenate([s, css], axis=0)[None]


# ---------------------------------------------------------------------------
# Pass 2: BatchNorm affine (y*scale + shift) + transpose-to-NCHW store
# ---------------------------------------------------------------------------
def _bn_apply_nchw_kernel(y_ref, scale_ref, shift_ref, o_ref):
    # y_ref: (TH*W, Cout) bf16; o_ref: (1, Cout, TH*W) f32 (lane-dense store)
    v = y_ref[...].astype(jnp.float32) * scale_ref[...] + shift_ref[...]
    o_ref[...] = jnp.transpose(v)[None]


# ---------------------------------------------------------------------------
# Wrapper helpers
# ---------------------------------------------------------------------------
def _pick_vmem_limit():
    try:
        cap = int(pltpu.get_tpu_info().vmem_capacity_bytes)
    except Exception:
        cap = 64 * 1024 * 1024
    # ~48 MiB on v7x (64 MiB physical), ~96 MiB on v5e/v6e (128 MiB physical).
    return max(32 * 1024 * 1024, min(cap * 3 // 4, 100 * 1024 * 1024))


def _pick_row_tile(H, W, Wp, Cin, Cout, kh, kw, ph, budget):
    hp = max(ph, 1)
    cands = []
    for t in range(H, 0, -1):
        if H % t:
            continue
        if ph and (t % ph):
            continue
        if (t * W) % 8:                        # y row blocks: sublane-aligned
            continue
        if ((t * W) % 128) and t != H:         # pass-2 out blocks: lane-dense unless full
            continue
        cands.append(t)
    assert cands, "unsupported spatial shape: need (H*W) % 8 == 0"
    for t in cands:                            # largest tile that fits the VMEM budget
        per_step = (
            2 * (t + 2 * hp) * Wp * Cin * 2    # double-buffered input tile + halos (bf16)
            + 2 * kh * kw * Cin * Cout * 2     # double-buffered weights (bf16)
            + (t + 2 * hp) * Wp * Cin * 2      # xwin scratch
            + t * W * kw * Cin * 2             # per-tap slab temporary
            + t * W * Cout * 4                 # f32 accumulator
            + 2 * t * W * Cout * 2             # double-buffered y output (bf16)
        )
        if per_step <= budget:
            return t
    return cands[-1]


def conv_block_forward(x_nchw, w_oihw, gamma, beta, *, eps=1e-5):
    """ConvBlock forward (default config):
    Conv2d(k, stride=1, pad=(k-1)//2, bias=False) -> ReLU -> BatchNorm2d (batch stats)."""
    N, Cin, H, W = x_nchw.shape
    Cout, Cin_w, kh, kw = w_oihw.shape
    assert Cin == Cin_w, "groups != 1 not supported"
    assert kh % 2 == 1 and kw % 2 == 1, "even kernel sizes not supported"
    ph, pw = (kh - 1) // 2, (kw - 1) // 2
    hp = max(ph, 1)
    Wp = W + 2 * pw
    M = N * H * W

    vmem_limit = _pick_vmem_limit()
    TH = _pick_row_tile(H, W, Wp, Cin, Cout, kh, kw, ph, vmem_limit // 2)
    R = H // TH
    q = TH // hp

    # ---- glue: NHWC + bf16 + W zero-halo (XLA fuses transpose+cast+pad into one pass) ----
    x_nhwc = jnp.transpose(x_nchw, (0, 2, 3, 1)).astype(jnp.bfloat16)
    if pw:
        x_nhwc = jnp.pad(x_nhwc, ((0, 0), (0, 0), (pw, pw), (0, 0)))
    w_k = jnp.transpose(w_oihw, (2, 3, 1, 0)).reshape(kh, kw * Cin, Cout).astype(jnp.bfloat16)

    cparams = pltpu.CompilerParams(
        dimension_semantics=("parallel", "parallel"),
        vmem_limit_bytes=vmem_limit,
    )

    # ---- pass 1: conv + ReLU + per-tile BN stats, grid over (batch, row tiles) ----
    kern1 = functools.partial(
        _conv_relu_stats_kernel,
        kh=kh, kw=kw, ph=ph, hp=hp, th=TH, w_cols=W, n_row_tiles=R)
    ce1 = pl.CostEstimate(
        flops=2 * M * kh * kw * Cin * Cout,
        transcendentals=0,
        bytes_accessed=x_nhwc.size * 2 + w_k.size * 2 + M * Cout * 2 + N * R * 2 * Cout * 4)
    y, stats = pl.pallas_call(
        kern1,
        out_shape=(
            jax.ShapeDtypeStruct((M, Cout), jnp.bfloat16),
            jax.ShapeDtypeStruct((N * R, 2, Cout), jnp.float32),
        ),
        grid=(N, R),
        in_specs=[
            pl.BlockSpec((1, TH, Wp, Cin), lambda n, r: (n, r, 0, 0)),
            pl.BlockSpec((1, hp, Wp, Cin),
                         lambda n, r: (n, jnp.maximum(r * q - 1, 0), 0, 0)),
            pl.BlockSpec((1, hp, Wp, Cin),
                         lambda n, r: (n, jnp.minimum((r + 1) * q, H // hp - 1), 0, 0)),
            pl.BlockSpec((kh, kw * Cin, Cout), lambda n, r: (0, 0, 0)),
        ],
        out_specs=(
            pl.BlockSpec((TH * W, Cout), lambda n, r: (n * R + r, 0)),
            pl.BlockSpec((1, 2, Cout), lambda n, r: (n * R + r, 0, 0)),
        ),
        scratch_shapes=[pltpu.VMEM((TH + 2 * hp, Wp, Cin), jnp.bfloat16)],
        compiler_params=cparams,
        cost_estimate=ce1,
    )(x_nhwc, x_nhwc, x_nhwc, w_k)

    # ---- combine per-tile stats (Chan's parallel variance; tiny wrapper-side math) ----
    rows_per_tile = TH * W
    tile_sum = stats[:, 0, :]                      # (N*R, Cout)
    tile_css = stats[:, 1, :]                      # (N*R, Cout)
    mean = jnp.sum(tile_sum, axis=0) / M
    tile_mean = tile_sum / rows_per_tile
    var = (jnp.sum(tile_css, axis=0)
           + rows_per_tile * jnp.sum((tile_mean - mean[None, :]) ** 2, axis=0)) / M
    inv = jax.lax.rsqrt(var + eps)
    g32 = gamma.astype(jnp.float32)
    scale = (g32 * inv).reshape(1, Cout)
    shift = (beta.astype(jnp.float32) - mean * g32 * inv).reshape(1, Cout)

    # ---- pass 2: normalize + write NCHW blocks directly (no wrapper output transpose) ----
    ce2 = pl.CostEstimate(
        flops=2 * M * Cout, transcendentals=0,
        bytes_accessed=M * Cout * 2 + M * Cout * 4 + 2 * Cout * 4)
    out3 = pl.pallas_call(
        _bn_apply_nchw_kernel,
        out_shape=jax.ShapeDtypeStruct((N, Cout, H * W), jnp.float32),
        grid=(N, R),
        in_specs=[
            pl.BlockSpec((TH * W, Cout), lambda n, r: (n * R + r, 0)),
            pl.BlockSpec((1, Cout), lambda n, r: (0, 0)),
            pl.BlockSpec((1, Cout), lambda n, r: (0, 0)),
        ],
        out_specs=pl.BlockSpec((1, Cout, TH * W), lambda n, r: (n, 0, r)),
        compiler_params=cparams,
        cost_estimate=ce2,
    )(y, scale, shift)

    # Metadata-only reshape (row-major split of the last dim) -> (N, Cout, H, W).
    return out3.reshape(N, Cout, H, W)


if __name__ == "__main__":
    key = jax.random.PRNGKey(0)
    k_x, k_w = jax.random.split(key)

    # ConvBlock(in_channels=4, out_channels=8, kernel_size=3)
    N, Cin, Cout, H, W, K = 2, 4, 8, 16, 16, 3
    x = jax.random.normal(k_x, (N, Cin, H, W), jnp.float32)
    w = jax.random.normal(k_w, (Cout, Cin, K, K), jnp.float32) * 0.1   # Conv2d weight
    gamma = jnp.ones((Cout,), jnp.float32)    # BatchNorm2d.weight default init
    beta = jnp.zeros((Cout,), jnp.float32)    # BatchNorm2d.bias default init

    fwd = jax.jit(conv_block_forward)
    out = jax.block_until_ready(fwd(x, w, gamma, beta))
    assert out.shape == (N, Cout, H, W)

    # Pure-JAX reference matching the kernel's numerics (bf16 conv operands, f32 accumulation,
    # f32 BN statistics, bf16 conv+ReLU intermediate before the BN affine).
    conv = jax.lax.conv_general_dilated(
        x.astype(jnp.bfloat16), w.astype(jnp.bfloat16),
        window_strides=(1, 1), padding=[(1, 1), (1, 1)],
        dimension_numbers=("NCHW", "OIHW", "NCHW"),
        preferred_element_type=jnp.float32)
    act = jnp.maximum(conv, 0.0)
    r_mean = jnp.mean(act, axis=(0, 2, 3), keepdims=True)
    r_var = jnp.mean((act - r_mean) ** 2, axis=(0, 2, 3), keepdims=True)
    r_inv = jax.lax.rsqrt(r_var + 1e-5)
    r_scale = gamma.reshape(1, -1, 1, 1) * r_inv
    r_shift = beta.reshape(1, -1, 1, 1) - r_mean * r_scale
    ref = act.astype(jnp.bfloat16).astype(jnp.float32) * r_scale + r_shift

    err = jnp.abs(out - ref)
    max_err = float(jnp.max(err))
    mean_err = float(jnp.mean(err))
    assert max_err < 5e-2 and mean_err < 2e-3, (
        "mismatch vs reference: max=%g mean=%g" % (max_err, mean_err))
    print("KERNEL_OK")
</pallas_src>

<mosaic_0001>
module attributes {stable_mosaic.version = 11 : i64} {
  func.func @_conv_relu_stats_kernel(%arg0: i32, %arg1: i32, %arg2: memref<1x16x18x4xbf16, #tpu.memory_space<vmem>>, %arg3: memref<1x1x18x4xbf16, #tpu.memory_space<vmem>>, %arg4: memref<1x1x18x4xbf16, #tpu.memory_space<vmem>>, %arg5: memref<3x12x8xbf16, #tpu.memory_space<vmem>>, %arg6: memref<256x8xbf16, #tpu.memory_space<vmem>>, %arg7: memref<1x2x8xf32, #tpu.memory_space<vmem>>, %arg8: memref<18x18x4xbf16, #tpu.memory_space<vmem>>) attributes {dimension_semantics = [#tpu.dimension_semantics<parallel>, #tpu.dimension_semantics<parallel>], iteration_bounds = array<i64: 2, 1>, scalar_prefetch = 0 : i64, scratch_operands = 1 : i64, tpu.core_type = #tpu.core_type<tc>, window_params = [{transform_indices = @transform_0, window_bounds = array<i64: 1, 16, 18, 4>}, {transform_indices = @transform_1, window_bounds = array<i64: 1, 1, 18, 4>}, {transform_indices = @transform_2, window_bounds = array<i64: 1, 1, 18, 4>}, {pipeline_mode = #tpu.pipeline_mode<synchronous>, transform_indices = @transform_3, window_bounds = array<i64: 3, 12, 8>}, {transform_indices = @transform_4, window_bounds = array<i64: 256, 8>}, {transform_indices = @transform_5, window_bounds = array<i64: 1, 2, 8>}]} {
    %c0 = arith.constant 0 : index
    %c0_0 = arith.constant 0 : index
    %c0_1 = arith.constant 0 : index
    %c0_2 = arith.constant 0 : index
    %0 = vector.load %arg2[%c0, %c0_0, %c0_1, %c0_2] : memref<1x16x18x4xbf16, #tpu.memory_space<vmem>>, vector<1x16x18x4xbf16>
    %1 = vector.shape_cast %0 : vector<1x16x18x4xbf16> to vector<16x18x4xbf16>
    %c1 = arith.constant 1 : index
    %c0_3 = arith.constant 0 : index
    %c0_4 = arith.constant 0 : index
    %2 = vector.load %arg8[%c1, %c0_3, %c0_4] : memref<18x18x4xbf16, #tpu.memory_space<vmem>>, vector<16x18x4xbf16>
    tpu.vector_store %arg8[%c1, %c0_3, %c0_4], %1 {strides = array<i32>} : memref<18x18x4xbf16, #tpu.memory_space<vmem>>, vector<16x18x4xbf16>,
    %c0_5 = arith.constant 0 : index
    %c0_6 = arith.constant 0 : index
    %c0_7 = arith.constant 0 : index
    %c0_8 = arith.constant 0 : index
    %3 = vector.load %arg3[%c0_5, %c0_6, %c0_7, %c0_8] : memref<1x1x18x4xbf16, #tpu.memory_space<vmem>>, vector<1x1x18x4xbf16>
    %4 = vector.shape_cast %3 : vector<1x1x18x4xbf16> to vector<1x18x4xbf16>
    %c0_9 = arith.constant 0 : index
    %c0_10 = arith.constant 0 : index
    %c0_11 = arith.constant 0 : index
    %5 = vector.load %arg8[%c0_9, %c0_10, %c0_11] : memref<18x18x4xbf16, #tpu.memory_space<vmem>>, vector<1x18x4xbf16>
    tpu.vector_store %arg8[%c0_9, %c0_10, %c0_11], %4 {strides = array<i32>} : memref<18x18x4xbf16, #tpu.memory_space<vmem>>, vector<1x18x4xbf16>,
    %c0_12 = arith.constant 0 : index
    %c0_13 = arith.constant 0 : index
    %c0_14 = arith.constant 0 : index
    %c0_15 = arith.constant 0 : index
    %6 = vector.load %arg4[%c0_12, %c0_13, %c0_14, %c0_15] : memref<1x1x18x4xbf16, #tpu.memory_space<vmem>>, vector<1x1x18x4xbf16>
    %7 = vector.shape_cast %6 : vector<1x1x18x4xbf16> to vector<1x18x4xbf16>
    %c17 = arith.constant 17 : index
    %c0_16 = arith.constant 0 : index
    %c0_17 = arith.constant 0 : index
    %8 = vector.load %arg8[%c17, %c0_16, %c0_17] : memref<18x18x4xbf16, #tpu.memory_space<vmem>>, vector<1x18x4xbf16>
    tpu.vector_store %arg8[%c17, %c0_16, %c0_17], %7 {strides = array<i32>} : memref<18x18x4xbf16, #tpu.memory_space<vmem>>, vector<1x18x4xbf16>,
    %c0_i32 = arith.constant 0 : i32
    %9 = arith.cmpi eq, %arg1, %c0_i32 : i32
    %10 = arith.extui %9 : i1 to i32
    %c0_i32_18 = arith.constant 0 : i32
    %11 = arith.cmpi ne, %10, %c0_i32_18 : i32
    scf.if %11 {
      %cst_68 = arith.constant 0.000000e+00 : bf16
      %61 = vector.broadcast %cst_68 : bf16 to vector<1x18x4xbf16>
      %c0_69 = arith.constant 0 : index
      %c0_70 = arith.constant 0 : index
      %c0_71 = arith.constant 0 : index
      %62 = vector.load %arg8[%c0_69, %c0_70, %c0_71] : memref<18x18x4xbf16, #tpu.memory_space<vmem>>, vector<1x18x4xbf16>
      tpu.vector_store %arg8[%c0_69, %c0_70, %c0_71], %61 {strides = array<i32>} : memref<18x18x4xbf16, #tpu.memory_space<vmem>>, vector<1x18x4xbf16>,
    } else {
    }
    %c0_i32_19 = arith.constant 0 : i32
    %12 = arith.cmpi eq, %arg1, %c0_i32_19 : i32
    %13 = arith.extui %12 : i1 to i32
    %c0_i32_20 = arith.constant 0 : i32
    %14 = arith.cmpi ne, %13, %c0_i32_20 : i32
    scf.if %14 {
      %cst_68 = arith.constant 0.000000e+00 : bf16
      %61 = vector.broadcast %cst_68 : bf16 to vector<1x18x4xbf16>
      %c17_69 = arith.constant 17 : index
      %c0_70 = arith.constant 0 : index
      %c0_71 = arith.constant 0 : index
      %62 = vector.load %arg8[%c17_69, %c0_70, %c0_71] : memref<18x18x4xbf16, #tpu.memory_space<vmem>>, vector<1x18x4xbf16>
      tpu.vector_store %arg8[%c17_69, %c0_70, %c0_71], %61 {strides = array<i32>} : memref<18x18x4xbf16, #tpu.memory_space<vmem>>, vector<1x18x4xbf16>,
    } else {
    }
    %cst = arith.constant 0.000000e+00 : f32
    %15 = vector.broadcast %cst : f32 to vector<256x8xf32>
    %c0_21 = arith.constant 0 : index
    %c0_22 = arith.constant 0 : index
    %c0_23 = arith.constant 0 : index
    %16 = vector.load %arg8[%c0_21, %c0_22, %c0_23] : memref<18x18x4xbf16, #tpu.memory_space<vmem>>, vector<16x16x4xbf16>
    %c0_24 = arith.constant 0 : index
    %c1_25 = arith.constant 1 : index
    %c0_26 = arith.constant 0 : index
    %17 = vector.load %arg8[%c0_24, %c1_25, %c0_26] : memref<18x18x4xbf16, #tpu.memory_space<vmem>>, vector<16x16x4xbf16>
    %c0_27 = arith.constant 0 : index
    %c2 = arith.constant 2 : index
    %c0_28 = arith.constant 0 : index
    %18 = vector.load %arg8[%c0_27, %c2, %c0_28] : memref<18x18x4xbf16, #tpu.memory_space<vmem>>, vector<16x16x4xbf16>
    %19 = tpu.concatenate %16, %17, %18 in 2 : vector<16x16x4xbf16>, vector<16x16x4xbf16>, vector<16x16x4xbf16> -> vector<16x16x12xbf16>
    %20 = vector.shape_cast %19 : vector<16x16x12xbf16> to vector<256x12xbf16>
    %c0_29 = arith.constant 0 : index
    %c0_30 = arith.constant 0 : index
    %c0_31 = arith.constant 0 : index
    %21 = vector.load %arg5[%c0_29, %c0_30, %c0_31] : memref<3x12x8xbf16, #tpu.memory_space<vmem>>, vector<1x12x8xbf16>
    %22 = vector.shape_cast %21 : vector<1x12x8xbf16> to vector<12x8xbf16>
    %cst_32 = arith.constant dense<0.000000e+00> : vector<256x8xf32>
    %23 = tpu.matmul %20, %22, %cst_32 {dimension_numbers = #tpu.dot_dimension_numbers<[1], [0], [0], [1], [0, 0, 1, 1], [], []>} : vector<256x12xbf16>, vector<12x8xbf16>, vector<256x8xf32> -> vector<256x8xf32>
    %24 = arith.addf %15, %23 : vector<256x8xf32>
    %c1_33 = arith.constant 1 : index
    %c0_34 = arith.constant 0 : index
    %c0_35 = arith.constant 0 : index
    %25 = vector.load %arg8[%c1_33, %c0_34, %c0_35] : memref<18x18x4xbf16, #tpu.memory_space<vmem>>, vector<16x16x4xbf16>
    %c1_36 = arith.constant 1 : index
    %c1_37 = arith.constant 1 : index
    %c0_38 = arith.constant 0 : index
    %26 = vector.load %arg8[%c1_36, %c1_37, %c0_38] : memref<18x18x4xbf16, #tpu.memory_space<vmem>>, vector<16x16x4xbf16>
    %c1_39 = arith.constant 1 : index
    %c2_40 = arith.constant 2 : index
    %c0_41 = arith.constant 0 : index
    %27 = vector.load %arg8[%c1_39, %c2_40, %c0_41] : memref<18x18x4xbf16, #tpu.memory_space<vmem>>, vector<16x16x4xbf16>
    %28 = tpu.concatenate %25, %26, %27 in 2 : vector<16x16x4xbf16>, vector<16x16x4xbf16>, vector<16x16x4xbf16> -> vector<16x16x12xbf16>
    %29 = vector.shape_cast %28 : vector<16x16x12xbf16> to vector<256x12xbf16>
    %c1_42 = arith.constant 1 : index
    %c0_43 = arith.constant 0 : index
    %c0_44 = arith.constant 0 : index
    %30 = vector.load %arg5[%c1_42, %c0_43, %c0_44] : memref<3x12x8xbf16, #tpu.memory_space<vmem>>, vector<1x12x8xbf16>
    %31 = vector.shape_cast %30 : vector<1x12x8xbf16> to vector<12x8xbf16>
    %cst_45 = arith.constant dense<0.000000e+00> : vector<256x8xf32>
    %32 = tpu.matmul %29, %31, %cst_45 {dimension_numbers = #tpu.dot_dimension_numbers<[1], [0], [0], [1], [0, 0, 1, 1], [], []>} : vector<256x12xbf16>, vector<12x8xbf16>, vector<256x8xf32> -> vector<256x8xf32>
    %33 = arith.addf %24, %32 : vector<256x8xf32>
    %c2_46 = arith.constant 2 : index
    %c0_47 = arith.constant 0 : index
    %c0_48 = arith.constant 0 : index
    %34 = vector.load %arg8[%c2_46, %c0_47, %c0_48] : memref<18x18x4xbf16, #tpu.memory_space<vmem>>, vector<16x16x4xbf16>
    %c2_49 = arith.constant 2 : index
    %c1_50 = arith.constant 1 : index
    %c0_51 = arith.constant 0 : index
    %35 = vector.load %arg8[%c2_49, %c1_50, %c0_51] : memref<18x18x4xbf16, #tpu.memory_space<vmem>>, vector<16x16x4xbf16>
    %c2_52 = arith.constant 2 : index
    %c2_53 = arith.constant 2 : index
    %c0_54 = arith.constant 0 : index
    %36 = vector.load %arg8[%c2_52, %c2_53, %c0_54] : memref<18x18x4xbf16, #tpu.memory_space<vmem>>, vector<16x16x4xbf16>
    %37 = tpu.concatenate %34, %35, %36 in 2 : vector<16x16x4xbf16>, vector<16x16x4xbf16>, vector<16x16x4xbf16> -> vector<16x16x12xbf16>
    %38 = vector.shape_cast %37 : vector<16x16x12xbf16> to vector<256x12xbf16>
    %c2_55 = arith.constant 2 : index
    %c0_56 = arith.constant 0 : index
    %c0_57 = arith.constant 0 : index
    %39 = vector.load %arg5[%c2_55, %c0_56, %c0_57] : memref<3x12x8xbf16, #tpu.memory_space<vmem>>, vector<1x12x8xbf16>
    %40 = vector.shape_cast %39 : vector<1x12x8xbf16> to vector<12x8xbf16>
    %cst_58 = arith.constant dense<0.000000e+00> : vector<256x8xf32>
    %41 = tpu.matmul %38, %40, %cst_58 {dimension_numbers = #tpu.dot_dimension_numbers<[1], [0], [0], [1], [0, 0, 1, 1], [], []>} : vector<256x12xbf16>, vector<12x8xbf16>, vector<256x8xf32> -> vector<256x8xf32>
    %42 = arith.addf %33, %41 : vector<256x8xf32>
    %cst_59 = arith.constant 0.000000e+00 : f32
    %43 = vector.broadcast %cst_59 : f32 to vector<256x8xf32>
    %44 = arith.maximumf %42, %43 : vector<256x8xf32>
    %45 = arith.truncf %44 : vector<256x8xf32> to vector<256x8xbf16>
    %c0_60 = arith.constant 0 : index
    %c0_61 = arith.constant 0 : index
    %46 = vector.load %arg6[%c0_60, %c0_61] : memref<256x8xbf16, #tpu.memory_space<vmem>>, vector<256x8xbf16>
    tpu.vector_store %arg6[%c0_60, %c0_61], %45 {strides = array<i32>} : memref<256x8xbf16, #tpu.memory_space<vmem>>, vector<256x8xbf16>,
    %cst_62 = arith.constant dense<0.000000e+00> : vector<8xf32>
    %47 = vector.multi_reduction <add>, %44, %cst_62 [0] : vector<256x8xf32> to vector<8xf32>
    %48 = vector.shape_cast %47 : vector<8xf32> to vector<1x8xf32>
    %cst_63 = arith.constant 3.906250e-03 : f32
    %49 = vector.broadcast %cst_63 : f32 to vector<1x8xf32>
    %50 = arith.mulf %48, %49 : vector<1x8xf32>
    %51 = vector.broadcast %50 : vector<1x8xf32> to vector<256x8xf32>
    %52 = arith.subf %44, %51 : vector<256x8xf32>
    %53 = vector.broadcast %50 : vector<1x8xf32> to vector<256x8xf32>
    %54 = arith.subf %44, %53 : vector<256x8xf32>
    %55 = arith.mulf %52, %54 : vector<256x8xf32>
    %cst_64 = arith.constant dense<0.000000e+00> : vector<8xf32>
    %56 = vector.multi_reduction <add>, %55, %cst_64 [0] : vector<256x8xf32> to vector<8xf32>
    %57 = vector.shape_cast %56 : vector<8xf32> to vector<1x8xf32>
    %58 = tpu.concatenate %48, %57 in 0 : vector<1x8xf32>, vector<1x8xf32> -> vector<2x8xf32>
    %59 = vector.shape_cast %58 : vector<2x8xf32> to vector<1x2x8xf32>
    %c0_65 = arith.constant 0 : index
    %c0_66 = arith.constant 0 : index
    %c0_67 = arith.constant 0 : index
    %60 = vector.load %arg7[%c0_65, %c0_66, %c0_67] : memref<1x2x8xf32, #tpu.memory_space<vmem>>, vector<1x2x8xf32>
    tpu.vector_store %arg7[%c0_65, %c0_66, %c0_67], %59 {strides = array<i32>} : memref<1x2x8xf32, #tpu.memory_space<vmem>>, vector<1x2x8xf32>,
    return
  }
  func.func @transform_0(%arg0: i32, %arg1: i32) -> (i32, i32, i32, i32) {
    %c0_i32 = arith.constant 0 : i32
    %c0_i32_0 = arith.constant 0 : i32
    %c0_i32_1 = arith.constant 0 : i32
    return %arg0, %arg1, %c0_i32, %c0_i32_0 : i32, i32, i32, i32
  }
  func.func @transform_1(%arg0: i32, %arg1: i32) -> (i32, i32, i32, i32) {
    %c16_i32 = arith.constant 16 : i32
    %0 = arith.muli %arg1, %c16_i32 : i32
    %c1_i32 = arith.constant 1 : i32
    %1 = arith.subi %0, %c1_i32 : i32
    %c0_i32 = arith.constant 0 : i32
    %2 = arith.maxsi %1, %c0_i32 : i32
    %c0_i32_0 = arith.constant 0 : i32
    %c0_i32_1 = arith.constant 0 : i32
    %c0_i32_2 = arith.constant 0 : i32
    return %arg0, %2, %c0_i32_0, %c0_i32_1 : i32, i32, i32, i32
  }
  func.func @transform_2(%arg0: i32, %arg1: i32) -> (i32, i32, i32, i32) {
    %c1_i32 = arith.constant 1 : i32
    %0 = arith.addi %arg1, %c1_i32 : i32
    %c16_i32 = arith.constant 16 : i32
    %1 = arith.muli %0, %c16_i32 : i32
    %c15_i32 = arith.constant 15 : i32
    %2 = arith.minsi %1, %c15_i32 : i32
    %c0_i32 = arith.constant 0 : i32
    %c0_i32_0 = arith.constant 0 : i32
    %c0_i32_1 = arith.constant 0 : i32
    return %arg0, %2, %c0_i32, %c0_i32_0 : i32, i32, i32, i32
  }
  func.func @transform_3(%arg0: i32, %arg1: i32) -> (i32, i32, i32) {
    %c0_i32 = arith.constant 0 : i32
    %c0_i32_0 = arith.constant 0 : i32
    %c0_i32_1 = arith.constant 0 : i32
    %c0_i32_2 = arith.constant 0 : i32
    return %c0_i32, %c0_i32_0, %c0_i32_1 : i32, i32, i32
  }
  func.func @transform_4(%arg0: i32, %arg1: i32) -> (i32, i32) {
    %c1_i32 = arith.constant 1 : i32
    %0 = arith.muli %arg0, %c1_i32 : i32
    %1 = arith.addi %0, %arg1 : i32
    %c0_i32 = arith.constant 0 : i32
    %c0_i32_0 = arith.constant 0 : i32
    return %1, %c0_i32 : i32, i32
  }
  func.func @transform_5(%arg0: i32, %arg1: i32) -> (i32, i32, i32) {
    %c1_i32 = arith.constant 1 : i32
    %0 = arith.muli %arg0, %c1_i32 : i32
    %1 = arith.addi %0, %arg1 : i32
    %c0_i32 = arith.constant 0 : i32
    %c0_i32_0 = arith.constant 0 : i32
    %c0_i32_1 = arith.constant 0 : i32
    return %1, %c0_i32, %c0_i32_0 : i32, i32, i32
  }
}

module attributes {stable_mosaic.version = 11 : i64} {
  func.func @_bn_apply_nchw_kernel(%arg0: i32, %arg1: i32, %arg2: memref<256x8xbf16, #tpu.memory_space<vmem>>, %arg3: memref<1x8xf32, #tpu.memory_space<vmem>>, %arg4: memref<1x8xf32, #tpu.memory_space<vmem>>, %arg5: memref<1x8x256xf32, #tpu.memory_space<vmem>>) attributes {dimension_semantics = [#tpu.dimension_semantics<parallel>, #tpu.dimension_semantics<parallel>], iteration_bounds = array<i64: 2, 1>, scalar_prefetch = 0 : i64, scratch_operands = 0 : i64, tpu.core_type = #tpu.core_type<tc>, window_params = [{transform_indices = @transform_0, window_bounds = array<i64: 256, 8>}, {pipeline_mode = #tpu.pipeline_mode<synchronous>, transform_indices = @transform_1, window_bounds = array<i64: 1, 8>}, {pipeline_mode = #tpu.pipeline_mode<synchronous>, transform_indices = @transform_2, window_bounds = array<i64: 1, 8>}, {transform_indices = @transform_3, window_bounds = array<i64: 1, 8, 256>}]} {
    %c0 = arith.constant 0 : index
    %c0_0 = arith.constant 0 : index
    %0 = vector.load %arg2[%c0, %c0_0] : memref<256x8xbf16, #tpu.memory_space<vmem>>, vector<256x8xbf16>
    %1 = arith.extf %0 : vector<256x8xbf16> to vector<256x8xf32>
    %c0_1 = arith.constant 0 : index
    %c0_2 = arith.constant 0 : index
    %2 = vector.load %arg3[%c0_1, %c0_2] : memref<1x8xf32, #tpu.memory_space<vmem>>, vector<1x8xf32>
    %3 = vector.broadcast %2 : vector<1x8xf32> to vector<256x8xf32>
    %4 = arith.mulf %1, %3 : vector<256x8xf32>
    %c0_3 = arith.constant 0 : index
    %c0_4 = arith.constant 0 : index
    %5 = vector.load %arg4[%c0_3, %c0_4] : memref<1x8xf32, #tpu.memory_space<vmem>>, vector<1x8xf32>
    %6 = vector.broadcast %5 : vector<1x8xf32> to vector<256x8xf32>
    %7 = arith.addf %4, %6 : vector<256x8xf32>
    %8 = tpu.transpose %7, [1, 0] : vector<256x8xf32> -> vector<8x256xf32>
    %9 = vector.shape_cast %8 : vector<8x256xf32> to vector<1x8x256xf32>
    %c0_5 = arith.constant 0 : index
    %c0_6 = arith.constant 0 : index
    %c0_7 = arith.constant 0 : index
    %10 = vector.load %arg5[%c0_5, %c0_6, %c0_7] : memref<1x8x256xf32, #tpu.memory_space<vmem>>, vector<1x8x256xf32>
    tpu.vector_store %arg5[%c0_5, %c0_6, %c0_7], %9 {strides = array<i32>} : memref<1x8x256xf32, #tpu.memory_space<vmem>>, vector<1x8x256xf32>,
    return
  }
  func.func @transform_0(%arg0: i32, %arg1: i32) -> (i32, i32) {
    %c1_i32 = arith.constant 1 : i32
    %0 = arith.muli %arg0, %c1_i32 : i32
    %1 = arith.addi %0, %arg1 : i32
    %c0_i32 = arith.constant 0 : i32
    %c0_i32_0 = arith.constant 0 : i32
    return %1, %c0_i32 : i32, i32
  }
  func.func @transform_1(%arg0: i32, %arg1: i32) -> (i32, i32) {
    %c0_i32 = arith.constant 0 : i32
    %c0_i32_0 = arith.constant 0 : i32
    %c0_i32_1 = arith.constant 0 : i32
    return %c0_i32, %c0_i32_0 : i32, i32
  }
  func.func @transform_2(%arg0: i32, %arg1: i32) -> (i32, i32) {
    %c0_i32 = arith.constant 0 : i32
    %c0_i32_0 = arith.constant 0 : i32
    %c0_i32_1 = arith.constant 0 : i32
    return %c0_i32, %c0_i32_0 : i32, i32
  }
  func.func @transform_3(%arg0: i32, %arg1: i32) -> (i32, i32, i32) {
    %c0_i32 = arith.constant 0 : i32
    %c0_i32_0 = arith.constant 0 : i32
    return %arg0, %c0_i32, %arg1 : i32, i32, i32
  }
}

</mosaic_0001>

<bundles_post_ra>
// kernel: conv_block_forward.3
= control target key start
LH: loop header
LB: loop body
LE: loop exit
PB: predicated region body
PF: predicated region fallthrough
CT: control target
= control target key end

     0   :  { %s653_s12 = smov 0   ;;  %s655_s13 = smov 0   ;;  %s783_s0 = inlined_call_operand.vmem [shape: bf16[512,8], index: 0, kind: input, shape index: {}]   ;;  %s784_s1 = inlined_call_operand.vmem [shape: f32[1,8], index: 1, kind: input, shape index: {}]   ;;  %s785_s2 = inlined_call_operand.vmem [shape: f32[1,8], index: 2, kind: input, shape index: {}]   ;;  %s786_s3 = inlined_call_operand.vmem [shape: f32[2,8,256], index: 3, kind: output, shape index: {}]  }
   0x1   :  { %s657_s14 = smov 0  }
   0x2 LB: > { %s25_s15 = sadd.s32 1, %s627_s13  ;;  %p496_p0 = scmp.ge.s32.totalorder %s631_s14, 1  ;;  %s631_s14 = sphi %s657_s14, %s13_s14   ;;  %s627_s13 = sphi %s655_s13, %s788_s13   ;;  %s623_s12 = sphi %s653_s12, %s787_s12  }
   0x3   : > { %p27_p1 = scmp.ge.s32.totalorder %s25_s15, 2  ;;  %p156_p2 = scmp.lt.s32.totalorder %s631_s14, 3 }
   0x5   : > { %s790_s15 = smov (%p27_p1, %s25_s15), 0  ;;  %p157_p3 = pnand %p496_p0, %p156_p2 }
   0x6   : > { %s497_s16 = sshll.u32 (!%p157_p3), %s623_s12, 5  ;;  %v682_v0 = vld [vmem:[%s784_s1] ss:$0 sm:$0xff] (!%p157_p3)  ;;  %p194_p5 = scmp.lt.s32.totalorder (!%p157_p3), %s623_s12, 1 }
   0x7   : > { %160 = sbr.rel (%p157_p3) target bundleno = 155 (0x9b), region = 32  ;;  %p187_p4 = scmp.lt.s32.totalorder (!%p157_p3), %s497_s16, 63  ;;  %v691_v9 = vld [vmem:[%s785_s2] ss:$0 sm:$0xff] (!%p157_p3) }
   0xe   : > { %s792_s16 = smov (!%p187_p4, %s497_s16), 63  ;;  %s794_s12 = smov (!%p194_p5, %s623_s12), 1 }
   0xf   : > { %s498_s17 = sshll.u32 %s792_s16, 2  ;;  %s505_s25 = sshll.u32 %s794_s12, 4 }
  0x10   : > { %s677_s20 = scalar_lea.vmem %s783_s0, %s498_s17  ;;  %s201_s28 = scalar_lea.vmem %s786_s3, %s505_s25 }
  0x11   : > { %v577_v1 = vld [vmem:[%s677_s20 + $0x40] sm:$0xff]   ;;  %v578_v3 = vld [vmem:[%s677_s20 + $0x48] sm:$0xff]   ;;  %v579_v24 = vld [vmem:[%s677_s20 + $0x50] sm:$0xff]  }
  0x12   : > { %v507_v2 = vld [vmem:[%s677_s20] sm:$0xff]   ;;  %v540_v4 = vunpack.c.l.bf16 %v577_v1  ;;  %v541_v6 = vunpack.c.h.bf16 %v577_v1  ;;  %v570_v8 = vld [vmem:[%s677_s20 + $0x8] sm:$0xff]   ;;  %v544_v10 = vunpack.c.l.bf16 %v578_v3  ;;  %v545_v19 = vunpack.c.h.bf16 %v578_v3  ;;  %v571_v25 = vld [vmem:[%s677_s20 + $0x10] sm:$0xff]  }
  0x13   : > { %v508_v5 = vunpack.c.l.bf16 %v507_v2  ;;  %v509_v7 = vunpack.c.h.bf16 %v507_v2  ;;  %v512_v11 = vunpack.c.l.bf16 %v570_v8  ;;  %v513_v20 = vunpack.c.h.bf16 %v570_v8  ;;  %v580_v38 = vld [vmem:[%s677_s20 + $0x58] sm:$0xff]   ;;  %v581_v52 = vld [vmem:[%s677_s20 + $0x60] sm:$0xff]   ;;  %v582_v3 = vld [vmem:[%s677_s20 + $0x68] sm:$0xff]  }
  0x14   : > { %v290_v12 = vmul.f32 %v540_v4, %v682_v0  ;;  %v291_v14 = vmul.f32 %v541_v6, %v682_v0  ;;  %v292_v18 = vmul.f32 %v544_v10, %v682_v0  ;;  %v293_v26 = vmul.f32 %v545_v19, %v682_v0  ;;  %v572_v39 = vld [vmem:[%s677_s20 + $0x18] sm:$0xff]   ;;  %v573_v53 = vld [vmem:[%s677_s20 + $0x20] sm:$0xff]   ;;  %v574_v4 = vld [vmem:[%s677_s20 + $0x28] sm:$0xff]  }
  0x15   : > { %v274_v13 = vmul.f32 %v508_v5, %v682_v0  ;;  %v275_v15 = vmul.f32 %v509_v7, %v682_v0  ;;  %v276_v23 = vmul.f32 %v512_v11, %v682_v0  ;;  %v277_v27 = vmul.f32 %v513_v20, %v682_v0  ;;  %v575_v19 = vld [vmem:[%s677_s20 + $0x30] sm:$0xff]  }
  0x16   : > { %v329_v16 = vadd.f32 %v691_v9, %v290_v12  ;;  %v330_v21 = vadd.f32 %v691_v9, %v291_v14  ;;  %v331_v28 = vadd.f32 %v691_v9, %v292_v18  ;;  %v548_v30 = vunpack.c.l.bf16 %v579_v24  ;;  %v583_v18 = vld [vmem:[%s677_s20 + $0x70] sm:$0xff]  }
  0x17   : > { %v313_v17 = vadd.f32 %v691_v9, %v274_v13  ;;  %v314_v22 = vadd.f32 %v691_v9, %v275_v15  ;;  %v315_v29 = vadd.f32 %v691_v9, %v276_v23  ;;  %v516_v31 = vunpack.c.l.bf16 %v571_v25 }
  0x18   : > { %377 = vxpose.xlu1.b32.start [1/16] (narrow) %v329_v16, 8  ;;  %v332_v32 = vadd.f32 %v691_v9, %v293_v26  ;;  %v549_v33 = vunpack.c.h.bf16 %v579_v24  ;;  %v316_v34 = vadd.f32 %v691_v9, %v277_v27  ;;  %v294_v35 = vmul.f32 %v548_v30, %v682_v0 }
  0x19   : > { %345 = vxpose.xlu0.b32.start [1/16] (narrow) %v313_v17, 8  ;;  %v278_v36 = vmul.f32 %v516_v31, %v682_v0  ;;  %v517_v37 = vunpack.c.h.bf16 %v571_v25  ;;  %v552_v41 = vunpack.c.l.bf16 %v580_v38  ;;  %v520_v45 = vunpack.c.l.bf16 %v572_v39 }
  0x1a   : > { %v295_v40 = vmul.f32 %v549_v33, %v682_v0  ;;  %v333_v42 = vadd.f32 %v691_v9, %v294_v35  ;;  %v553_v47 = vunpack.c.h.bf16 %v580_v38  ;;  %v521_v51 = vunpack.c.h.bf16 %v572_v39  ;;  %v576_v33 = vld [vmem:[%s677_s20 + $0x38] sm:$0xff]  }
  0x1b   : > { %v317_v43 = vadd.f32 %v691_v9, %v278_v36  ;;  %v279_v44 = vmul.f32 %v517_v37, %v682_v0  ;;  %v296_v46 = vmul.f32 %v552_v41, %v682_v0  ;;  %v280_v50 = vmul.f32 %v520_v45, %v682_v0 }
  0x1c   : > { %378 = vxpose.xlu1.b32.cont [2/16] (narrow) %v330_v21, 8  ;;  %v334_v48 = vadd.f32 %v691_v9, %v295_v40  ;;  %v297_v54 = vmul.f32 %v553_v47, %v682_v0  ;;  %v556_v55 = vunpack.c.l.bf16 %v581_v52  ;;  %v281_v58 = vmul.f32 %v521_v51, %v682_v0 }
  0x1d   : > { %346 = vxpose.xlu0.b32.cont [2/16] (narrow) %v314_v22, 8  ;;  %v318_v49 = vadd.f32 %v691_v9, %v279_v44  ;;  %v335_v56 = vadd.f32 %v691_v9, %v296_v46  ;;  %v319_v57 = vadd.f32 %v691_v9, %v280_v50  ;;  %v524_v59 = vunpack.c.l.bf16 %v573_v53 }
  0x1e   : > { %v336_v60 = vadd.f32 %v691_v9, %v297_v54  ;;  %v298_v61 = vmul.f32 %v556_v55, %v682_v0  ;;  %v320_v62 = vadd.f32 %v691_v9, %v281_v58  ;;  %v557_v1 = vunpack.c.h.bf16 %v581_v52 }
  0x1f   : > { %v282_v63 = vmul.f32 %v524_v59, %v682_v0  ;;  %v525_v2 = vunpack.c.h.bf16 %v573_v53  ;;  %v560_v6 = vunpack.c.l.bf16 %v582_v3  ;;  %v528_v11 = vunpack.c.l.bf16 %v574_v4 }
  0x20   : > { %379 = vxpose.xlu1.b32.cont [3/16] (narrow) %v331_v28, 8  ;;  %v337_v5 = vadd.f32 %v691_v9, %v298_v61  ;;  %v299_v8 = vmul.f32 %v557_v1, %v682_v0  ;;  %v561_v13 = vunpack.c.h.bf16 %v582_v3  ;;  %v529_v17 = vunpack.c.h.bf16 %v574_v4 }
  0x21   : > { %347 = vxpose.xlu0.b32.cont [3/16] (narrow) %v315_v29, 8  ;;  %v321_v7 = vadd.f32 %v691_v9, %v282_v63  ;;  %v283_v10 = vmul.f32 %v525_v2, %v682_v0  ;;  %v300_v12 = vmul.f32 %v560_v6, %v682_v0  ;;  %v284_v16 = vmul.f32 %v528_v11, %v682_v0 }
  0x22   : > { %v338_v14 = vadd.f32 %v691_v9, %v299_v8  ;;  %v301_v20 = vmul.f32 %v561_v13, %v682_v0  ;;  %v564_v21 = vunpack.c.l.bf16 %v583_v18  ;;  %v285_v24 = vmul.f32 %v529_v17, %v682_v0 }
  0x23   : > { %v322_v15 = vadd.f32 %v691_v9, %v283_v10  ;;  %v339_v22 = vadd.f32 %v691_v9, %v300_v12  ;;  %v323_v23 = vadd.f32 %v691_v9, %v284_v16  ;;  %v532_v25 = vunpack.c.l.bf16 %v575_v19 }
  0x24   : > { %380 = vxpose.xlu1.b32.cont [4/16] (narrow) %v332_v32, 8  ;;  %v340_v26 = vadd.f32 %v691_v9, %v301_v20  ;;  %v302_v27 = vmul.f32 %v564_v21, %v682_v0  ;;  %v324_v28 = vadd.f32 %v691_v9, %v285_v24  ;;  %v565_v30 = vunpack.c.h.bf16 %v583_v18  ;;  %v584_v32 = vld [vmem:[%s677_s20 + $0x78] sm:$0xff]  }
  0x25   : > { %348 = vxpose.xlu0.b32.cont [4/16] (narrow) %v316_v34, 8  ;;  %v286_v29 = vmul.f32 %v532_v25, %v682_v0  ;;  %v533_v31 = vunpack.c.h.bf16 %v575_v19  ;;  %v568_v35 = vunpack.c.l.bf16 %v584_v32  ;;  %v536_v39 = vunpack.c.l.bf16 %v576_v33 }
  0x26   : > { %v341_v34 = vadd.f32 %v691_v9, %v302_v27  ;;  %v303_v37 = vmul.f32 %v565_v30, %v682_v0  ;;  %v569_v41 = vunpack.c.h.bf16 %v584_v32  ;;  %v537_v45 = vunpack.c.h.bf16 %v576_v33 }
  0x27   : > { %v325_v36 = vadd.f32 %v691_v9, %v286_v29  ;;  %v287_v38 = vmul.f32 %v533_v31, %v682_v0  ;;  %v304_v40 = vmul.f32 %v568_v35, %v682_v0  ;;  %v288_v44 = vmul.f32 %v536_v39, %v682_v0 }
  0x28   : > { %381 = vxpose.xlu1.b32.cont [5/16] (narrow) %v333_v42, 8  ;;  %v342_v42 = vadd.f32 %v691_v9, %v303_v37  ;;  %v305_v46 = vmul.f32 %v569_v41, %v682_v0 }
  0x29   : > { %349 = vxpose.xlu0.b32.cont [5/16] (narrow) %v317_v43, 8  ;;  %v326_v43 = vadd.f32 %v691_v9, %v287_v38  ;;  %v343_v47 = vadd.f32 %v691_v9, %v304_v40 }
  0x2a   : > { %v344_v50 = vadd.f32 %v691_v9, %v305_v46 }
  0x2c   : > { %382 = vxpose.xlu1.b32.cont [6/16] (narrow) %v334_v48, 8  ;;  %v327_v48 = vadd.f32 %v691_v9, %v288_v44 }
  0x2d   : > { %350 = vxpose.xlu0.b32.cont [6/16] (narrow) %v318_v49, 8  ;;  %v289_v49 = vmul.f32 %v537_v45, %v682_v0 }
  0x2f   : > { %v328_v51 = vadd.f32 %v691_v9, %v289_v49 }
  0x30   : > { %383 = vxpose.xlu1.b32.cont [7/16] (narrow) %v335_v56, 8 }
  0x31   : > { %351 = vxpose.xlu0.b32.cont [7/16] (narrow) %v319_v57, 8 }
  0x34   : > { %384 = vxpose.xlu1.b32.cont [8/16] (narrow) %v336_v60, 8 }
  0x35   : > { %352 = vxpose.xlu0.b32.cont [8/16] (narrow) %v320_v62, 8 }
  0x38   : > { %385 = vxpose.xlu1.b32.cont [9/16] (narrow) %v337_v5, 8 }
  0x39   : > { %353 = vxpose.xlu0.b32.cont [9/16] (narrow) %v321_v7, 8 }
  0x3c   : > { %386 = vxpose.xlu1.b32.cont [10/16] (narrow) %v338_v14, 8 }
  0x3d   : > { %354 = vxpose.xlu0.b32.cont [10/16] (narrow) %v322_v15, 8 }
  0x40   : > { %387 = vxpose.xlu1.b32.cont [11/16] (narrow) %v339_v22, 8 }
  0x41   : > { %355 = vxpose.xlu0.b32.cont [11/16] (narrow) %v323_v23, 8 }
  0x44   : > { %388 = vxpose.xlu1.b32.cont [12/16] (narrow) %v340_v26, 8 }
  0x45   : > { %356 = vxpose.xlu0.b32.cont [12/16] (narrow) %v324_v28, 8 }
  0x48   : > { %389 = vxpose.xlu1.b32.cont [13/16] (narrow) %v341_v34, 8 }
  0x49   : > { %357 = vxpose.xlu0.b32.cont [13/16] (narrow) %v325_v36, 8 }
  0x4c   : > { %390 = vxpose.xlu1.b32.cont [14/16] (narrow) %v342_v42, 8 }
  0x4d   : > { %358 = vxpose.xlu0.b32.cont [14/16] (narrow) %v326_v43, 8 }
  0x50   : > { %391 = vxpose.xlu1.b32.cont [15/16] (narrow) %v343_v47, 8 }
  0x51   : > { %359 = vxpose.xlu0.b32.cont [15/16] (narrow) %v327_v48, 8 }
  0x54   : > { %392 = vxpose.xlu1.b32.end [16/16] (narrow) %v344_v50, 8 }
  0x55   : > { %360 = vxpose.xlu0.b32.end [16/16] (narrow) %v328_v51, 8 }
  0x98   : > { %v393_v52 = vpop.trf.xlu1 }
  0x99   : > { %v361_v53 = vpop.trf.xlu0  ;;  %410 = vst [vmem:[%s201_s28 + $0x8] sm:$0xff] %v393_v52 }
  0x9a   : > { %409 = vst [vmem:[%s201_s28] sm:$0xff] %v361_v53 }
  0x9b PF: > { %s13_s14 = sadd.s32 1, %s631_s14   ;;  %s787_s12 = smov %s627_s13 }
  0x9c   : > { %p10_p6 = scmp.ge.s32.totalorder %s13_s14, 4   ;;  %s788_s13 = smov %s790_s15 }
  0x9e   :  { %12 = sbr.rel (!%p10_p6) target bundleno = 2 (0x2), region = 62 }

// kernel: conv_block_forward.2
= control target key start
LH: loop header
LB: loop body
LE: loop exit
PB: predicated region body
PF: predicated region fallthrough
CT: control target
= control target key end

     0   :  { %s4270_s18 = smov 0   ;;  %s4272_s19 = smov 0   ;;  %s5753_s0 = inlined_call_operand.vmem [shape: bf16[2,16,18,4], index: 0, kind: input, shape index: {}, may-alias: {0,1,2}]   ;;  %s5754_s1 = inlined_call_operand.vmem [shape: bf16[2,16,18,4], index: 1, kind: input, shape index: {}, may-alias: {0,1,2}]   ;;  %s5755_s2 = inlined_call_operand.vmem [shape: bf16[2,16,18,4], index: 2, kind: input, shape index: {}, may-alias: {0,1,2}]   ;;  %s5756_s3 = inlined_call_operand.vmem [shape: bf16[3,12,8], index: 3, kind: input, shape index: {}]   ;;  %s5757_s4 = inlined_call_operand.vmem [shape: bf16[512,8], index: 4, kind: output, shape index: {0}]   ;;  %s5758_s5 = inlined_call_operand.vmem [shape: f32[2,2,8], index: 5, kind: output, shape index: {1}]  }
   0x1   :  { %s4274_s20 = smov 0  }
   0x2 LB: > { %s28_s21 = sadd.s32 1, %s4231_s19  ;;  %p3556_p0 = scmp.ge.s32.totalorder %s4235_s20, 1  ;;  %s4235_s20 = sphi %s4274_s20, %s16_s20   ;;  %s4231_s19 = sphi %s4272_s19, %s5811_s19   ;;  %s4227_s18 = sphi %s4270_s18, %s5810_s18  }
   0x3   : > { %p30_p1 = scmp.ge.s32.totalorder %s28_s21, 2  ;;  %p278_p2 = scmp.lt.s32.totalorder %s4235_s20, 3 }
   0x5   : > { %s5813_s21 = smov (%p30_p1, %s28_s21), 0  ;;  %p279_p3 = pnand %p3556_p0, %p278_p2 }
   0x7   : > { %282 = sbr.rel (%p279_p3) target bundleno = 672 (0x2a0), region = 36 }
   0xe   : > { %p344_p4 = scmp.lt.s32.totalorder %s4227_s18, 1  ;;  %vm452_vm0 = vcmask 27648   ;;  %vm455_vm1 = vcmask 24576   ;;  %vm990_vm2 = vcmask 1046528   ;;  %v5759_v15 = vmov 0   ;;  %s4238_s30 = smov 8  }
   0xf   : > { %vm717_vm3 = vsmask.f32 7424  ;;  %s4239_s6 = smov 4   ;;  %vm1788_vm4 = vcmask 1045504   ;;  %vm1071_vm5 = vcmask 31744   ;;  %vm1104_vm6 = vcmask 64512  }
  0x10   : > { %s4292_s22 = scalar_select %p344_p4, %s4227_s18, 1  ;;  %vm1755_vm7 = vcmask 97280   ;;  %vm3159_vm8 = vcmask 60416   ;;  %vm3395_vm9 = vcmask 1040384   ;;  %vm3397_vm10 = vcmask 58368  }
  0x11   : > { %s3560_s17 = sshll.u32 %s4227_s18, 5 }
  0x12   : > { %s4295_s23 = smul.u32 192, %s4292_s22  ;;  %p390_p5 = scmp.lt.s32.totalorder %s3560_s17, 63 }
  0x13   : > { %s3562_s18 = sshll.u32 %s4292_s22, 1 }
  0x14   : > { %s4301_s26 = scalar_lea.vmem %s5753_s0, %s4295_s23  ;;  %s366_s29 = scalar_lea.vmem %s5754_s1, %s4295_s23 }
  0x15   : > { %v403_v0 = vld [vmem:[%s4301_s26] sm:$0xf]  ;;  %v404_v1 = vld [vmem:[%s4301_s26 + $0x4] sm:$0xf]  ;;  %v405_v2 = vld [vmem:[%s4301_s26 + $0x8] sm:$0x1] }
  0x16   : > { %453 = vst.msk [vmem:[#allocation2 + $0xc] sm:$0xf] %vm452_vm0, %v403_v0  ;;  %454 = vst.msk [vmem:[#allocation2 + $0x10] sm:$0xf] %vm452_vm0, %v404_v1  ;;  %v406_v3 = vld [vmem:[%s4301_s26 + $0xc] sm:$0xf] }
  0x17   : > { %456 = vst.msk [vmem:[#allocation2 + $0x14] sm:$0x1] %vm455_vm1, %v405_v2  ;;  %v407_v4 = vld [vmem:[%s4301_s26 + $0x10] sm:$0xf]  ;;  %v408_v5 = vld [vmem:[%s4301_s26 + $0x14] sm:$0x1] }
  0x18   : > { %457 = vst.msk [vmem:[#allocation2 + $0x18] sm:$0xf] %vm452_vm0, %v406_v3  ;;  %458 = vst.msk [vmem:[#allocation2 + $0x1c] sm:$0xf] %vm452_vm0, %v407_v4  ;;  %v409_v6 = vld [vmem:[%s4301_s26 + $0x18] sm:$0xf] }
  0x19   : > { %459 = vst.msk [vmem:[#allocation2 + $0x20] sm:$0x1] %vm455_vm1, %v408_v5  ;;  %v410_v7 = vld [vmem:[%s4301_s26 + $0x1c] sm:$0xf]  ;;  %v411_v8 = vld [vmem:[%s4301_s26 + $0x20] sm:$0x1] }
  0x1a   : > { %460 = vst.msk [vmem:[#allocation2 + $0x24] sm:$0xf] %vm452_vm0, %v409_v6  ;;  %461 = vst.msk [vmem:[#allocation2 + $0x28] sm:$0xf] %vm452_vm0, %v410_v7  ;;  %v502_v9 = vld [vmem:[%s366_s29] sm:$0xf] }
  0x1b   : > { %462 = vst.msk [vmem:[#allocation2 + $0x2c] sm:$0x1] %vm455_vm1, %v411_v8  ;;  %v503_v10 = vld [vmem:[%s366_s29 + $0x4] sm:$0xf]  ;;  %v504_v11 = vld [vmem:[%s366_s29 + $0x8] sm:$0x1]  ;;  %s400_s29 = scalar_lea.vmem %s5758_s5, %s3562_s18 }
  0x1c   : > { %505 = vst.msk [vmem:[#allocation2] sm:$0xf] %vm452_vm0, %v502_v9  ;;  %506 = vst.msk [vmem:[#allocation2 + $0x4] sm:$0xf] %vm452_vm0, %v503_v10  ;;  %v412_v12 = vld [vmem:[%s4301_s26 + $0x24] sm:$0xf] }
  0x1d   : > { %507 = vst.msk [vmem:[#allocation2 + $0x8] sm:$0x1] %vm455_vm1, %v504_v11  ;;  %v413_v13 = vld [vmem:[%s4301_s26 + $0x28] sm:$0xf]  ;;  %v414_v14 = vld [vmem:[%s4301_s26 + $0x2c] sm:$0x1] }
  0x1e   : > { %519 = vst.msk [vmem:[#allocation2] sm:$0xf] %vm452_vm0, %v5759_v15  ;;  %520 = vst.msk [vmem:[#allocation2 + $0x4] sm:$0xf] %vm452_vm0, %v5759_v15  ;;  %v415_v16 = vld [vmem:[%s4301_s26 + $0x30] sm:$0xf] }
  0x1f   : > { %521 = vst.msk [vmem:[#allocation2 + $0x8] sm:$0x1] %vm455_vm1, %v5759_v15  ;;  %465 = vst.msk [vmem:[#allocation2 + $0x38] sm:$0x1] %vm455_vm1, %v414_v14  ;;  %v416_v17 = vld [vmem:[%s4301_s26 + $0x34] sm:$0xf] }
  0x20   : > { %463 = vst.msk [vmem:[#allocation2 + $0x30] sm:$0xf] %vm452_vm0, %v412_v12  ;;  %464 = vst.msk [vmem:[#allocation2 + $0x34] sm:$0xf] %vm452_vm0, %v413_v13  ;;  %v417_v18 = vld [vmem:[%s4301_s26 + $0x38] sm:$0x1] }
  0x21   : > { %466 = vst.msk [vmem:[#allocation2 + $0x3c] sm:$0xf] %vm452_vm0, %v415_v16  ;;  %467 = vst.msk [vmem:[#allocation2 + $0x40] sm:$0xf] %vm452_vm0, %v416_v17  ;;  %v418_v19 = vld [vmem:[%s4301_s26 + $0x3c] sm:$0xf] }
  0x22   : > { %468 = vst.msk [vmem:[#allocation2 + $0x44] sm:$0x1] %vm455_vm1, %v417_v18  ;;  %v419_v20 = vld [vmem:[%s4301_s26 + $0x40] sm:$0xf]  ;;  %v420_v21 = vld [vmem:[%s4301_s26 + $0x44] sm:$0x1] }
  0x23   : > { %469 = vst.msk [vmem:[#allocation2 + $0x48] sm:$0xf] %vm452_vm0, %v418_v19  ;;  %470 = vst.msk [vmem:[#allocation2 + $0x4c] sm:$0xf] %vm452_vm0, %v419_v20  ;;  %v421_v22 = vld [vmem:[%s4301_s26 + $0x48] sm:$0xf] }
  0x24   : > { %471 = vst.msk [vmem:[#allocation2 + $0x50] sm:$0x1] %vm455_vm1, %v420_v21  ;;  %v422_v23 = vld [vmem:[%s4301_s26 + $0x4c] sm:$0xf]  ;;  %v423_v24 = vld [vmem:[%s4301_s26 + $0x50] sm:$0x1] }
  0x25   : > { %v1140_v25 = vld [vmem:[#allocation2 + $0x10] sm:$0xf]  ;;  %v1187_v26 = vld [vmem:[#allocation2 + $0xc] sm:$0xe]  ;;  %472 = vst.msk [vmem:[#allocation2 + $0x54] sm:$0xf] %vm452_vm0, %v421_v22 }
  0x26   : > { %473 = vst.msk [vmem:[#allocation2 + $0x58] sm:$0xf] %vm452_vm0, %v422_v23  ;;  %v4083_v27 = vld [vmem:[#allocation2 + $0x14] ss:$0 sps:$4 sm:$0x11]   ;;  %v3643_v28 = vcombine.low %v1187_v26, %v1140_v25  ;;  %s3797_s11 = sadd.s32 180, %s4295_s23 }
  0x27   : > { %474 = vst.msk [vmem:[#allocation2 + $0x5c] sm:$0x1] %vm455_vm1, %v423_v24  ;;  %v1139_v29 = vld [vmem:[#allocation2 + $0xc] sm:$0xf]  ;;  %v528_v31 = vld [vmem:[#allocation2 + $0x10] sm:$0xf]  ;;  %s383_s14 = scalar_lea.vmem %s5755_s2, %s3797_s11 }
  0x28   : > { %v4358_v30 = vcombine.low %v1139_v29, %v1140_v25  ;;  %v574_v32 = vld [vmem:[#allocation2 + $0xc] sm:$0xe]  ;;  %v1603_v33 = vrot.slane %v3643_v28, 1  ;;  %v1604_v34 = vrot.slane %v4083_v27, 1  ;;  %v1339_v37 = vshll.u32 %v4083_v27, 16  ;;  %s5815_s17 = smov (!%p390_p5, %s3560_s17), 63 }
  0x29   : > { %v4360_v35 = vld [vmem:[#allocation2 + $0x14] ss:$0 sps:$4 sm:$0x11]   ;;  %v3596_v36 = vcombine.low %v574_v32, %v528_v31  ;;  %v527_v38 = vld [vmem:[#allocation2 + $0xc] sm:$0xf]  ;;  %s3561_s23 = sshll.u32 %s5815_s17, 2 }
  0x2a   : > { %v1141_v39 = vld [vmem:[#allocation2 + $0x18] sm:$0xf]  ;;  %v1142_v40 = vld [vmem:[#allocation2 + $0x1c] sm:$0xf]  ;;  %v1605_v41 = vsel %vm990_vm2, %v1603_v33, %v1604_v34  ;;  %v995_v43 = vrot.slane %v4360_v35, 1  ;;  %v4364_v44 = vcombine.low %v527_v38, %v528_v31  ;;  %v1332_v49 = vshrl.u32 %v4358_v30, 16 }
  0x2b   : > { %v994_v42 = vrot.slane %v3596_v36, 1  ;;  %v1188_v45 = vld [vmem:[#allocation2 + $0x18] sm:$0xe]  ;;  %1651 = vrot.lane.b32.xlu1 %v1605_v41, %s4238_s30  ;;  %v4367_v46 = vcombine.low %v1141_v39, %v1142_v40  ;;  %v4090_v47 = vld [vmem:[#allocation2 + $0x20] ss:$0 sps:$4 sm:$0x11]  }
  0x2c   : > { %v3644_v48 = vcombine.low %v1188_v45, %v1142_v40  ;;  %v1334_v50 = vshll.u32 %v4358_v30, 16  ;;  %v1341_v52 = vrot.slane %v1339_v37, 1  ;;  %v529_v53 = vld [vmem:[#allocation2 + $0x18] sm:$0xf]  ;;  %v530_v54 = vld [vmem:[#allocation2 + $0x1c] sm:$0xf] }
  0x2d   : > { %v996_v51 = vsel %vm990_vm2, %v994_v42, %v995_v43  ;;  %v1607_v56 = vrot.slane %v4090_v47, 1  ;;  %v731_v58 = vshrl.u32 %v4364_v44, 16  ;;  %v575_v59 = vld [vmem:[#allocation2 + $0x18] sm:$0xe]  ;;  %v4374_v60 = vcombine.low %v529_v53, %v530_v54  ;;  %v1144_v3 = vld [vmem:[#allocation2 + $0x28] sm:$0xf] }
  0x2e   : > { %1041 = vrot.lane.b32.xlu0 %v996_v51, %s4238_s30  ;;  %v1606_v55 = vrot.slane %v3644_v48, 1  ;;  %v1336_v57 = vrot.slane %v1334_v50, 1  ;;  %v4093_v61 = vld [vmem:[#allocation2 + $0x20] ss:$0 sps:$4 sm:$0x11]   ;;  %v1344_v62 = vshrl.u32 %v4367_v46, 16  ;;  %v3597_v1 = vcombine.low %v575_v59, %v530_v54 }
  0x2f   : > { %v1346_v2 = vshll.u32 %v4367_v46, 16  ;;  %v998_v4 = vrot.slane %v4093_v61, 1  ;;  %v1351_v5 = vshll.u32 %v4090_v47, 16  ;;  %v1189_v6 = vld [vmem:[#allocation2 + $0x24] sm:$0xe]  ;;  %v743_v14 = vshrl.u32 %v4374_v60, 16 }
  0x30   : > { %v1608_v63 = vsel %vm990_vm2, %v1606_v55, %v1607_v56  ;;  %v1337_v0 = vor.u32 %v1336_v57, %v1332_v49  ;;  %v997_v8 = vrot.slane %v3597_v1, 1  ;;  %v4381_v10 = vld [vmem:[#allocation2 + $0x2c] ss:$0 sps:$4 sm:$0x11]   ;;  %v3645_v11 = vcombine.low %v1189_v6, %v1144_v3  ;;  %v1143_v13 = vld [vmem:[#allocation2 + $0x24] sm:$0xf] }
  0x31   : > { %1653 = vrot.lane.b32.xlu1 %v1608_v63, %s4238_s30  ;;  %v1348_v9 = vrot.slane %v1346_v2, 1  ;;  %v1353_v12 = vrot.slane %v1351_v5, 1  ;;  %v745_v16 = vshll.u32 %v4374_v60, 16  ;;  %v750_v17 = vshll.u32 %v4093_v61, 16  ;;  %v525_v18 = vld [vmem:[#allocation2] sm:$0xf] }
  0x32   : > { %v1342_v7 = vsel %vm717_vm3, %v1337_v0, %v1341_v52  ;;  %v999_v19 = vsel %vm990_vm2, %v997_v8, %v998_v4  ;;  %v1609_v21 = vrot.slane %v3645_v11, 1  ;;  %v1610_v22 = vrot.slane %v4381_v10, 1  ;;  %v526_v23 = vld [vmem:[#allocation2 + $0x4] sm:$0xf]  ;;  %v573_v26 = vld [vmem:[#allocation2] sm:$0xe] }
  0x33   : > { %1523 = vrot.lane.b32.xlu0 %v1342_v7, %s4239_s6  ;;  %v1349_v20 = vor.u32 %v1348_v9, %v1344_v62  ;;  %v747_v24 = vrot.slane %v745_v16, 1  ;;  %v752_v25 = vrot.slane %v750_v17, 1  ;;  %v531_v27 = vld [vmem:[#allocation2 + $0x24] sm:$0xf]  ;;  %v3595_v32 = vcombine.low %v573_v26, %v526_v23  ;;  %v4391_v33 = vld [vmem:[#allocation2 + $0x28] sm:$0xf] }
  0x34   : > { %v1611_v29 = vsel %vm990_vm2, %v1609_v21, %v1610_v22  ;;  %v4099_v31 = vld [vmem:[#allocation2 + $0x8] ss:$0 sps:$4 sm:$0x11]   ;;  %v733_v34 = vshll.u32 %v4364_v44, 16  ;;  %v4395_v37 = vcombine.low %v525_v18, %v526_v23  ;;  %v4398_v38 = vcombine.low %v531_v27, %v4391_v33  ;;  %v1145_v45 = vld [vmem:[#allocation2 + $0x30] sm:$0xf] }
  0x35   : > { %1043 = vrot.lane.b32.xlu1 %v999_v19, %s4238_s30  ;;  %v1354_v28 = vsel %vm717_vm3, %v1349_v20, %v1353_v12  ;;  %v748_v36 = vor.u32 %v747_v24, %v743_v14  ;;  %v4400_v39 = vld [vmem:[#allocation2 + $0x2c] ss:$0 sps:$4 sm:$0x11]   ;;  %v738_v40 = vshll.u32 %v4360_v35, 16  ;;  %v4403_v41 = vcombine.low %v1143_v13, %v1144_v3  ;;  %v1146_v47 = vld [vmem:[#allocation2 + $0x34] sm:$0xf] }
  0x36   : > { %v991_v42 = vrot.slane %v3595_v32, 1  ;;  %v992_v43 = vrot.slane %v4099_v31, 1  ;;  %v755_v49 = vshrl.u32 %v4398_v38, 16  ;;  %v757_v50 = vshll.u32 %v4398_v38, 16  ;;  %v576_v2 = vld [vmem:[#allocation2 + $0x24] sm:$0xe] }
  0x37   : > { %1525 = vrot.lane.b32.xlu0 %v1354_v28, %s4239_s6  ;;  %v753_v48 = vsel %vm717_vm3, %v748_v36, %v752_v25  ;;  %v762_v51 = vshll.u32 %v4400_v39, 16  ;;  %v4411_v53 = vcombine.low %v1145_v45, %v1146_v47  ;;  %v4104_v35 = vld [vmem:[#allocation2 + $0x38] ss:$0 sps:$4 sm:$0x11]   ;;  %v735_v54 = vrot.slane %v733_v34, 1 }
  0x38   : > { %v993_v52 = vsel %vm990_vm2, %v991_v42, %v992_v43  ;;  %v740_v55 = vrot.slane %v738_v40, 1  ;;  %v759_v56 = vrot.slane %v757_v50, 1  ;;  %v719_v59 = vshrl.u32 %v4395_v37, 16  ;;  %v1190_v7 = vld [vmem:[#allocation2 + $0x30] sm:$0xe] }
  0x39   : > { %1655 = vrot.lane.b32.xlu1 %v1611_v29, %s4238_s30  ;;  %v764_v57 = vrot.slane %v762_v51, 1  ;;  %v721_v61 = vshll.u32 %v4395_v37, 16  ;;  %v1368_v62 = vshrl.u32 %v4411_v53, 16  ;;  %v1370_v63 = vshll.u32 %v4411_v53, 16  ;;  %v533_v13 = vld [vmem:[#allocation2 + $0x30] sm:$0xf] }
  0x3a   : > { %v1375_v0 = vshll.u32 %v4104_v35, 16  ;;  %v736_v1 = vor.u32 %v735_v54, %v731_v58  ;;  %v760_v3 = vor.u32 %v759_v56, %v755_v49  ;;  %v726_v5 = vshll.u32 %v4099_v31, 16  ;;  %v534_v17 = vld [vmem:[#allocation2 + $0x34] sm:$0xf]  ;;  %v1147_v23 = vld [vmem:[#allocation2 + $0x3c] sm:$0xf] }
  0x3b   : > { %914 = vrot.lane.b32.xlu0 %v753_v48, %s4239_s6  ;;  %v723_v4 = vrot.slane %v721_v61, 1  ;;  %v1356_v6 = vshrl.u32 %v4403_v41, 16  ;;  %v1372_v8 = vrot.slane %v1370_v63, 1  ;;  %v1358_v12 = vshll.u32 %v4403_v41, 16  ;;  %v1148_v27 = vld [vmem:[#allocation2 + $0x40] sm:$0xf] }
  0x3c   : > { %v1377_v9 = vrot.slane %v1375_v0, 1  ;;  %v741_v11 = vsel %vm717_vm3, %v736_v1, %v740_v55  ;;  %v765_v14 = vsel %vm717_vm3, %v760_v3, %v764_v57  ;;  %v728_v16 = vrot.slane %v726_v5, 1  ;;  %v4428_v22 = vld [vmem:[#allocation2 + $0x38] ss:$0 sps:$4 sm:$0x11]  }
  0x3d   : > { %1039 = vrot.lane.b32.xlu1 %v993_v52, %s4238_s30  ;;  %v1363_v58 = vshll.u32 %v4381_v10, 16  ;;  %v1373_v18 = vor.u32 %v1372_v8, %v1368_v62  ;;  %v724_v19 = vor.u32 %v723_v4, %v719_v59  ;;  %v1360_v20 = vrot.slane %v1358_v12, 1  ;;  %v4435_v32 = vld [vmem:[#allocation2 + $0x44] ss:$0 sps:$4 sm:$0x11]  }
  0x3e   : > { %v3598_v21 = vcombine.low %v576_v2, %v4391_v33  ;;  %v3646_v25 = vcombine.low %v1190_v7, %v1146_v47  ;;  %v1613_v26 = vrot.slane %v4104_v35, 1  ;;  %v1001_v29 = vrot.slane %v4400_v39, 1  ;;  %v535_v34 = vld [vmem:[#allocation2 + $0x3c] sm:$0xf]  ;;  %v4440_v42 = vld [vmem:[#allocation2 + $0x40] sm:$0xf] }
  0x3f   : > { %916 = vrot.lane.b32.xlu0 %v765_v14, %s4239_s6  ;;  %v1365_v24 = vrot.slane %v1363_v58, 1  ;;  %v1378_v28 = vsel %vm717_vm3, %v1373_v18, %v1377_v9  ;;  %v1361_v10 = vor.u32 %v1360_v20, %v1356_v6  ;;  %v4433_v31 = vcombine.low %v533_v13, %v534_v17  ;;  %v4446_v48 = vld [vmem:[#allocation2 + $0x44] ss:$0 sps:$4 sm:$0x11]   ;;  %v577_v35 = vld [vmem:[#allocation2 + $0x30] sm:$0xe] }
  0x40   : > { %v1612_v33 = vrot.slane %v3646_v25, 1  ;;  %v774_v36 = vshll.u32 %v4428_v22, 16  ;;  %v4438_v40 = vcombine.low %v1147_v23, %v1148_v27  ;;  %v729_v43 = vsel %vm717_vm3, %v724_v19, %v728_v16  ;;  %v1149_v59 = vld [vmem:[#allocation2 + $0x48] sm:$0xf]  ;;  %v1150_v0 = vld [vmem:[#allocation2 + $0x4c] sm:$0xf] }
  0x41   : > { %912 = vrot.lane.b32.xlu1 %v741_v11, %s4239_s6  ;;  %v1366_v45 = vsel %vm717_vm3, %v1361_v10, %v1365_v24  ;;  %v1000_v47 = vrot.slane %v3598_v21, 1  ;;  %v769_v39 = vshll.u32 %v4433_v31, 16  ;;  %v767_v50 = vshrl.u32 %v4433_v31, 16  ;;  %v4462_v5 = vld [vmem:[#allocation2 + $0x50] ss:$0 sps:$4 sm:$0x11]  }
  0x42   : > { %v1614_v49 = vsel %vm990_vm2, %v1612_v33, %v1613_v26  ;;  %v1380_v51 = vshrl.u32 %v4438_v40, 16  ;;  %v1382_v52 = vshll.u32 %v4438_v40, 16  ;;  %v776_v55 = vrot.slane %v774_v36, 1  ;;  %v1191_v11 = vld [vmem:[#allocation2 + $0x3c] sm:$0xe] }
  0x43   : > { %1529 = vrot.lane.b32.xlu0 %v1378_v28, %s4239_s6  ;;  %v771_v54 = vrot.slane %v769_v39, 1  ;;  %v1387_v56 = vshll.u32 %v4435_v32, 16  ;;  %v4455_v57 = vcombine.low %v535_v34, %v4440_v42  ;;  %v786_v62 = vshll.u32 %v4446_v48, 16  ;;  %v1192_v16 = vld [vmem:[#allocation2 + $0x48] sm:$0xe] }
  0x44   : > { %v1384_v61 = vrot.slane %v1382_v52, 1  ;;  %v3599_v63 = vcombine.low %v577_v35, %v534_v17  ;;  %v1002_v1 = vsel %vm990_vm2, %v1000_v47, %v1001_v29  ;;  %v1004_v4 = vrot.slane %v4428_v22, 1  ;;  %v537_v58 = vld [vmem:[#allocation2 + $0x48] sm:$0xf]  ;;  %v4471_v20 = vld [vmem:[#allocation2 + $0x4c] sm:$0xf] }
  0x45   : > { %1527 = vrot.lane.b32.xlu1 %v1366_v45, %s4239_s6  ;;  %v1389_v2 = vrot.slane %v1387_v56, 1  ;;  %v781_v3 = vshll.u32 %v4455_v57, 16  ;;  %v772_v6 = vor.u32 %v771_v54, %v767_v50  ;;  %v779_v8 = vshrl.u32 %v4455_v57, 16  ;;  %v578_v24 = vld [vmem:[#allocation2 + $0x3c] sm:$0xe] }
  0x46   : > { %v1385_v7 = vor.u32 %v1384_v61, %v1380_v51  ;;  %v4466_v9 = vcombine.low %v1149_v59, %v1150_v0  ;;  %v1003_v13 = vrot.slane %v3599_v63, 1  ;;  %v3647_v14 = vcombine.low %v1191_v11, %v1148_v27  ;;  %v1151_v10 = vld [vmem:[#allocation2 + $0x54] sm:$0xf]  ;;  %v4478_v29 = vld [vmem:[#allocation2 + $0x58] sm:$0xf] }
  0x47   : > { %910 = vrot.lane.b32.xlu0 %v729_v43, %s4239_s6  ;;  %v783_v12 = vrot.slane %v781_v3, 1  ;;  %v1399_v19 = vshll.u32 %v4462_v5, 16  ;;  %v788_v21 = vrot.slane %v786_v62, 1  ;;  %v777_v25 = vsel %vm717_vm3, %v772_v6, %v776_v55  ;;  %v4484_v43 = vld [vmem:[#allocation2 + $0x5c] ss:$0 sps:$4 sm:$0x11]  }
  0x48   : > { %v1390_v17 = vsel %vm717_vm3, %v1385_v7, %v1389_v2  ;;  %v1394_v18 = vshll.u32 %v4466_v9, 16  ;;  %v1392_v22 = vshrl.u32 %v4466_v9, 16  ;;  %v1615_v23 = vrot.slane %v3647_v14, 1  ;;  %v4487_v39 = vld [vmem:[#allocation2 + $0x50] ss:$0 sps:$4 sm:$0x11]  }
  0x49   : > { %1657 = vrot.lane.b32.xlu1 %v1614_v49, %s4238_s30  ;;  %v784_v26 = vor.u32 %v783_v12, %v779_v8  ;;  %v1616_v28 = vrot.slane %v4435_v32, 1  ;;  %v1005_v34 = vsel %vm990_vm2, %v1003_v13, %v1004_v4  ;;  %v3648_v33 = vcombine.low %v1192_v16, %v1150_v0  ;;  %v539_v52 = vld [vmem:[#allocation2 + $0x54] sm:$0xf]  ;;  %v4495_v35 = vld [vmem:[#allocation2 + $0x58] sm:$0xf] }
  0x4a   : > { %v1396_v27 = vrot.slane %v1394_v18, 1  ;;  %v4482_v36 = vcombine.low %v537_v58, %v4471_v20  ;;  %v1401_v45 = vrot.slane %v1399_v19, 1  ;;  %v3600_v47 = vcombine.low %v578_v24, %v4440_v42  ;;  %v4501_v56 = vld [vmem:[#allocation2 + $0x5c] ss:$0 sps:$4 sm:$0x11]  }
  0x4b   : > { %1045 = vrot.lane.b32.xlu0 %v1002_v1, %s4238_s30  ;;  %v1007_v32 = vrot.slane %v4446_v48, 1  ;;  %v4493_v51 = vcombine.low %v1151_v10, %v4478_v29  ;;  %v789_v54 = vsel %vm717_vm3, %v784_v26, %v788_v21  ;;  %v1617_v42 = vsel %vm990_vm2, %v1615_v23, %v1616_v28  ;;  %v579_v63 = vld [vmem:[#allocation2 + $0x48] sm:$0xe]  ;;  %v424_v3 = vld [vmem:[%s4301_s26 + $0x54] sm:$0xf] }
  0x4c   : > { %v1397_v49 = vor.u32 %v1396_v27, %v1392_v22  ;;  %v793_v50 = vshll.u32 %v4482_v36, 16  ;;  %v1411_v55 = vshll.u32 %v4484_v43, 16  ;;  %v1618_v48 = vrot.slane %v3648_v33, 1  ;;  %v425_v4 = vld [vmem:[%s4301_s26 + $0x58] sm:$0xf] }
  0x4d   : > { %1531 = vrot.lane.b32.xlu1 %v1390_v17, %s4239_s6  ;;  %v1619_v59 = vrot.slane %v4462_v5, 1  ;;  %v1404_v61 = vshrl.u32 %v4493_v51, 16  ;;  %v1406_v62 = vshll.u32 %v4493_v51, 16  ;;  %v1006_v0 = vrot.slane %v3600_v47, 1  ;;  %v426_v11 = vld [vmem:[%s4301_s26 + $0x5c] sm:$0x1] }
  0x4e   : > { %v798_v1 = vshll.u32 %v4487_v39, 16  ;;  %v4508_v2 = vcombine.low %v539_v52, %v4495_v35  ;;  %v1402_v6 = vsel %vm717_vm3, %v1397_v49, %v1401_v45  ;;  %v791_v5 = vshrl.u32 %v4482_v36, 16  ;;  %475 = vst.msk [vmem:[#allocation2 + $0x60] sm:$0xf] %vm452_vm0, %v424_v3  ;;  %476 = vst.msk [vmem:[#allocation2 + $0x64] sm:$0xf] %vm452_vm0, %v425_v4 }
  0x4f   : > { %918 = vrot.lane.b32.xlu0 %v777_v25, %s4239_s6  ;;  %v795_v7 = vrot.slane %v793_v50, 1  ;;  %v1408_v8 = vrot.slane %v1406_v62, 1  ;;  %v1413_v12 = vrot.slane %v1411_v55, 1  ;;  %v810_v14 = vshll.u32 %v4501_v56, 16  ;;  %477 = vst.msk [vmem:[#allocation2 + $0x68] sm:$0x1] %vm455_vm1, %v426_v11 }
  0x50   : > { %v805_v13 = vshll.u32 %v4508_v2, 16  ;;  %v3601_v16 = vcombine.low %v579_v63, %v4471_v20  ;;  %v1193_v58 = vld [vmem:[#allocation2 + $0x54] sm:$0xe]  ;;  %v1620_v17 = vsel %vm990_vm2, %v1618_v48, %v1619_v59  ;;  %v427_v19 = vld [vmem:[%s4301_s26 + $0x60] sm:$0xf]  ;;  %v1008_v23 = vsel %vm990_vm2, %v1006_v0, %v1007_v32 }
  0x51   : > { %1047 = vrot.lane.b32.xlu1 %v1005_v34, %s4238_s30  ;;  %v1409_v18 = vor.u32 %v1408_v8, %v1404_v61  ;;  %v428_v21 = vld [vmem:[%s4301_s26 + $0x64] sm:$0xf]  ;;  %v429_v22 = vld [vmem:[%s4301_s26 + $0x68] sm:$0x1]  ;;  %v800_v24 = vrot.slane %v798_v1, 1  ;;  %v1010_v25 = vrot.slane %v4487_v39, 1  ;;  %v796_v27 = vor.u32 %v795_v7, %v791_v5 }
  0x52   : > { %478 = vst.msk [vmem:[#allocation2 + $0x6c] sm:$0xf] %vm452_vm0, %v427_v19  ;;  %479 = vst.msk [vmem:[#allocation2 + $0x70] sm:$0xf] %vm452_vm0, %v428_v21  ;;  %v2155_v20 = vld [vmem:[#allocation2 + $0x18] sm:$0xf]  ;;  %v3649_v28 = vcombine.low %v1193_v58, %v4478_v29 }
  0x53   : > { %920 = vrot.lane.b32.xlu0 %v789_v54, %s4239_s6  ;;  %480 = vst.msk [vmem:[#allocation2 + $0x74] sm:$0x1] %vm455_vm1, %v429_v22  ;;  %v4532_v26 = vld [vmem:[#allocation2 + $0x1c] sm:$0xf]  ;;  %v1622_v10 = vrot.slane %v4484_v43, 1  ;;  %v803_v45 = vshrl.u32 %v4508_v2, 16  ;;  %v1414_v50 = vsel %vm717_vm3, %v1409_v18, %v1413_v12  ;;  %v801_v59 = vsel %vm717_vm3, %v796_v27, %v800_v24 }
  0x54   : > { %v4538_v34 = vcombine.low %v2155_v20, %v4532_v26  ;;  %v430_v33 = vld [vmem:[%s4301_s26 + $0x6c] sm:$0xf]  ;;  %v807_v47 = vrot.slane %v805_v13, 1  ;;  %v812_v39 = vrot.slane %v810_v14, 1  ;;  %v1009_v49 = vrot.slane %v3601_v16, 1 }
  0x55   : > { %1659 = vrot.lane.b32.xlu1 %v1617_v42, %s4238_s30  ;;  %v431_v32 = vld [vmem:[%s4301_s26 + $0x70] sm:$0xf]  ;;  %481 = vst.msk [vmem:[#allocation2 + $0x78] sm:$0xf] %vm452_vm0, %v430_v33  ;;  %v580_v52 = vld [vmem:[#allocation2 + $0x54] sm:$0xe] }
  0x56   : > { %v4546_v29 = vld [vmem:[#allocation2 + $0x20] ss:$0 sps:$4 sm:$0x11]   ;;  %v2350_v43 = vshll.u32 %v4538_v34, 16  ;;  %v432_v54 = vld [vmem:[%s4301_s26 + $0x74] sm:$0x1]  ;;  %v808_v1 = vor.u32 %v807_v47, %v803_v45  ;;  %v1011_v3 = vsel %vm990_vm2, %v1009_v49, %v1010_v25  ;;  %v3602_v14 = vcombine.low %v580_v52, %v4495_v35 }
  0x57   : > { %1533 = vrot.lane.b32.xlu0 %v1402_v6, %s4239_s6  ;;  %482 = vst.msk [vmem:[#allocation2 + $0x7c] sm:$0xf] %vm452_vm0, %v431_v32  ;;  %v1153_v42 = vld [vmem:[#allocation2 + $0x60] sm:$0xf]  ;;  %v1154_v55 = vld [vmem:[#allocation2 + $0x64] sm:$0xf] }
  0x58   : > { %v1194_v48 = vld [vmem:[#allocation2 + $0x60] sm:$0xe]  ;;  %483 = vst.msk [vmem:[#allocation2 + $0x80] sm:$0x1] %vm455_vm1, %v432_v54  ;;  %v4554_v61 = vcombine.low %v1153_v42, %v1154_v55  ;;  %v1621_v63 = vrot.slane %v3649_v28, 1  ;;  %v2348_v4 = vshrl.u32 %v4538_v34, 16 }
  0x59   : > { %1661 = vrot.lane.b32.xlu1 %v1620_v17, %s4238_s30  ;;  %v4122_v62 = vld [vmem:[#allocation2 + $0x68] ss:$0 sps:$4 sm:$0x11]   ;;  %v3650_v0 = vcombine.low %v1194_v48, %v1154_v55  ;;  %v2352_v6 = vrot.slane %v2350_v43, 1  ;;  %v2157_v5 = vld [vmem:[#allocation2 + $0x24] sm:$0xf] }
  0x5a   : > { %v1416_v7 = vshrl.u32 %v4554_v61, 16  ;;  %v1418_v8 = vshll.u32 %v4554_v61, 16  ;;  %v1423_v11 = vshll.u32 %v4122_v62, 16  ;;  %v1155_v12 = vld [vmem:[#allocation2 + $0x6c] sm:$0xf]  ;;  %v2355_v13 = vshll.u32 %v4546_v29, 16 }
  0x5b   : > { %1049 = vrot.lane.b32.xlu0 %v1008_v23, %s4238_s30  ;;  %v1156_v16 = vld [vmem:[#allocation2 + $0x70] sm:$0xf]  ;;  %v4563_v58 = vld [vmem:[#allocation2 + $0x28] sm:$0xf]  ;;  %v1624_v18 = vrot.slane %v3650_v0, 1  ;;  %v1625_v19 = vrot.slane %v4122_v62, 1  ;;  %v813_v23 = vsel %vm717_vm3, %v808_v1, %v812_v39  ;;  %v1623_v25 = vsel %vm990_vm2, %v1621_v63, %v1622_v10 }
  0x5c   : > { %v1420_v17 = vrot.slane %v1418_v8, 1  ;;  %v4566_v21 = vcombine.low %v1155_v12, %v1156_v16  ;;  %v4568_v22 = vld [vmem:[#allocation2 + $0x74] ss:$0 sps:$4 sm:$0x11]   ;;  %v1425_v24 = vrot.slane %v1423_v11, 1  ;;  %v4578_v47 = vcombine.low %v2157_v5, %v4563_v58 }
  0x5d   : > { %1535 = vrot.lane.b32.xlu1 %v1414_v50, %s4239_s6  ;;  %v1157_v35 = vld [vmem:[#allocation2 + $0x78] sm:$0xf]  ;;  %v1435_v33 = vshll.u32 %v4568_v22, 16  ;;  %v1195_v45 = vld [vmem:[#allocation2 + $0x6c] sm:$0xe]  ;;  %v1012_v49 = vrot.slane %v3602_v14, 1  ;;  %v1626_v10 = vsel %vm990_vm2, %v1624_v18, %v1625_v19  ;;  %v2353_v43 = vor.u32 %v2352_v6, %v2348_v4 }
  0x5e   : > { %v4573_v20 = vld [vmem:[#allocation2 + $0x7c] sm:$0xf]  ;;  %v1421_v27 = vor.u32 %v1420_v17, %v1416_v7  ;;  %v1430_v28 = vshll.u32 %v4566_v21, 16  ;;  %v1013_v39 = vrot.slane %v4501_v56, 1  ;;  %v1428_v52 = vshrl.u32 %v4566_v21, 16 }
  0x5f   : > { %922 = vrot.lane.b32.xlu0 %v801_v59, %s4239_s6  ;;  %v4582_v32 = vcombine.low %v1157_v35, %v4573_v20  ;;  %v4584_v50 = vld [vmem:[#allocation2 + $0x80] ss:$0 sps:$4 sm:$0x11]   ;;  %v2357_v54 = vrot.slane %v2355_v13, 1  ;;  %v3651_v48 = vcombine.low %v1195_v45, %v1156_v16  ;;  %v1437_v62 = vrot.slane %v1435_v33, 1 }
  0x60   : > { %v1426_v42 = vsel %vm717_vm3, %v1421_v27, %v1425_v24  ;;  %v1432_v56 = vrot.slane %v1430_v28, 1  ;;  %v4592_v59 = vld [vmem:[#allocation2 + $0x2c] ss:$0 sps:$4 sm:$0x11]   ;;  %v1447_v63 = vshll.u32 %v4584_v50, 16  ;;  %v1628_v0 = vrot.slane %v4568_v22, 1 }
  0x61   : > { %1051 = vrot.lane.b32.xlu1 %v1011_v3, %s4238_s30  ;;  %v1442_v55 = vshll.u32 %v4582_v32, 16  ;;  %v2362_v1 = vshll.u32 %v4578_v47, 16  ;;  %v2203_v3 = vld [vmem:[#allocation2 + $0x18] sm:$0xe]  ;;  %v434_v5 = vld [vmem:[%s4301_s26 + $0x7c] sm:$0xf]  ;;  %v1014_v7 = vsel %vm990_vm2, %v1012_v49, %v1013_v39  ;;  %v2358_v19 = vsel %vm717_vm3, %v2353_v43, %v2357_v54 }
  0x62   : > { %v1196_v4 = vld [vmem:[#allocation2 + $0x78] sm:$0xe]  ;;  %v2204_v8 = vld [vmem:[#allocation2 + $0x24] sm:$0xe]  ;;  %v435_v11 = vld [vmem:[%s4301_s26 + $0x80] sm:$0x1]  ;;  %v1433_v13 = vor.u32 %v1432_v56, %v1428_v52  ;;  %v3727_v17 = vcombine.low %v2203_v3, %v4532_v26 }
  0x63   : > { %924 = vrot.lane.b32.xlu0 %v813_v23, %s4239_s6  ;;  %v433_v6 = vld [vmem:[%s4301_s26 + $0x78] sm:$0xf]  ;;  %485 = vst.msk [vmem:[#allocation2 + $0x88] sm:$0xf] %vm452_vm0, %v434_v5  ;;  %v2159_v12 = vld [vmem:[#allocation2 + $0x30] sm:$0xf]  ;;  %v3652_v27 = vcombine.low %v1196_v4, %v4573_v20  ;;  %v3728_v43 = vcombine.low %v2204_v8, %v4563_v58 }
  0x64   : > { %484 = vst.msk [vmem:[#allocation2 + $0x84] sm:$0xf] %vm452_vm0, %v433_v6  ;;  %v1440_v14 = vshrl.u32 %v4582_v32, 16  ;;  %v1444_v16 = vrot.slane %v1442_v55, 1  ;;  %v4608_v18 = vld [vmem:[#allocation2 + $0x34] sm:$0xf] }
  0x65   : > { %1663 = vrot.lane.b32.xlu1 %v1623_v25, %s4238_s30  ;;  %486 = vst.msk [vmem:[#allocation2 + $0x8c] sm:$0x1] %vm455_vm1, %v435_v11  ;;  %v1627_v22 = vrot.slane %v3651_v48, 1  ;;  %v4612_v23 = vcombine.low %v2159_v12, %v4608_v18  ;;  %v4614_v24 = vld [vmem:[#allocation2 + $0x38] ss:$0 sps:$4 sm:$0x11]  }
  0x66   : > { %v436_v25 = vld [vmem:[%s4301_s26 + $0x84] sm:$0xf]  ;;  %v2367_v35 = vshll.u32 %v4592_v59, 16  ;;  %v437_v28 = vld [vmem:[%s4301_s26 + $0x88] sm:$0xf]  ;;  %v1449_v26 = vrot.slane %v1447_v63, 1  ;;  %v1445_v20 = vor.u32 %v1444_v16, %v1440_v14 }
  0x67   : > { %1537 = vrot.lane.b32.xlu0 %v1426_v42, %s4239_s6  ;;  %v438_v33 = vld [vmem:[%s4301_s26 + $0x8c] sm:$0x1]  ;;  %487 = vst.msk [vmem:[#allocation2 + $0x90] sm:$0xf] %vm452_vm0, %v436_v25  ;;  %v2360_v45 = vshrl.u32 %v4578_v47, 16  ;;  %v2364_v49 = vrot.slane %v2362_v1, 1  ;;  %v1629_v54 = vsel %vm990_vm2, %v1627_v22, %v1628_v0 }
  0x68   : > { %v2620_v39 = vrot.slane %v4546_v29, 1  ;;  %488 = vst.msk [vmem:[#allocation2 + $0x94] sm:$0xf] %vm452_vm0, %v437_v28  ;;  %v2619_v52 = vrot.slane %v3727_v17, 1  ;;  %v2374_v42 = vshll.u32 %v4612_v23, 16  ;;  %v2379_v56 = vshll.u32 %v4614_v24, 16 }
  0x69   : > { %1665 = vrot.lane.b32.xlu1 %v1626_v10, %s4238_s30  ;;  %489 = vst.msk [vmem:[#allocation2 + $0x98] sm:$0x1] %vm455_vm1, %v438_v33  ;;  %v1438_v10 = vsel %vm717_vm3, %v1433_v13, %v1437_v62  ;;  %v2369_v55 = vrot.slane %v2367_v35, 1  ;;  %v1630_v29 = vrot.slane %v3652_v27, 1  ;;  %v2365_v1 = vor.u32 %v2364_v49, %v2360_v45  ;;  %v4643_v8 = vld [vmem:[#allocation2 + $0x40] sm:$0xf] }
  0x6a   : > { %v1160_v63 = vld [vmem:[#allocation2 + $0x88] sm:$0xf]  ;;  %v1631_v62 = vrot.slane %v4584_v50, 1  ;;  %v1450_v58 = vsel %vm717_vm3, %v1445_v20, %v1449_v26  ;;  %v2621_v0 = vsel %vm990_vm2, %v2619_v52, %v2620_v39  ;;  %v2622_v6 = vrot.slane %v3728_v43, 1  ;;  %v2205_v35 = vld [vmem:[#allocation2 + $0x30] sm:$0xe] }
  0x6b   : > { %1053 = vrot.lane.b32.xlu0 %v1014_v7, %s4238_s30  ;;  %v1159_v48 = vld [vmem:[#allocation2 + $0x84] sm:$0xf]  ;;  %v2623_v5 = vrot.slane %v4592_v59, 1  ;;  %v2161_v7 = vld [vmem:[#allocation2 + $0x3c] sm:$0xf]  ;;  %v2372_v50 = vshrl.u32 %v4612_v23, 16  ;;  %v2370_v27 = vsel %vm717_vm3, %v2365_v1, %v2369_v55 }
  0x6c   : > { %v4635_v3 = vcombine.low %v1159_v48, %v1160_v63  ;;  %v4637_v4 = vld [vmem:[#allocation2 + $0x8c] ss:$0 sps:$4 sm:$0x11]   ;;  %v2376_v12 = vrot.slane %v2374_v42, 1  ;;  %v2381_v13 = vrot.slane %v2379_v56, 1  ;;  %v4656_v25 = vcombine.low %v2161_v7, %v4643_v8 }
  0x6d   : > { %2539 = vrot.lane.b32.xlu1 %v2358_v19, %s4239_s6  ;;  %v1197_v17 = vld [vmem:[#allocation2 + $0x84] sm:$0xe]  ;;  %v1459_v59 = vshll.u32 %v4637_v4, 16  ;;  %v439_v26 = vld [vmem:[%s4301_s26 + $0x90] sm:$0xf]  ;;  %v2624_v45 = vsel %vm990_vm2, %v2622_v6, %v2623_v5  ;;  %v1632_v56 = vsel %vm990_vm2, %v1630_v29, %v1631_v62 }
  0x6e   : > { %v1454_v11 = vshll.u32 %v4635_v3, 16  ;;  %v1161_v14 = vld [vmem:[#allocation2 + $0x90] sm:$0xf]  ;;  %v1452_v19 = vshrl.u32 %v4635_v3, 16  ;;  %5778 = vst [vmem:[#allocation4_spill] sm:$0xff] %v4656_v25  ;;  %v2377_v49 = vor.u32 %v2376_v12, %v2372_v50  ;;  %v2386_v48 = vshll.u32 %v4656_v25, 16 }
  0x6f   : > { %1539 = vrot.lane.b32.xlu0 %v1438_v10, %s4239_s6  ;;  %v4647_v16 = vld [vmem:[#allocation2 + $0x94] sm:$0xf]  ;;  %v3653_v10 = vcombine.low %v1197_v17, %v1160_v63  ;;  %v4665_v20 = vld [vmem:[#allocation2 + $0x44] ss:$0 sps:$4 sm:$0x11]   ;;  %v1461_v55 = vrot.slane %v1459_v59, 1  ;;  %v3729_v63 = vcombine.low %v2205_v35, %v4608_v18 }
  0x70   : > { %v4653_v22 = vcombine.low %v1161_v14, %v4647_v16  ;;  %v1456_v28 = vrot.slane %v1454_v11, 1  ;;  %v4660_v33 = vld [vmem:[#allocation2 + $0x98] ss:$0 sps:$4 sm:$0x11]   ;;  %v440_v52 = vld [vmem:[%s4301_s26 + $0x94] sm:$0xf]  ;;  %v2382_v62 = vsel %vm717_vm3, %v2377_v49, %v2381_v13 }
  0x71   : > { %1667 = vrot.lane.b32.xlu1 %v1629_v54, %s4238_s30  ;;  %490 = vst.msk [vmem:[#allocation2 + $0x9c] sm:$0xf] %vm452_vm0, %v439_v26  ;;  %v2206_v43 = vld [vmem:[#allocation2 + $0x3c] sm:$0xe]  ;;  %v441_v54 = vld [vmem:[%s4301_s26 + $0x98] sm:$0x1] }
  0x72   : > { %5777 = vst [vmem:[#allocation3_spill] sm:$0xff] %v4653_v22  ;;  %v1466_v39 = vshll.u32 %v4653_v22, 16  ;;  %491 = vst.msk [vmem:[#allocation2 + $0xa0] sm:$0xf] %vm452_vm0, %v440_v52  ;;  %v2163_v42 = vld [vmem:[#allocation2 + $0x48] sm:$0xf]  ;;  %v3730_v13 = vcombine.low %v2206_v43, %v4643_v8 }
  0x73   : > { %1541 = vrot.lane.b32.xlu0 %v1450_v58, %s4239_s6  ;;  %492 = vst.msk [vmem:[#allocation2 + $0xa4] sm:$0x1] %vm455_vm1, %v441_v54  ;;  %v4676_v1 = vld [vmem:[#allocation2 + $0x4c] sm:$0xf]  ;;  %v1457_v58 = vor.u32 %v1456_v28, %v1452_v19  ;;  %v1471_v5 = vshll.u32 %v4660_v33, 16  ;;  %v1633_v7 = vrot.slane %v3653_v10, 1 }
  0x74   : > { %v1468_v6 = vrot.slane %v1466_v39, 1  ;;  %v442_v29 = vld [vmem:[%s4301_s26 + $0x9c] sm:$0xf]  ;;  %v1634_v11 = vrot.slane %v4637_v4, 1  ;;  %v4685_v18 = vcombine.low %v2163_v42, %v4676_v1  ;;  %v443_v50 = vld [vmem:[%s4301_s26 + $0xa0] sm:$0xf] }
  0x75   : > { %2667 = vrot.lane.b32.xlu1 %v2621_v0, %s4238_s30  ;;  %v1464_v0 = vshrl.u32 %v4653_v22, 16  ;;  %v444_v12 = vld [vmem:[%s4301_s26 + $0xa4] sm:$0x1]  ;;  %493 = vst.msk [vmem:[#allocation2 + $0xa8] sm:$0xf] %vm452_vm0, %v442_v29  ;;  %v2384_v14 = vshrl.u32 %v4656_v25, 16  ;;  %v1462_v35 = vsel %vm717_vm3, %v1457_v58, %v1461_v55 }
  0x76   : > { %5779 = vst [vmem:[#allocation5_spill] sm:$0xff] %v4685_v18  ;;  %v2626_v17 = vrot.slane %v4614_v24, 1  ;;  %v1198_v19 = vld [vmem:[#allocation2 + $0x90] sm:$0xe]  ;;  %494 = vst.msk [vmem:[#allocation2 + $0xac] sm:$0xf] %vm452_vm0, %v443_v50 }
  0x77   : > { %2541 = vrot.lane.b32.xlu0 %v2370_v27, %s4239_s6  ;;  %495 = vst.msk [vmem:[#allocation2 + $0xb0] sm:$0x1] %vm455_vm1, %v444_v12  ;;  %v2391_v4 = vshll.u32 %v4665_v20, 16  ;;  %v4697_v59 = vld [vmem:[#allocation2 + $0x50] ss:$0 sps:$4 sm:$0x11]   ;;  %v1469_v27 = vor.u32 %v1468_v6, %v1464_v0  ;;  %v3654_v8 = vcombine.low %v1198_v19, %v4647_v16 }
  0x78   : > { %v1473_v28 = vrot.slane %v1471_v5, 1  ;;  %v2388_v24 = vrot.slane %v2386_v48, 1  ;;  %v1163_v26 = vld [vmem:[#allocation2 + $0x9c] sm:$0xf]  ;;  %v2625_v49 = vrot.slane %v3729_v63, 1  ;;  %v2629_v39 = vrot.slane %v4665_v20, 1 }
  0x79   : > { %2669 = vrot.lane.b32.xlu1 %v2624_v45, %s4238_s30  ;;  %v1635_v45 = vsel %vm990_vm2, %v1633_v7, %v1634_v11  ;;  %v4703_v10 = vld [vmem:[#allocation2 + $0xa0] sm:$0xf]  ;;  %v2398_v52 = vshll.u32 %v4685_v18, 16  ;;  %v2165_v54 = vld [vmem:[#allocation2 + $0x54] sm:$0xf]  ;;  %v2628_v55 = vrot.slane %v3730_v13, 1 }
  0x7a   : > { %v4708_v43 = vcombine.low %v1163_v26, %v4703_v10  ;;  %v4710_v42 = vld [vmem:[#allocation2 + $0x58] sm:$0xf]  ;;  %v4713_v48 = vld [vmem:[#allocation2 + $0xa4] ss:$0 sps:$4 sm:$0x11]   ;;  %v2403_v20 = vshll.u32 %v4697_v59, 16  ;;  %v1474_v63 = vsel %vm717_vm3, %v1469_v27, %v1473_v28  ;;  %v2389_v58 = vor.u32 %v2388_v24, %v2384_v14 }
  0x7b   : > { %1669 = vrot.lane.b32.xlu0 %v1632_v56, %s4238_s30  ;;  %v2393_v56 = vrot.slane %v2391_v4, 1  ;;  %v4719_v6 = vld [vmem:[#allocation2 + $0x5c] ss:$0 sps:$4 sm:$0x11]   ;;  %v2627_v5 = vsel %vm990_vm2, %v2625_v49, %v2626_v17  ;;  %v2396_v29 = vshrl.u32 %v4685_v18, 16  ;;  %v4726_v11 = vcombine.low %v2165_v54, %v4710_v42 }
  0x7c   : > { %5780 = vst [vmem:[#allocation6_spill] sm:$0xff] %v4708_v43  ;;  %v1478_v16 = vshll.u32 %v4708_v43, 16  ;;  %v1165_v0 = vld [vmem:[#allocation2 + $0xa8] sm:$0xf]  ;;  %v1636_v50 = vrot.slane %v3654_v8, 1  ;;  %v1637_v12 = vrot.slane %v4660_v33, 1  ;;  %v2630_v33 = vsel %vm990_vm2, %v2628_v55, %v2629_v39 }
  0x7d   : > { %2543 = vrot.lane.b32.xlu1 %v2382_v62, %s4239_s6  ;;  %v2400_v62 = vrot.slane %v2398_v52, 1  ;;  %v4723_v7 = vld [vmem:[#allocation2 + $0xac] sm:$0xf]  ;;  %5781 = vst [vmem:[#allocation7_spill] sm:$0xff] %v4726_v11  ;;  %v1199_v19 = vld [vmem:[#allocation2 + $0x9c] sm:$0xe]  ;;  %v2394_v24 = vsel %vm717_vm3, %v2389_v58, %v2393_v56 }
  0x7e   : > { %v4730_v14 = vcombine.low %v1165_v0, %v4723_v7  ;;  %v2207_v4 = vld [vmem:[#allocation2 + $0x48] sm:$0xe]  ;;  %v1476_v17 = vshrl.u32 %v4708_v43, 16  ;;  %v1480_v13 = vrot.slane %v1478_v16, 1  ;;  %v2405_v27 = vrot.slane %v2403_v20, 1 }
  0x7f   : > { %1543 = vrot.lane.b32.xlu0 %v1462_v35, %s4239_s6  ;;  %v1483_v35 = vshll.u32 %v4713_v48, 16  ;;  %v445_v28 = vld [vmem:[%s4301_s26 + $0xa8] sm:$0xf]  ;;  %v4739_v26 = vld [vmem:[#allocation2 + $0xb0] ss:$0 sps:$4 sm:$0x11]   ;;  %v2401_v52 = vor.u32 %v2400_v62, %v2396_v29  ;;  %v3655_v8 = vcombine.low %v1199_v19, %v4703_v10  ;;  %v3731_v10 = vcombine.low %v2207_v4, %v4676_v1 }
  0x80   : > { %5782 = vst [vmem:[#allocation8_spill] sm:$0xff] %v4730_v14  ;;  %v446_v49 = vld [vmem:[%s4301_s26 + $0xac] sm:$0xf]  ;;  %496 = vst.msk [vmem:[#allocation2 + $0xb4] sm:$0xf] %vm452_vm0, %v445_v28  ;;  %v2410_v54 = vshll.u32 %v4726_v11, 16  ;;  %v1481_v29 = vor.u32 %v1480_v13, %v1476_v17 }
  0x81   : > { %1671 = vrot.lane.b32.xlu1 %v1635_v45, %s4238_s30  ;;  %v1490_v45 = vshll.u32 %v4730_v14, 16  ;;  %v2415_v20 = vshll.u32 %v4719_v6, 16  ;;  %v447_v56 = vld [vmem:[%s4301_s26 + $0xb0] sm:$0x1]  ;;  %497 = vst.msk [vmem:[#allocation2 + $0xb8] sm:$0xf] %vm452_vm0, %v446_v49 }
  0x82   : > { %498 = vst.msk [vmem:[#allocation2 + $0xbc] sm:$0x1] %vm455_vm1, %v447_v56  ;;  %v2167_v39 = vld [vmem:[#allocation2 + $0x60] sm:$0xf]  ;;  %v4750_v55 = vld [vmem:[#allocation2 + $0x64] sm:$0xf] }
  0x83   : > { %1545 = vrot.lane.b32.xlu0 %v1474_v63, %s4239_s6  ;;  %v1485_v63 = vrot.slane %v1483_v35, 1  ;;  %v1488_v58 = vshrl.u32 %v4730_v14, 16  ;;  %v2208_v16 = vld [vmem:[#allocation2 + $0x54] sm:$0xe]  ;;  %v1492_v62 = vrot.slane %v1490_v45, 1  ;;  %v1495_v19 = vshll.u32 %v4739_v26, 16 }
  0x84   : > { %v448_v0 = vld [vmem:[%s4301_s26 + $0xb4] sm:$0xf]  ;;  %v449_v28 = vld [vmem:[%s4301_s26 + $0xb8] sm:$0xf]  ;;  %v450_v49 = vld [vmem:[%s4301_s26 + $0xbc] sm:$0x1]  ;;  %v2406_v35 = vsel %vm717_vm3, %v2401_v52, %v2405_v27  ;;  %v4765_v1 = vcombine.low %v2167_v39, %v4750_v55  ;;  %v3732_v13 = vcombine.low %v2208_v16, %v4710_v42  ;;  %s5374_s26 = scalar_lea.vmem %s5757_s4, %s3561_s23 }
  0x85   : > { %2671 = vrot.lane.b32.xlu1 %v2627_v5, %s4238_s30  ;;  %v1638_v5 = vsel %vm990_vm2, %v1636_v50, %v1637_v12  ;;  %499 = vst.msk [vmem:[#allocation2 + $0xc0] sm:$0xf] %vm452_vm0, %v448_v0  ;;  %v1640_v56 = vrot.slane %v4713_v48, 1  ;;  %500 = vst.msk [vmem:[#allocation2 + $0xc4] sm:$0xf] %vm452_vm0, %v449_v28  ;;  %v2408_v50 = vshrl.u32 %v4726_v11, 16  ;;  %v1493_v45 = vor.u32 %v1492_v62, %v1488_v58 }
  0x86   : > { %5783 = vst [vmem:[#allocation9_spill] sm:$0xff] %v4765_v1  ;;  %501 = vst.msk [vmem:[#allocation2 + $0xc8] sm:$0x1] %vm455_vm1, %v450_v49  ;;  %v2632_v12 = vrot.slane %v4697_v59, 1  ;;  %v2412_v4 = vrot.slane %v2410_v54, 1  ;;  %v2631_v17 = vrot.slane %v3731_v10, 1 }
  0x87   : > { %2545 = vrot.lane.b32.xlu0 %v2394_v24, %s4239_s6  ;;  %v1639_v24 = vrot.slane %v3655_v8, 1  ;;  %v2635_v48 = vrot.slane %v4719_v6, 1  ;;  %v1167_v27 = vld [vmem:[#allocation2 + $0xb4] sm:$0xf]  ;;  %v1497_v52 = vrot.slane %v1495_v19, 1  ;;  %v2417_v8 = vrot.slane %v2415_v20, 1 }
  0x88   : > { %v1200_v39 = vld [vmem:[#allocation2 + $0xa8] sm:$0xe]  ;;  %v1168_v0 = vld [vmem:[#allocation2 + $0xb8] sm:$0xf]  ;;  %v2422_v42 = vshll.u32 %v4765_v1, 16  ;;  %v2413_v20 = vor.u32 %v2412_v4, %v2408_v50  ;;  %v2633_v58 = vsel %vm990_vm2, %v2631_v17, %v2632_v12  ;;  %v2634_v16 = vrot.slane %v3732_v13, 1 }
  0x89   : > { %2673 = vrot.lane.b32.xlu1 %v2630_v33, %s4238_s30  ;;  %v1486_v33 = vsel %vm717_vm3, %v1481_v29, %v1485_v63  ;;  %v1641_v59 = vsel %vm990_vm2, %v1639_v24, %v1640_v56  ;;  %v4777_v28 = vcombine.low %v1167_v27, %v1168_v0  ;;  %v4779_v54 = vld [vmem:[#allocation2 + $0x68] ss:$0 sps:$4 sm:$0x11]   ;;  %v2169_v10 = vld [vmem:[#allocation2 + $0x6c] sm:$0xf]  ;;  %v1498_v62 = vsel %vm717_vm3, %v1493_v45, %v1497_v52 }
  0x8a   : > { %v4782_v6 = vld [vmem:[#allocation2 + $0x70] sm:$0xf]  ;;  %v4162_v63 = vld [vmem:[%s5756_s3 + $0x8] sm:$0x3f]   ;;  %v3656_v19 = vcombine.low %v1200_v39, %v4723_v7  ;;  %v2424_v56 = vrot.slane %v2422_v42, 1  ;;  %v2427_v50 = vshll.u32 %v4779_v54, 16  ;;  %v2418_v27 = vsel %vm717_vm3, %v2413_v20, %v2417_v8 }
  0x8b   : > { %1673 = vrot.lane.b32.xlu0 %v1638_v5, %s4238_s30  ;;  %5784 = vst [vmem:[#allocation10_spill] sm:$0xff] %v4777_v28  ;;  %v4789_v5 = vld [vmem:[#allocation2 + $0xbc] ss:$0 sps:$4 sm:$0x11]   ;;  %v1502_v49 = vshll.u32 %v4777_v28, 16  ;;  %4049 = vmatprep.subr.msk.bf16.mxu1 %vm1788_vm4, %v4162_v63  ;;  %v1790_v4 = vsel %vm1788_vm4, %v4162_v63, 0  ;;  %v4806_v7 = vcombine.low %v2169_v10, %v4782_v6  ;;  %v2636_v10 = vsel %vm990_vm2, %v2634_v16, %v2635_v48 }
  0x8c   : > { %v1169_v29 = vld [vmem:[#allocation2 + $0xc0] sm:$0xf]  ;;  %v4796_v24 = vld [vmem:[#allocation2 + $0xc4] sm:$0xf]  ;;  %v1643_v17 = vrot.slane %v4739_v26, 1  ;;  %3882 = vmatpush3.bf16.msra.mxu1 %v1790_v4  ;;  %v1642_v39 = vrot.slane %v3656_v19, 1 }
  0x8d   : > { %2547 = vrot.lane.b32.xlu1 %v2406_v35, %s4239_s6  ;;  %v2420_v35 = vshrl.u32 %v4765_v1, 16  ;;  %v4801_v12 = vcombine.low %v1169_v29, %v4796_v24  ;;  %v1201_v13 = vld [vmem:[#allocation2 + $0xb4] sm:$0xe]  ;;  %5786 = vst [vmem:[#allocation12_spill] sm:$0xff] %v4806_v7  ;;  %v2209_v52 = vld [vmem:[#allocation2 + $0x60] sm:$0xe] }
  0x8e   : > { %v4811_v45 = vld [vmem:[#allocation2 + $0xc8] ss:$0 sps:$4 sm:$0x11]   ;;  %v1504_v26 = vrot.slane %v1502_v49, 1  ;;  %v2429_v29 = vrot.slane %v2427_v50, 1  ;;  %v2434_v8 = vshll.u32 %v4806_v7, 16  ;;  %v3733_v20 = vcombine.low %v2209_v52, %v4750_v55 }
  0x8f   : > { %1547 = vrot.lane.b32.xlu0 %v1486_v33, %s4239_s6  ;;  %5785 = vst [vmem:[#allocation11_spill] sm:$0xff] %v4801_v12  ;;  %v1507_v33 = vshll.u32 %v4789_v5, 16  ;;  %v1514_v42 = vshll.u32 %v4801_v12, 16  ;;  %v2425_v63 = vor.u32 %v2424_v56, %v2420_v35  ;;  %v4817_v4 = vld [vmem:[#allocation2 + $0x74] ss:$0 sps:$4 sm:$0x11]   ;;  %v1644_v48 = vsel %vm990_vm2, %v1642_v39, %v1643_v17 }
  0x90   : > { %v2171_v15 = vld [vmem:[#allocation2 + $0x78] sm:$0xf]  ;;  %v4821_v1 = vld [vmem:[#allocation2 + $0x7c] sm:$0xf]  ;;  %v1519_v19 = vshll.u32 %v4811_v45, 16  ;;  %v2638_v49 = vrot.slane %v4779_v54, 1 }
  0x91   : > { %1675 = vrot.lane.b32.xlu1 %v1641_v59, %s4238_s30  ;;  %v1500_v59 = vshrl.u32 %v4777_v28, 16  ;;  %v1512_v16 = vshrl.u32 %v4801_v12, 16  ;;  %v1516_v35 = vrot.slane %v1514_v42, 1  ;;  %v541_v56 = vld [vmem:[#allocation2 + $0x60] sm:$0xf]  ;;  %v2430_v50 = vsel %vm717_vm3, %v2425_v63, %v2429_v29 }
  0x92   : > { %v4829_v55 = vld [vmem:[#allocation2 + $0x64] sm:$0xf]  ;;  %v2432_v54 = vshrl.u32 %v4806_v7, 16  ;;  %v2436_v17 = vrot.slane %v2434_v8, 1  ;;  %v2439_v52 = vshll.u32 %v4817_v4, 16  ;;  %v2637_v39 = vrot.slane %v3733_v20, 1 }
  0x93   : > { %1549 = vrot.lane.b32.xlu0 %v1498_v62, %s4239_s6  ;;  %v3657_v62 = vcombine.low %v1201_v13, %v1168_v0  ;;  %v1505_v0 = vor.u32 %v1504_v26, %v1500_v59  ;;  %v2210_v59 = vld [vmem:[#allocation2 + $0x6c] sm:$0xe]  ;;  %v1521_v26 = vrot.slane %v1519_v19, 1  ;;  %v1202_v42 = vld [vmem:[#allocation2 + $0xc0] sm:$0xe]  ;;  %v1517_v63 = vor.u32 %v1516_v35, %v1512_v16 }
  0x94   : > { %v543_v29 = vld [vmem:[#allocation2 + $0x6c] sm:$0xf]  ;;  %v3734_v19 = vcombine.low %v2210_v59, %v4782_v6  ;;  %v2441_v7 = vrot.slane %v2439_v52, 1  ;;  %v4175_v16 = vld [vmem:[%s5756_s3] sm:$0x3f]   ;;  %v2437_v52 = vor.u32 %v2436_v17, %v2432_v54  ;;  %v2639_v59 = vsel %vm990_vm2, %v2637_v39, %v2638_v49 }
  0x95   : > { %2675 = vrot.lane.b32.xlu1 %v2633_v58, %s4238_s30  ;;  %v1509_v58 = vrot.slane %v1507_v33, 1  ;;  %v1645_v13 = vrot.slane %v3657_v62, 1  ;;  %v4834_v33 = vcombine.low %v2171_v15, %v4821_v1  ;;  %v4846_v62 = vld [vmem:[#allocation2 + $0x70] sm:$0xf]  ;;  %4050 = vmatprep.subr.msk.bf16.mxu0 %vm1788_vm4, %v4175_v16  ;;  %v581_v49 = vld [vmem:[#allocation2 + $0x60] sm:$0xe] }
  0x96   : > { %4051 = vmatprep.subr.msk.bf16.mxu1 %vm1788_vm4, %v4175_v16  ;;  %v2175_v18 = vld [vmem:[#allocation2 + $0x90] sm:$0xf]  ;;  %v4897_v43 = vld [vmem:[#allocation2 + $0x94] sm:$0xf] }
  0x97   : > { %2549 = vrot.lane.b32.xlu0 %v2418_v27, %s4239_s6  ;;  %v1646_v27 = vrot.slane %v4789_v5, 1  ;;  %5787 = vst [vmem:[#allocation13_spill] sm:$0xff] %v4834_v33  ;;  %v4842_v5 = vld [vmem:[#allocation2 + $0x80] ss:$0 sps:$4 sm:$0x11]   ;;  %v1510_v15 = vsel %vm717_vm3, %v1505_v0, %v1509_v58  ;;  %v2446_v12 = vshll.u32 %v4834_v33, 16  ;;  %v3658_v58 = vcombine.low %v1202_v42, %v4796_v24 }
  0x98   : > { %v4855_v0 = vld [vmem:[#allocation2 + $0x74] ss:$0 sps:$4 sm:$0x11]   ;;  %v1522_v24 = vsel %vm717_vm3, %v1517_v63, %v1521_v26  ;;  %v1649_v42 = vrot.slane %v4811_v45, 1  ;;  %v2444_v28 = vshrl.u32 %v4834_v33, 16 }
  0x99   : > { %2677 = vrot.lane.b32.xlu1 %v2636_v10, %s4238_s30  ;;  %v4840_v10 = vcombine.low %v541_v56, %v4829_v55  ;;  %v1647_v20 = vsel %vm990_vm2, %v1645_v13, %v1646_v27  ;;  %v4851_v56 = vld [vmem:[#allocation2 + $0x68] ss:$0 sps:$4 sm:$0x11]   ;;  %v2173_v13 = vld [vmem:[#allocation2 + $0x84] sm:$0xf]  ;;  %v2448_v14 = vrot.slane %v2446_v12, 1 }
  0x9a   : > { %v4868_v27 = vld [vmem:[#allocation2 + $0x88] sm:$0xf]  ;;  %v1648_v26 = vrot.slane %v3658_v58, 1  ;;  %v822_v54 = vshll.u32 %v4851_v56, 16  ;;  %v2442_v58 = vsel %vm717_vm3, %v2437_v52, %v2441_v7  ;;  %v545_v33 = vld [vmem:[#allocation2 + $0x78] sm:$0xf] }
  0x9b   : > { %1677 = vrot.lane.b32.xlu0 %v1644_v48, %s4238_s30  ;;  %5788 = vst [vmem:[#allocation14_spill] sm:$0xff] %v4840_v10  ;;  %v2641_v48 = vrot.slane %v4817_v4, 1  ;;  %v817_v6 = vshll.u32 %v4840_v10, 16  ;;  %v2451_v4 = vshll.u32 %v4842_v5, 16  ;;  %v815_v63 = vshrl.u32 %v4840_v10, 16 }
  0x9c   : > { %v4883_v45 = vcombine.low %v2173_v13, %v4868_v27  ;;  %v4891_v10 = vld [vmem:[#allocation2 + $0x7c] sm:$0xf]  ;;  %v1650_v52 = vsel %vm990_vm2, %v1648_v26, %v1649_v42  ;;  %v4904_v25 = vld [vmem:[#allocation2 + $0x8c] ss:$0 sps:$4 sm:$0x11]  }
  0x9d   : > { %2551 = vrot.lane.b32.xlu1 %v2430_v50, %s4239_s6  ;;  %v1652_v8 = vpop.permute.xlu1 %1651  ;;  %v4866_v50 = vcombine.low %v543_v29, %v4846_v62  ;;  %v4877_v29 = vsel %vm1788_vm4, %v4175_v16, 0  ;;  %v819_v12 = vrot.slane %v817_v6, 1  ;;  %v2453_v17 = vrot.slane %v2451_v4, 1  ;;  %v2211_v16 = vld [vmem:[#allocation2 + $0x78] sm:$0xe] }
  0x9e   : > { %5790 = vst [vmem:[#allocation16_spill] sm:$0xff] %v4883_v45  ;;  %3916 = vmatpush3.bf16.msra.mxu0 %v4877_v29  ;;  %v2449_v6 = vor.u32 %v2448_v14, %v2444_v28  ;;  %v3603_v4 = vcombine.low %v581_v49, %v4829_v55  ;;  %v824_v28 = vrot.slane %v822_v54, 1  ;;  %v582_v26 = vld [vmem:[#allocation2 + $0x6c] sm:$0xe]  ;;  %v4917_v49 = vcombine.low %v2175_v18, %v4897_v43 }
  0x9f   : > { %1551 = vrot.lane.b32.xlu0 %v1510_v15, %s4239_s6  ;;  %5789 = vst [vmem:[#allocation15_spill] sm:$0xff] %v4866_v50  ;;  %v2640_v15 = vrot.slane %v3734_v19, 1  ;;  %v829_v39 = vshll.u32 %v4866_v50, 16  ;;  %v820_v14 = vor.u32 %v819_v12, %v815_v63  ;;  %v827_v55 = vshrl.u32 %v4866_v50, 16  ;;  %v2212_v12 = vld [vmem:[#allocation2 + $0x84] sm:$0xe] }
  0xa0   : > { %v4861_v35 = vpop.permute.xlu0 %1041  ;;  %5792 = vst [vmem:[#allocation18_spill] sm:$0xff] %v4917_v49  ;;  %v2454_v63 = vsel %vm717_vm3, %v2449_v6, %v2453_v17  ;;  %v4932_v18 = vld [vmem:[#allocation2 + $0x98] ss:$0 sps:$4 sm:$0x11]   ;;  %v547_v17 = vld [vmem:[#allocation2 + $0x84] sm:$0xf] }
  0xa1   : > { %1679 = vrot.lane.b32.xlu1 %v1647_v20, %s4238_s30  ;;  %v834_v20 = vshll.u32 %v4855_v0, 16  ;;  %v831_v42 = vrot.slane %v829_v39, 1  ;;  %v4939_v6 = vld [vmem:[#allocation2 + $0x88] sm:$0xf] }
  0xa3   : > { %v1654_v11 = vpop.permute.xlu1 %1653  ;;  %1553 = vrot.lane.b32.xlu0 %v1522_v24, %s4239_s6  ;;  %v2642_v24 = vsel %vm990_vm2, %v2640_v15, %v2641_v48  ;;  %v2644_v15 = vrot.slane %v4842_v5, 1  ;;  %v836_v54 = vrot.slane %v834_v20, 1  ;;  %v2463_v5 = vshll.u32 %v4904_v25, 16 }
  0xa5   : > { %v1524_v19 = vpop.permute.xlu0 %1523  ;;  %2679 = vrot.lane.b32.xlu1 %v2639_v59, %s4238_s30  ;;  %v1016_v59 = vrot.slane %v4851_v56, 1  ;;  %v3735_v56 = vcombine.low %v2211_v16, %v4821_v1  ;;  %v2456_v1 = vshrl.u32 %v4883_v45, 16  ;;  %v4927_v16 = vld [vmem:[#allocation2 + $0x80] ss:$0 sps:$4 sm:$0x11]  }
  0xa6   : > { %v1684_v13 = vsel %vm1071_vm5, %v4358_v30, %v1524_v19  ;;  %v2458_v30 = vshll.u32 %v4883_v45, 16 }
  0xa7   : > { %v1716_v22 = vsel %vm1104_vm6, %v1684_v13, %v1652_v8  ;;  %v4900_v7 = vpop.permute.xlu1 %1043  ;;  %2553 = vrot.lane.b32.xlu0 %v2442_v58, %s4239_s6  ;;  %v4911_v8 = vcombine.low %v545_v33, %v4891_v10  ;;  %v1015_v33 = vrot.slane %v3603_v4, 1  ;;  %v832_v13 = vor.u32 %v831_v42, %v827_v55  ;;  %v4941_v4 = vld [vmem:[#allocation2 + $0x8c] ss:$0 sps:$4 sm:$0x11]  }
  0xa8   : > { %3883 = vmatprep.mubr.msk.bf16.mxu1 %vm1755_vm7, %v1716_v22  ;;  %v2460_v39 = vrot.slane %v2458_v30, 1  ;;  %v2643_v30 = vrot.slane %v3735_v56, 1  ;;  %v846_v42 = vshll.u32 %v4927_v16, 16 }
  0xa9   : > { %5791 = vst [vmem:[#allocation17_spill] sm:$0xff] %v4911_v8  ;;  %v1526_v48 = vpop.permute.xlu0 %1525  ;;  %2681 = vrot.lane.b32.xlu1 %v2642_v24, %s4238_s30  ;;  %v2470_v24 = vshll.u32 %v4917_v49, 16  ;;  %v839_v55 = vshrl.u32 %v4911_v8, 16  ;;  %v837_v56 = vsel %vm717_vm3, %v832_v13, %v836_v54 }
  0xaa   : > { %v1686_v22 = vsel %vm1071_vm5, %v4367_v46, %v1526_v48  ;;  %v841_v46 = vshll.u32 %v4911_v8, 16  ;;  %v3604_v48 = vcombine.low %v582_v26, %v4846_v62  ;;  %v4955_v62 = vcombine.low %v547_v17, %v4939_v6 }
  0xab   : > { %v1718_v19 = vsel %vm1104_vm6, %v1686_v22, %v1654_v11  ;;  %v4923_v58 = vpop.permute.xlu1 %1655  ;;  %1681 = vrot.lane.b32.xlu0 %v1650_v52, %s4238_s30  ;;  %v825_v11 = vsel %vm717_vm3, %v820_v14, %v824_v28  ;;  %v1017_v52 = vsel %vm990_vm2, %v1015_v33, %v1016_v59  ;;  %v3736_v22 = vcombine.low %v2212_v12, %v4868_v27  ;;  %v2177_v27 = vld [vmem:[#allocation2 + $0x9c] sm:$0xf]  ;;  %v4960_v12 = vld [vmem:[#allocation2 + $0xa0] sm:$0xf] }
  0xac   : > { %3884 = vmatmul.mubr.msk.bf16.vlgmr.msra.gmra.mrb[0].mxu1 %vm1755_vm7, %v1718_v19  ;;  %v2461_v14 = vor.u32 %v2460_v39, %v2456_v1  ;;  %v2465_v28 = vrot.slane %v2463_v5, 1  ;;  %v843_v50 = vrot.slane %v841_v46, 1  ;;  %v2475_v59 = vshll.u32 %v4932_v18, 16 }
  0xad   : > { %v4934_v20 = vpop.permute.xlu0 %914  ;;  %2555 = vrot.lane.b32.xlu1 %v2454_v63, %s4239_s6  ;;  %3984 = vmatpush3.bf16.msra.mxu1 %v4877_v29  ;;  %v583_v63 = vld [vmem:[#allocation2 + $0x78] sm:$0xe]  ;;  %v2468_v29 = vshrl.u32 %v4917_v49, 16  ;;  %v2472_v26 = vrot.slane %v2470_v24, 1  ;;  %v858_v33 = vshll.u32 %v4941_v4, 16  ;;  %v2645_v39 = vsel %vm990_vm2, %v2643_v30, %v2644_v15 }
  0xae   : > { %v2646_v5 = vrot.slane %v3736_v22, 1  ;;  %v2647_v46 = vrot.slane %v4904_v25, 1  ;;  %v3605_v17 = vcombine.low %v583_v63, %v4891_v10  ;;  %v2466_v54 = vsel %vm717_vm3, %v2461_v14, %v2465_v28 }
  0xaf   : > { %v4947_v19 = vpop.permute.xlu1 %1039  ;;  %926 = vrot.lane.b32.xlu0 %v825_v11, %s4239_s6  ;;  %v4967_v11 = vld [vmem:[#allocation2 + $0xa4] ss:$0 sps:$4 sm:$0x11]   ;;  %v1018_v13 = vrot.slane %v3604_v48, 1  ;;  %v1019_v24 = vrot.slane %v4855_v0, 1  ;;  %v844_v8 = vor.u32 %v843_v50, %v839_v55  ;;  %v2477_v45 = vrot.slane %v2475_v59, 1 }
  0xb0   : > { %v853_v15 = vshll.u32 %v4955_v62, 16  ;;  %v4974_v30 = vcombine.low %v2177_v27, %v4960_v12  ;;  %v2473_v25 = vor.u32 %v2472_v26, %v2468_v29  ;;  %v851_v10 = vshrl.u32 %v4955_v62, 16  ;;  %v2213_v55 = vld [vmem:[#allocation2 + $0x90] sm:$0xe]  ;;  %v2179_v27 = vld [vmem:[#allocation2 + $0xa8] sm:$0xf] }
  0xb1   : > { %1055 = vrot.lane.b32.xlu1 %v1017_v52, %s4238_s30  ;;  %v4962_v1 = vpop.permute.xlu0 %916  ;;  %v848_v52 = vrot.slane %v846_v42, 1  ;;  %v4978_v22 = vrot.slane %v858_v33, 1  ;;  %v1022_v48 = vrot.slane %v4927_v16, 1  ;;  %v2648_v14 = vsel %vm990_vm2, %v2646_v5, %v2647_v46  ;;  %v584_v42 = vld [vmem:[#allocation2 + $0x84] sm:$0xe] }
  0xb2   : > { %v1021_v28 = vrot.slane %v3605_v17, 1  ;;  %v2487_v50 = vshll.u32 %v4967_v11, 16  ;;  %v1020_v59 = vsel %vm990_vm2, %v1018_v13, %v1019_v24  ;;  %v855_v26 = vrot.slane %v853_v15, 1  ;;  %v4991_v5 = vld [vmem:[#allocation2 + $0x94] sm:$0xf] }
  0xb3   : > { %v913_v49 = vpop.permute.xlu1 %912  ;;  %928 = vrot.lane.b32.xlu0 %v837_v56, %s4239_s6  ;;  %v4984_v56 = vld [vmem:[#allocation2 + $0xac] sm:$0xf]  ;;  %v849_v16 = vsel %vm717_vm3, %v844_v8, %v848_v52  ;;  %v2482_v33 = vshll.u32 %v4974_v30, 16  ;;  %v1077_v46 = vsel %vm1071_vm5, %v4374_v60, %v4934_v20  ;;  %v2214_v8 = vld [vmem:[#allocation2 + $0x9c] sm:$0xe]  ;;  %v2480_v52 = vshrl.u32 %v4974_v30, 16 }
  0xb4   : > { %v1075_v13 = vsel %vm1071_vm5, %v4364_v44, %v913_v49  ;;  %v5005_v60 = vrot.slane %v2487_v50, 1  ;;  %v5008_v20 = vcombine.low %v2179_v27, %v4984_v56  ;;  %v3606_v44 = vcombine.low %v584_v42, %v4939_v6 }
  0xb5   : > { %2683 = vrot.lane.b32.xlu1 %v2645_v39, %s4238_s30  ;;  %v1530_v0 = vpop.permute.xlu0 %1529  ;;  %v549_v39 = vld [vmem:[#allocation2 + $0x90] sm:$0xf]  ;;  %v3738_v50 = vcombine.low %v2214_v8, %v4960_v12  ;;  %v856_v6 = vor.u32 %v855_v26, %v851_v10  ;;  %v1110_v12 = vsel %vm1104_vm6, %v1077_v46, %v4900_v7  ;;  %v1025_v27 = vrot.slane %v4941_v4, 1 }
  0xb6   : > { %v5016_v49 = vcombine.low %v549_v39, %v4991_v5  ;;  %v2494_v10 = vshll.u32 %v5008_v20, 16  ;;  %v585_v46 = vld [vmem:[#allocation2 + $0x90] sm:$0xe] }
  0xb7   : > { %v1528_v63 = vpop.permute.xlu1 %1527  ;;  %2557 = vrot.lane.b32.xlu0 %v2466_v54, %s4239_s6  ;;  %v2478_v54 = vsel %vm717_vm3, %v2473_v25, %v2477_v45  ;;  %v1690_v45 = vsel %vm1071_vm5, %v4411_v53, %v1530_v0  ;;  %v5023_v53 = vld [vmem:[#allocation2 + $0x98] ss:$0 sps:$4 sm:$0x11]   ;;  %v1023_v0 = vsel %vm990_vm2, %v1021_v28, %v1022_v48  ;;  %v5042_v28 = vrot.slane %v3606_v44, 1 }
  0xb8   : > { %v1688_v29 = vsel %vm1071_vm5, %v4403_v41, %v1528_v63  ;;  %v3737_v41 = vcombine.low %v2213_v55, %v4897_v43  ;;  %v551_v55 = vld [vmem:[#allocation2 + $0x9c] sm:$0xf]  ;;  %v865_v7 = vshll.u32 %v5016_v49, 16  ;;  %v2652_v26 = vrot.slane %v3738_v50, 1 }
  0xb9   : > { %2685 = vrot.lane.b32.xlu1 %v2648_v14, %s4238_s30  ;;  %v1720_v17 = vsel %vm1104_vm6, %v1688_v29, %v4923_v58  ;;  %v911_v24 = vpop.permute.xlu0 %910  ;;  %v2484_v14 = vrot.slane %v2482_v33, 1  ;;  %v2653_v29 = vrot.slane %v4967_v11, 1  ;;  %v870_v33 = vshll.u32 %v5023_v53, 16 }
  0xba   : > { %3887 = vmatprep.mubr.msk.bf16.mxu1 %vm1755_vm7, %v1720_v17  ;;  %v1073_v43 = vsel %vm1071_vm5, %v4395_v37, %v911_v24  ;;  %v1108_v37 = vsel %vm1104_vm6, %v1075_v13, %v4861_v35  ;;  %v2649_v63 = vrot.slane %v3737_v41, 1  ;;  %v5038_v35 = vld [vmem:[#allocation2 + $0xb0] ss:$0 sps:$4 sm:$0x11]   ;;  %v861_v17 = vsel %vm717_vm3, %v856_v6, %v4978_v22  ;;  %v2181_v41 = vld [vmem:[#allocation2 + $0xb4] sm:$0xf] }
  0xbb   : > { %v1658_v58 = vpop.permute.xlu1 %1657  ;;  %1057 = vrot.lane.b32.xlu0 %v1020_v59, %s4238_s30  ;;  %v1106_v15 = vsel %vm1104_vm6, %v1073_v43, %v4947_v19  ;;  %v5031_v19 = vld [vmem:[#allocation2 + $0xa0] sm:$0xf]  ;;  %v2650_v59 = vrot.slane %v4932_v18, 1  ;;  %v2485_v18 = vor.u32 %v2484_v14, %v2480_v52  ;;  %v2492_v11 = vshrl.u32 %v5008_v20, 16  ;;  %v5063_v52 = vld [vmem:[#allocation2 + $0xb8] sm:$0xf] }
  0xbc   : > { %v1722_v25 = vsel %vm1104_vm6, %v1690_v45, %v1658_v58  ;;  %3917 = vmatprep.mubr.msk.bf16.mxu0 %vm1755_vm7, %v1106_v15  ;;  %v5053_v39 = vcombine.low %v551_v55, %v5031_v19  ;;  %v2496_v13 = vrot.slane %v2494_v10, 1  ;;  %v2499_v24 = vshll.u32 %v5038_v35, 16  ;;  %v508_v45 = vld [vmem:[%s383_s14] sm:$0xf]  ;;  %v509_v15 = vld [vmem:[%s383_s14 + $0x4] sm:$0xf] }
  0xbd   : > { %2559 = vrot.lane.b32.xlu1 %v2478_v54, %s4239_s6  ;;  %v1046_v42 = vpop.permute.xlu0 %1045  ;;  %3918 = vmatmul.mubr.msk.bf16.vlgmr.msra.gmra.mrb[0].mxu0 %vm1755_vm7, %v1108_v37  ;;  %v5059_v54 = vld [vmem:[#allocation2 + $0xa4] ss:$0 sps:$4 sm:$0x11]   ;;  %v863_v58 = vshrl.u32 %v5016_v49, 16  ;;  %v867_v44 = vrot.slane %v865_v7, 1  ;;  %v1079_v14 = vsel %vm1071_vm5, %v4398_v38, %v4962_v1  ;;  %v2490_v37 = vsel %vm717_vm3, %v2485_v18, %v5005_v60 }
  0xbe   : > { %3888 = vmatmul.mubr.msk.bf16.gmra.mrb[4].mxu1 %vm1755_vm7, %v1722_v25  ;;  %3921 = vmatprep.mubr.msk.bf16.mxu0 %vm1755_vm7, %v1110_v12  ;;  %v510_v25 = vld [vmem:[%s383_s14 + $0x8] sm:$0x1]  ;;  %512 = vst.msk [vmem:[#allocation2 + $0xcc] sm:$0xf] %vm452_vm0, %v508_v45  ;;  %513 = vst.msk [vmem:[#allocation2 + $0xd0] sm:$0xf] %vm452_vm0, %v509_v15  ;;  %v2654_v38 = vsel %vm990_vm2, %v2652_v26, %v2653_v29  ;;  %v3607_v1 = vcombine.low %v585_v46, %v4991_v5 }
  0xbf   : > { %v1532_v48 = vpop.permute.xlu1 %1531  ;;  %930 = vrot.lane.b32.xlu0 %v849_v16, %s4239_s6  ;;  %v2651_v16 = vsel %vm990_vm2, %v2649_v63, %v2650_v59  ;;  %514 = vst.msk [vmem:[#allocation2 + $0xd4] sm:$0x1] %vm455_vm1, %v510_v25  ;;  %v5793_v6 = vmov 0   ;;  %v5086_v55 = vcombine.low %v2181_v41, %v5063_v52  ;;  %v4211_v60 = vld [vmem:[%s5756_s3 + $0x10] sm:$0x3f]   ;;  %v872_v12 = vrot.slane %v870_v33, 1 }
  0xc0   : > { %522 = vst.msk [vmem:[#allocation2 + $0xcc] sm:$0xf] %vm452_vm0, %v5793_v6  ;;  %523 = vst.msk [vmem:[#allocation2 + $0xd0] sm:$0xf] %vm452_vm0, %v5793_v6  ;;  %v2497_v63 = vor.u32 %v2496_v13, %v2492_v11  ;;  %v2501_v59 = vrot.slane %v2499_v24, 1  ;;  %v882_v5 = vshll.u32 %v5059_v54, 16  ;;  %v1692_v29 = vsel %vm1071_vm5, %v4438_v40, %v1532_v48  ;;  %4052 = vmatprep.subr.msk.bf16.mxu0 %vm1788_vm4, %v4211_v60 }
  0xc1   : > { %1059 = vrot.lane.b32.xlu1 %v1023_v0, %s4238_s30  ;;  %v919_v8 = vpop.permute.xlu0 %918  ;;  %v1112_v0 = vsel %vm1104_vm6, %v1079_v14, %v1046_v42  ;;  %524 = vst.msk [vmem:[#allocation2 + $0xd4] sm:$0x1] %vm455_vm1, %v5793_v6  ;;  %v5097_v10 = vld [vmem:[#allocation2 + $0xbc] ss:$0 sps:$4 sm:$0x11]   ;;  %v868_v18 = vor.u32 %v867_v44, %v863_v58  ;;  %v875_v11 = vshrl.u32 %v5053_v39, 16  ;;  %v1026_v40 = vsel %vm990_vm2, %v5042_v28, %v1025_v27 }
  0xc2   : > { %v1081_v43 = vsel %vm1071_vm5, %v4433_v31, %v919_v8  ;;  %v877_v31 = vshll.u32 %v5053_v39, 16  ;;  %v2215_v26 = vld [vmem:[#allocation2 + $0xa8] sm:$0xe]  ;;  %v2183_v46 = vld [vmem:[#allocation2 + $0xc0] sm:$0xf]  ;;  %v1027_v48 = vrot.slane %v3607_v1, 1  ;;  %v2502_v45 = vsel %vm717_vm3, %v2497_v63, %v2501_v59 }
  0xc3   : > { %v1048_v22 = vpop.permute.xlu1 %1047  ;;  %932 = vrot.lane.b32.xlu0 %v861_v17, %s4239_s6  ;;  %v5102_v17 = vld [vmem:[#allocation2 + $0xc4] sm:$0xf]  ;;  %v2506_v8 = vshll.u32 %v5086_v55, 16  ;;  %v5115_v13 = vld [vmem:[#allocation2 + $0xac] sm:$0xf]  ;;  %v3739_v4 = vcombine.low %v2215_v26, %v4984_v56  ;;  %v873_v44 = vsel %vm717_vm3, %v868_v18, %v872_v12  ;;  %v884_v15 = vrot.slane %v882_v5, 1 }
  0xc4   : > { %v1114_v50 = vsel %vm1104_vm6, %v1081_v43, %v1048_v22  ;;  %v879_v41 = vrot.slane %v877_v31, 1  ;;  %v1028_v43 = vrot.slane %v5023_v53, 1  ;;  %v2216_v22 = vld [vmem:[#allocation2 + $0xb4] sm:$0xe]  ;;  %v5121_v28 = vcombine.low %v2183_v46, %v5102_v17 }
  0xc5   : > { %2687 = vrot.lane.b32.xlu1 %v2651_v16, %s4238_s30  ;;  %v921_v42 = vpop.permute.xlu0 %920  ;;  %3922 = vmatmul.mubr.msk.bf16.gmra.mrb[4].mxu0 %vm1755_vm7, %v1112_v0  ;;  %v553_v16 = vld [vmem:[#allocation2 + $0xa8] sm:$0xf]  ;;  %v2511_v25 = vshll.u32 %v5097_v10, 16  ;;  %v2508_v31 = vrot.slane %v2506_v8, 1  ;;  %v2656_v6 = vrot.slane %v5038_v35, 1  ;;  %v3740_v0 = vcombine.low %v2216_v22, %v5063_v52 }
  0xc6   : > { %3925 = vmatprep.mubr.msk.bf16.mxu0 %vm1755_vm7, %v1114_v50  ;;  %v880_v53 = vor.u32 %v879_v41, %v875_v11  ;;  %v586_v50 = vld [vmem:[#allocation2 + $0x9c] sm:$0xe]  ;;  %v5130_v56 = vcombine.low %v553_v16, %v5115_v13  ;;  %v1083_v1 = vsel %vm1071_vm5, %v4455_v57, %v921_v42  ;;  %v1029_v63 = vsel %vm990_vm2, %v1027_v48, %v1028_v43  ;;  %v555_v5 = vld [vmem:[#allocation2 + $0xb4] sm:$0xf]  ;;  %v587_v22 = vld [vmem:[#allocation2 + $0xa8] sm:$0xe] }
  0xc7   : > { %v1660_v7 = vpop.permute.xlu1 %1659  ;;  %2561 = vrot.lane.b32.xlu0 %v2490_v37, %s4239_s6  ;;  %v2804_v37 = vsel %vm1788_vm4, %v4211_v60, 0  ;;  %v2655_v60 = vrot.slane %v3739_v4, 1  ;;  %v2518_v59 = vshll.u32 %v5121_v28, 16  ;;  %v2513_v18 = vrot.slane %v2511_v25, 1 }
  0xc8   : > { %v1724_v33 = vsel %vm1104_vm6, %v1692_v29, %v1660_v7  ;;  %v5144_v29 = vld [vmem:[#allocation2 + $0xb8] sm:$0xf]  ;;  %3950 = vmatpush3.bf16.msra.mxu0 %v2804_v37  ;;  %v5147_v52 = vld [vmem:[#allocation2 + $0xb0] ss:$0 sps:$4 sm:$0x11]   ;;  %v885_v57 = vsel %vm717_vm3, %v880_v53, %v884_v15  ;;  %v3608_v42 = vcombine.low %v586_v50, %v5031_v19  ;;  %v2659_v26 = vrot.slane %v5097_v10, 1 }
  0xc9   : > { %2689 = vrot.lane.b32.xlu1 %v2654_v38, %s4238_s30  ;;  %3891 = vmatprep.mubr.msk.bf16.mxu1 %vm1755_vm7, %v1724_v33  ;;  %v1534_v24 = vpop.permute.xlu0 %1533  ;;  %v5138_v38 = vld [vmem:[#allocation2 + $0xc8] ss:$0 sps:$4 sm:$0x11]   ;;  %v889_v46 = vshll.u32 %v5130_v56, 16  ;;  %v2658_v11 = vrot.slane %v3740_v0, 1  ;;  %v2657_v8 = vsel %vm990_vm2, %v2655_v60, %v2656_v6  ;;  %v2516_v16 = vshrl.u32 %v5121_v28, 16 }
  0xca   : > { %v1694_v27 = vsel %vm1071_vm5, %v4466_v9, %v1534_v24  ;;  %v2504_v9 = vshrl.u32 %v5086_v55, 16  ;;  %v2523_v41 = vshll.u32 %v5138_v38, 16  ;;  %v2520_v24 = vrot.slane %v2518_v59, 1  ;;  %v2185_v19 = vld [vmem:[#allocation2 + $0xcc] sm:$0xf] }
  0xcb   : > { %v1662_v58 = vpop.permute.xlu1 %1661  ;;  %1061 = vrot.lane.b32.xlu0 %v1026_v40, %s4238_s30  ;;  %v5158_v40 = vcombine.low %v555_v5, %v5144_v29  ;;  %v894_v4 = vshll.u32 %v5147_v52, 16  ;;  %v891_v15 = vrot.slane %v889_v46, 1  ;;  %v5171_v25 = vld [vmem:[#allocation2 + $0xbc] ss:$0 sps:$4 sm:$0x11]   ;;  %v3609_v0 = vcombine.low %v587_v22, %v5115_v13 }
  0xcc   : > { %v1726_v14 = vsel %vm1104_vm6, %v1694_v27, %v1662_v58  ;;  %v2509_v33 = vor.u32 %v2508_v31, %v2504_v9  ;;  %v1031_v58 = vrot.slane %v5059_v54, 1  ;;  %v2217_v37 = vld [vmem:[#allocation2 + $0xc0] sm:$0xe]  ;;  %v2660_v54 = vsel %vm990_vm2, %v2658_v11, %v2659_v26 }
  0xcd   : > { %2563 = vrot.lane.b32.xlu1 %v2502_v45, %s4239_s6  ;;  %3892 = vmatmul.mubr.msk.bf16.gmra.mrb[8].mxu1 %vm1755_vm7, %v1726_v14  ;;  %v1050_v12 = vpop.permute.xlu0 %1049  ;;  %v5162_v45 = vld [vmem:[#allocation2 + $0xd0] sm:$0xf]  ;;  %v901_v53 = vshll.u32 %v5158_v40, 16  ;;  %v2521_v31 = vor.u32 %v2520_v24, %v2516_v16  ;;  %v2525_v6 = vrot.slane %v2523_v41, 1  ;;  %v906_v5 = vshll.u32 %v5171_v25, 16 }
  0xce   : > { %v1116_v7 = vsel %vm1104_vm6, %v1083_v1, %v1050_v12  ;;  %v2514_v14 = vsel %vm717_vm3, %v2509_v33, %v2513_v18  ;;  %v5178_v50 = vcombine.low %v2185_v19, %v5162_v45  ;;  %v899_v13 = vshrl.u32 %v5158_v40, 16  ;;  %v2218_v41 = vld [vmem:[#allocation2 + $0xcc] sm:$0xe] }
  0xcf   : > { %v1536_v35 = vpop.permute.xlu1 %1535  ;;  %934 = vrot.lane.b32.xlu0 %v873_v44, %s4239_s6  ;;  %3926 = vmatmul.mubr.msk.bf16.gmra.mrb[8].mxu0 %vm1755_vm7, %v1116_v7  ;;  %v887_v44 = vshrl.u32 %v5130_v56, 16  ;;  %v3741_v7 = vcombine.low %v2217_v37, %v5102_v17  ;;  %v2526_v26 = vsel %vm717_vm3, %v2521_v31, %v2525_v6  ;;  %v1033_v46 = vrot.slane %v3609_v0, 1 }
  0xd0   : > { %v1696_v1 = vsel %vm1071_vm5, %v4493_v51, %v1536_v35  ;;  %v903_v51 = vrot.slane %v901_v53, 1  ;;  %v4210_v35 = vld [vmem:[#allocation2 + $0xd4] ss:$0 sps:$4 sm:$0x11]   ;;  %v1034_v33 = vrot.slane %v5147_v52, 1  ;;  %v908_v16 = vrot.slane %v906_v5, 1 }
  0xd1   : > { %1063 = vrot.lane.b32.xlu1 %v1029_v63, %s4238_s30  ;;  %v923_v48 = vpop.permute.xlu0 %922  ;;  %v896_v63 = vrot.slane %v894_v4, 1  ;;  %v892_v59 = vor.u32 %v891_v15, %v887_v44  ;;  %v2661_v24 = vrot.slane %v3741_v7, 1  ;;  %v2528_v52 = vshrl.u32 %v5178_v50, 16 }
  0xd2   : > { %v1085_v10 = vsel %vm1071_vm5, %v4482_v36, %v923_v48  ;;  %v1030_v36 = vrot.slane %v3608_v42, 1  ;;  %v904_v19 = vor.u32 %v903_v51, %v899_v13  ;;  %v1035_v22 = vsel %vm990_vm2, %v1033_v46, %v1034_v33 }
  0xd3   : > { %v1052_v43 = vpop.permute.xlu1 %1051  ;;  %936 = vrot.lane.b32.xlu0 %v885_v57, %s4239_s6  ;;  %v2530_v57 = vshll.u32 %v5178_v50, 16  ;;  %v3742_v44 = vcombine.low %v2218_v41, %v5162_v45  ;;  %v2665_v45 = vrot.slane %v4210_v35, 1 }
  0xd4   : > { %v1118_v27 = vsel %vm1104_vm6, %v1085_v10, %v1052_v43  ;;  %v1032_v18 = vsel %vm990_vm2, %v1030_v36, %v1031_v58  ;;  %v2535_v43 = vshll.u32 %v4210_v35, 16  ;;  %v588_v58 = vld [vmem:[#allocation2 + $0xb4] sm:$0xe]  ;;  %v909_v36 = vsel %vm717_vm3, %v904_v19, %v908_v16  ;;  %v5795_v19 = vld [vmem:[#allocation3_spill] sm:$0xff] }
  0xd5   : > { %2691 = vrot.lane.b32.xlu1 %v2657_v8, %s4238_s30  ;;  %3929 = vmatprep.mubr.msk.bf16.mxu0 %vm1755_vm7, %v1118_v27  ;;  %v925_v9 = vpop.permute.xlu0 %924  ;;  %v897_v8 = vsel %vm717_vm3, %v892_v59, %v896_v63  ;;  %v2532_v10 = vrot.slane %v2530_v57, 1  ;;  %v2662_v27 = vrot.slane %v5138_v38, 1  ;;  %v3610_v37 = vcombine.low %v588_v58, %v5144_v29 }
  0xd6   : > { %v2537_v53 = vrot.slane %v2535_v43, 1 }
  0xd7   : > { %v1664_v12 = vpop.permute.xlu1 %1663  ;;  %2565 = vrot.lane.b32.xlu0 %v2514_v14, %s4239_s6  ;;  %v2663_v38 = vsel %vm990_vm2, %v2661_v24, %v2662_v27  ;;  %v1036_v29 = vrot.slane %v3610_v37, 1  ;;  %v5798_v37 = vld [vmem:[#allocation7_spill] sm:$0xff] }
  0xd8   : > { %v1728_v60 = vsel %vm1104_vm6, %v1696_v1, %v1664_v12  ;;  %v1037_v12 = vrot.slane %v5171_v25, 1 }
  0xd9   : > { %2693 = vrot.lane.b32.xlu1 %v2660_v54, %s4238_s30  ;;  %3895 = vmatprep.mubr.msk.bf16.mxu1 %vm1755_vm7, %v1728_v60  ;;  %v1538_v42 = vpop.permute.xlu0 %1537  ;;  %v2664_v54 = vrot.slane %v3742_v44, 1 }
  0xda   : > { %v1698_v17 = vsel %vm1071_vm5, %v4554_v61, %v1538_v42  ;;  %v1087_v61 = vsel %vm1071_vm5, %v4508_v2, %v925_v9  ;;  %v2533_v2 = vor.u32 %v2532_v10, %v2528_v52  ;;  %v1038_v7 = vsel %vm990_vm2, %v1036_v29, %v1037_v12  ;;  %v5800_v12 = vld [vmem:[#allocation10_spill] sm:$0xff] }
  0xdb   : > { %v1666_v11 = vpop.permute.xlu1 %1665  ;;  %1065 = vrot.lane.b32.xlu0 %v1032_v18, %s4238_s30  ;;  %v2666_v60 = vsel %vm990_vm2, %v2664_v54, %v2665_v45  ;;  %v5799_v45 = vld [vmem:[#allocation8_spill] sm:$0xff] }
  0xdc   : > { %v1730_v48 = vsel %vm1104_vm6, %v1698_v17, %v1666_v11  ;;  %v2538_v1 = vsel %vm717_vm3, %v2533_v2, %v2537_v53 }
  0xdd   : > { %2567 = vrot.lane.b32.xlu1 %v2526_v26, %s4239_s6  ;;  %3896 = vmatmul.mubr.msk.bf16.gmra.mrb[12].mxu1 %vm1755_vm7, %v1730_v48  ;;  %v1054_v4 = vpop.permute.xlu0 %1053 }
  0xde   : > { %v1120_v15 = vsel %vm1104_vm6, %v1087_v61, %v1054_v4  ;;  %v5796_v4 = vld [vmem:[#allocation6_spill] sm:$0xff] }
  0xdf   : > { %v2540_v14 = vpop.permute.xlu1 %2539  ;;  %938 = vrot.lane.b32.xlu0 %v897_v8, %s4239_s6  ;;  %3930 = vmatmul.mubr.msk.bf16.gmra.mrb[12].mxu0 %vm1755_vm7, %v1120_v15  ;;  %v5794_v8 = vld [vmem:[#allocation4_spill] sm:$0xff]  ;;  %v5797_v15 = vld [vmem:[#allocation5_spill] sm:$0xff] }
  0xe1   : > { %1067 = vrot.lane.b32.xlu1 %v1035_v22, %s4238_s30  ;;  %v1540_v9 = vpop.permute.xlu0 %1539 }
  0xe2   : > { %v1700_v31 = vsel %vm1071_vm5, %v4566_v21, %v1540_v9  ;;  %v2700_v21 = vsel %vm1071_vm5, %v4538_v34, %v2540_v14 }
  0xe3   : > { %v1668_v6 = vpop.permute.xlu1 %1667  ;;  %940 = vrot.lane.b32.xlu0 %v909_v36, %s4239_s6 }
  0xe4   : > { %v1732_v0 = vsel %vm1104_vm6, %v1700_v31, %v1668_v6 }
  0xe5   : > { %2695 = vrot.lane.b32.xlu1 %v2663_v38, %s4238_s30  ;;  %3899 = vmatprep.mubr.msk.bf16.mxu1 %vm1755_vm7, %v1732_v0  ;;  %v1542_v63 = vpop.permute.xlu0 %1541 }
  0xe6   : > { %v1702_v51 = vsel %vm1071_vm5, %v4582_v32, %v1542_v63 }
  0xe7   : > { %v2668_v59 = vpop.permute.xlu1 %2667  ;;  %2569 = vrot.lane.b32.xlu0 %v2538_v1, %s4239_s6 }
  0xe8   : > { %v2732_v5 = vsel %vm1104_vm6, %v2700_v21, %v2668_v59 }
  0xe9   : > { %2697 = vrot.lane.b32.xlu1 %v2666_v60, %s4238_s30  ;;  %3951 = vmatprep.mubr.msk.bf16.mxu0 %vm1755_vm7, %v2732_v5  ;;  %v2542_v18 = vpop.permute.xlu0 %2541  ;;  %v5801_v5 = vld [vmem:[#allocation9_spill] sm:$0xff] }
  0xea   : > { %v2702_v25 = vsel %vm1071_vm5, %v4578_v47, %v2542_v18 }
  0xeb   : > { %v2670_v13 = vpop.permute.xlu1 %2669  ;;  %1069 = vrot.lane.b32.xlu0 %v1038_v7, %s4238_s30 }
  0xec   : > { %v2734_v34 = vsel %vm1104_vm6, %v2702_v25, %v2670_v13 }
  0xed   : > { %3952 = vmatmul.mubr.msk.bf16.vlgmr.msra.gmra.mrb[0].mxu0 %vm1755_vm7, %v2734_v34  ;;  %v1670_v35 = vpop.permute.xlu0 %1669  ;;  %v5802_v34 = vld [vmem:[#allocation12_spill] sm:$0xff] }
  0xee   : > { %v1734_v57 = vsel %vm1104_vm6, %v1702_v51, %v1670_v35 }
  0xef   : > { %v2544_v42 = vpop.permute.xlu1 %2543  ;;  %3900 = vmatmul.mubr.msk.bf16.gmra.mrb[16].mxu1 %vm1755_vm7, %v1734_v57 }
  0xf0   : > { %v2704_v11 = vsel %vm1071_vm5, %v4612_v23, %v2544_v42  ;;  %v5803_v42 = vld [vmem:[#allocation11_spill] sm:$0xff] }
  0xf1   : > { %v1544_v26 = vpop.permute.xlu0 %1543 }
  0xf2   : > { %v1704_v47 = vsel %vm1071_vm5, %v4635_v3, %v1544_v26 }
  0xf3   : > { %v1672_v46 = vpop.permute.xlu1 %1671 }
  0xf4   : > { %v1736_v33 = vsel %vm1104_vm6, %v1704_v47, %v1672_v46 }
  0xf5   : > { %3903 = vmatprep.mubr.msk.bf16.mxu1 %vm1755_vm7, %v1736_v33  ;;  %v1546_v17 = vpop.permute.xlu0 %1545 }
  0xf6   : > { %v1706_v52 = vsel %vm1071_vm5, %v5795_v19, %v1546_v17 }
  0xf7   : > { %v2672_v32 = vpop.permute.xlu1 %2671 }
  0xf8   : > { %v2736_v41 = vsel %vm1104_vm6, %v2704_v11, %v2672_v32  ;;  %v5804_v11 = vld [vmem:[#allocation14_spill] sm:$0xff] }
  0xf9   : > { %3955 = vmatprep.mubr.msk.bf16.mxu0 %vm1755_vm7, %v2736_v41  ;;  %v2546_v48 = vpop.permute.xlu0 %2545 }
  0xfa   : > { %v2706_v16 = vsel %vm1071_vm5, %v5794_v8, %v2546_v48 }
  0xfb   : > { %v2674_v24 = vpop.permute.xlu1 %2673 }
  0xfc   : > { %v2738_v3 = vsel %vm1104_vm6, %v2706_v16, %v2674_v24  ;;  %v5805_v16 = vld [vmem:[#allocation13_spill] sm:$0xff] }
  0xfd   : > { %3956 = vmatmul.mubr.msk.bf16.gmra.mrb[4].mxu0 %vm1755_vm7, %v2738_v3  ;;  %v1674_v10 = vpop.permute.xlu0 %1673 }
  0xfe   : > { %v1738_v23 = vsel %vm1104_vm6, %v1706_v52, %v1674_v10  ;;  %v5806_v10 = vld [vmem:[#allocation16_spill] sm:$0xff] }
  0xff   : > { %v2548_v43 = vpop.permute.xlu1 %2547  ;;  %3904 = vmatmul.mubr.msk.bf16.gmra.mrb[20].mxu1 %vm1755_vm7, %v1738_v23 }
 0x100   : > { %v2708_v14 = vsel %vm1071_vm5, %v5797_v15, %v2548_v43 }
 0x101   : > { %v1548_v61 = vpop.permute.xlu0 %1547 }
 0x102   : > { %v1708_v22 = vsel %vm1071_vm5, %v5796_v4, %v1548_v61  ;;  %v5807_v4 = vld [vmem:[#allocation15_spill] sm:$0xff] }
 0x103   : > { %v1676_v27 = vpop.permute.xlu1 %1675 }
 0x104   : > { %v1740_v58 = vsel %vm1104_vm6, %v1708_v22, %v1676_v27 }
 0x105   : > { %3907 = vmatprep.mubr.msk.bf16.mxu1 %vm1755_vm7, %v1740_v58  ;;  %v1550_v44 = vpop.permute.xlu0 %1549 }
 0x106   : > { %v1710_v31 = vsel %vm1071_vm5, %v5799_v45, %v1550_v44 }
 0x107   : > { %v2676_v36 = vpop.permute.xlu1 %2675 }
 0x108   : > { %v2740_v2 = vsel %vm1104_vm6, %v2708_v14, %v2676_v36  ;;  %v5808_v14 = vld [vmem:[#allocation17_spill] sm:$0xff] }
 0x109   : > { %3959 = vmatprep.mubr.msk.bf16.mxu0 %vm1755_vm7, %v2740_v2  ;;  %v2550_v53 = vpop.permute.xlu0 %2549 }
 0x10a   : > { %v2710_v9 = vsel %vm1071_vm5, %v5798_v37, %v2550_v53 }
 0x10b   : > { %v2678_v38 = vpop.permute.xlu1 %2677 }
 0x10c   : > { %v2742_v54 = vsel %vm1104_vm6, %v2710_v9, %v2678_v38  ;;  %v5809_v9 = vld [vmem:[#allocation18_spill] sm:$0xff] }
 0x10d   : > { %3960 = vmatmul.mubr.msk.bf16.gmra.mrb[8].mxu0 %vm1755_vm7, %v2742_v54  ;;  %v1678_v6 = vpop.permute.xlu0 %1677 }
 0x10e   : > { %v1742_v0 = vsel %vm1104_vm6, %v1710_v31, %v1678_v6 }
 0x10f   : > { %v2552_v1 = vpop.permute.xlu1 %2551  ;;  %3908 = vmatmul.mubr.msk.bf16.gmra.mrb[24].mxu1 %vm1755_vm7, %v1742_v0 }
 0x110   : > { %v2712_v7 = vsel %vm1071_vm5, %v5801_v5, %v2552_v1 }
 0x111   : > { %v1552_v29 = vpop.permute.xlu0 %1551 }
 0x112   : > { %v1712_v63 = vsel %vm1071_vm5, %v5800_v12, %v1552_v29 }
 0x113   : > { %v1680_v60 = vpop.permute.xlu1 %1679 }
 0x114   : > { %v1744_v21 = vsel %vm1104_vm6, %v1712_v63, %v1680_v60 }
 0x115   : > { %3911 = vmatprep.mubr.msk.bf16.mxu1 %vm1755_vm7, %v1744_v21  ;;  %v1554_v59 = vpop.permute.xlu0 %1553 }
 0x116   : > { %v1714_v26 = vsel %vm1071_vm5, %v5803_v42, %v1554_v59 }
 0x117   : > { %v2680_v18 = vpop.permute.xlu1 %2679 }
 0x118   : > { %v2744_v25 = vsel %vm1104_vm6, %v2712_v7, %v2680_v18 }
 0x119   : > { %3963 = vmatprep.mubr.msk.bf16.mxu0 %vm1755_vm7, %v2744_v25  ;;  %v2554_v13 = vpop.permute.xlu0 %2553 }
 0x11a   : > { %v2714_v51 = vsel %vm1071_vm5, %v5802_v34, %v2554_v13 }
 0x11b   : > { %v2682_v35 = vpop.permute.xlu1 %2681 }
 0x11c   : > { %v2746_v57 = vsel %vm1104_vm6, %v2714_v51, %v2682_v35 }
 0x11d   : > { %3964 = vmatmul.mubr.msk.bf16.gmra.mrb[12].mxu0 %vm1755_vm7, %v2746_v57  ;;  %v1682_v47 = vpop.permute.xlu0 %1681 }
 0x11e   : > { %v1746_v46 = vsel %vm1104_vm6, %v1714_v26, %v1682_v47 }
 0x11f   : > { %v2556_v33 = vpop.permute.xlu1 %2555  ;;  %3912 = vmatmul.mubr.msk.bf16.gmra.mrb[28].mxu1 %vm1755_vm7, %v1746_v46 }
 0x120   : > { %v2716_v24 = vsel %vm1071_vm5, %v5805_v16, %v2556_v33 }
 0x121   : > { %v927_v17 = vpop.permute.xlu0 %926 }
 0x122   : > { %v1089_v32 = vsel %vm1071_vm5, %v5804_v11, %v927_v17 }
 0x123   : > { %v1056_v41 = vpop.permute.xlu1 %1055 }
 0x124   : > { %v1122_v48 = vsel %vm1104_vm6, %v1089_v32, %v1056_v41 }
 0x125   : > { %3933 = vmatprep.mubr.msk.bf16.mxu1 %vm1755_vm7, %v1122_v48  ;;  %v929_v8 = vpop.permute.xlu0 %928 }
 0x126   : > { %v1091_v22 = vsel %vm1071_vm5, %v5807_v4, %v929_v8 }
 0x127   : > { %v2684_v3 = vpop.permute.xlu1 %2683 }
 0x128   : > { %v2748_v19 = vsel %vm1104_vm6, %v2716_v24, %v2684_v3 }
 0x129   : > { %3967 = vmatprep.mubr.msk.bf16.mxu0 %vm1755_vm7, %v2748_v19  ;;  %v2558_v52 = vpop.permute.xlu0 %2557 }
 0x12a   : > { %v2718_v23 = vsel %vm1071_vm5, %v5806_v10, %v2558_v52 }
 0x12b   : > { %v2686_v43 = vpop.permute.xlu1 %2685 }
 0x12c   : > { %v2750_v61 = vsel %vm1104_vm6, %v2718_v23, %v2686_v43 }
 0x12d   : > { %3968 = vmatmul.mubr.msk.bf16.gmra.mrb[16].mxu0 %vm1755_vm7, %v2750_v61  ;;  %v1058_v27 = vpop.permute.xlu0 %1057 }
 0x12e   : > { %v1124_v58 = vsel %vm1104_vm6, %v1091_v22, %v1058_v27 }
 0x12f   : > { %v2560_v44 = vpop.permute.xlu1 %2559  ;;  %3934 = vmatmul.mubr.msk.bf16.vlgmr.msra.gmra.mrb[16].mxu1 %vm1755_vm7, %v1124_v58 }
 0x130   : > { %v2720_v38 = vsel %vm1071_vm5, %v5809_v9, %v2560_v44 }
 0x131   : > { %v931_v15 = vpop.permute.xlu0 %930 }
 0x132   : > { %v1093_v36 = vsel %vm1071_vm5, %v5808_v14, %v931_v15 }
 0x133   : > { %v1060_v2 = vpop.permute.xlu1 %1059 }
 0x134   : > { %v1126_v53 = vsel %vm1104_vm6, %v1093_v36, %v1060_v2 }
 0x135   : > { %3937 = vmatprep.mubr.msk.bf16.mxu1 %vm1755_vm7, %v1126_v53  ;;  %v933_v37 = vpop.permute.xlu0 %932 }
 0x136   : > { %v1095_v29 = vsel %vm1071_vm5, %v4955_v62, %v933_v37 }
 0x137   : > { %v2688_v54 = vpop.permute.xlu1 %2687 }
 0x138   : > { %v2752_v45 = vsel %vm1104_vm6, %v2720_v38, %v2688_v54 }
 0x139   : > { %3971 = vmatprep.mubr.msk.bf16.mxu0 %vm1755_vm7, %v2752_v45  ;;  %v2562_v31 = vpop.permute.xlu0 %2561 }
 0x13a   : > { %v2722_v6 = vsel %vm1071_vm5, %v4974_v30, %v2562_v31 }
 0x13b   : > { %v2690_v0 = vpop.permute.xlu1 %2689 }
 0x13c   : > { %v2754_v1 = vsel %vm1104_vm6, %v2722_v6, %v2690_v0 }
 0x13d   : > { %3972 = vmatmul.mubr.msk.bf16.gmra.mrb[20].mxu0 %vm1755_vm7, %v2754_v1  ;;  %v1062_v12 = vpop.permute.xlu0 %1061 }
 0x13e   : > { %v1128_v63 = vsel %vm1104_vm6, %v1095_v29, %v1062_v12 }
 0x13f   : > { %v2564_v60 = vpop.permute.xlu1 %2563  ;;  %3938 = vmatmul.mubr.msk.bf16.gmra.mrb[20].mxu1 %vm1755_vm7, %v1128_v63 }
 0x140   : > { %v2724_v18 = vsel %vm1071_vm5, %v5008_v20, %v2564_v60 }
 0x141   : > { %v935_v21 = vpop.permute.xlu0 %934 }
 0x142   : > { %v1097_v59 = vsel %vm1071_vm5, %v5016_v49, %v935_v21 }
 0x143   : > { %v1064_v5 = vpop.permute.xlu1 %1063 }
 0x144   : > { %v1130_v30 = vsel %vm1104_vm6, %v1097_v59, %v1064_v5 }
 0x145   : > { %3941 = vmatprep.mubr.msk.bf16.mxu1 %vm1755_vm7, %v1130_v30  ;;  %v937_v7 = vpop.permute.xlu0 %936 }
 0x146   : > { %v1099_v35 = vsel %vm1071_vm5, %v5053_v39, %v937_v7 }
 0x147   : > { %v2692_v62 = vpop.permute.xlu1 %2691 }
 0x148   : > { %v2756_v25 = vsel %vm1104_vm6, %v2724_v18, %v2692_v62 }
 0x149   : > { %3975 = vmatprep.mubr.msk.bf16.mxu0 %vm1755_vm7, %v2756_v25  ;;  %v2566_v13 = vpop.permute.xlu0 %2565 }
 0x14a   : > { %v2726_v34 = vsel %vm1071_vm5, %v5086_v55, %v2566_v13 }
 0x14b   : > { %v2694_v51 = vpop.permute.xlu1 %2693 }
 0x14c   : > { %v2758_v49 = vsel %vm1104_vm6, %v2726_v34, %v2694_v51 }
 0x14d   : > { %3976 = vmatmul.mubr.msk.bf16.gmra.mrb[24].mxu0 %vm1755_vm7, %v2758_v49  ;;  %v1066_v57 = vpop.permute.xlu0 %1065 }
 0x14e   : > { %v1132_v20 = vsel %vm1104_vm6, %v1099_v35, %v1066_v57 }
 0x14f   : > { %v2568_v42 = vpop.permute.xlu1 %2567  ;;  %3942 = vmatmul.mubr.msk.bf16.gmra.mrb[24].mxu1 %vm1755_vm7, %v1132_v20 }
 0x150   : > { %v2728_v17 = vsel %vm1071_vm5, %v5121_v28, %v2568_v42 }
 0x151   : > { %v939_v26 = vpop.permute.xlu0 %938 }
 0x152   : > { %v1101_v47 = vsel %vm1071_vm5, %v5130_v56, %v939_v26 }
 0x153   : > { %v1068_v46 = vpop.permute.xlu1 %1067 }
 0x154   : > { %v1134_v55 = vsel %vm1104_vm6, %v1101_v47, %v1068_v46 }
 0x155   : > { %3945 = vmatprep.mubr.msk.bf16.mxu1 %vm1755_vm7, %v1134_v55  ;;  %v941_v33 = vpop.permute.xlu0 %940 }
 0x156   : > { %v1103_v8 = vsel %vm1071_vm5, %v5158_v40, %v941_v33 }
 0x157   : > { %v2696_v39 = vpop.permute.xlu1 %2695 }
 0x158   : > { %v2760_v11 = vsel %vm1104_vm6, %v2728_v17, %v2696_v39 }
 0x159   : > { %3979 = vmatprep.mubr.msk.bf16.mxu0 %vm1755_vm7, %v2760_v11  ;;  %v2570_v32 = vpop.permute.xlu0 %2569 }
 0x15a   : > { %v2730_v41 = vsel %vm1071_vm5, %v5178_v50, %v2570_v32 }
 0x15b   : > { %v2698_v48 = vpop.permute.xlu1 %2697 }
 0x15c   : > { %v2762_v56 = vsel %vm1104_vm6, %v2730_v41, %v2698_v48 }
 0x15d   : > { %3980 = vmatmul.mubr.msk.bf16.gmra.mrb[28].mxu0 %vm1755_vm7, %v2762_v56  ;;  %v1070_v16 = vpop.permute.xlu0 %1069 }
 0x15e   : > { %v1136_v28 = vsel %vm1104_vm6, %v1103_v8, %v1070_v16 }
 0x15f   : > { %3946 = vmatmul.mubr.msk.bf16.gmra.mrb[28].mxu1 %vm1755_vm7, %v1136_v28 }
 0x17f   : > { %v3885_v24 = vpop.f32.mrb[0].mxu1 }
 0x180   : > { %v1826_v3 = vpop.f32.mrb[1].mxu1 }
 0x181   : > { %v3886_v19 = vpop.f32.mrb[2].mxu1 }
 0x182   : > { %v1829_v52 = vpop.f32.mrb[3].mxu1 }
 0x191   : > { %v3889_v10 = vpop.f32.mrb[4].mxu1 }
 0x192   : > { %v1842_v50 = vpop.f32.mrb[5].mxu1 }
 0x193   : > { %v3890_v23 = vpop.f32.mrb[6].mxu1 }
 0x194   : > { %v1845_v43 = vpop.f32.mrb[7].mxu1 }
 0x1a0   : > { %v5352_v61 = vpop.f32.mrb[8].mxu1 }
 0x1a1   : > { %v5354_v4 = vpop.f32.mrb[9].mxu1 }
 0x1a2   : > { %v5356_v22 = vpop.f32.mrb[10].mxu1 }
 0x1a3   : > { %v5358_v40 = vpop.f32.mrb[11].mxu1 }
 0x1b0   : > { %v5360_v27 = vpop.f32.mrb[12].mxu1 }
 0x1b1   : > { %v5362_v58 = vpop.f32.mrb[13].mxu1 }
 0x1b2   : > { %v5364_v44 = vpop.f32.mrb[14].mxu1 }
 0x1b3   : > { %v5366_v15 = vpop.f32.mrb[15].mxu1 }
 0x1c0   : > { %v3953_v14 = vpop.f32.mrb[0].mxu0 }
 0x1c1   : > { %v3985_v36 = vadd.f32 %v3953_v14, %v3885_v24  ;;  %v2840_v2 = vpop.f32.mrb[1].mxu0 }
 0x1c2   : > { %v3986_v53 = vadd.f32 %v2840_v2, %v1826_v3  ;;  %v3954_v37 = vpop.f32.mrb[2].mxu0 }
 0x1c3   : > { %v5369_v9 = vmax.f32 %v3985_v36, 0.0  ;;  %v3987_v38 = vadd.f32 %v3954_v37, %v3886_v19  ;;  %v2843_v54 = vpop.f32.mrb[3].mxu0 }
 0x1c4   : > { %v5376_v45 = vmax.f32 %v3986_v53, 0.0  ;;  %v3988_v31 = vadd.f32 %v2843_v54, %v1829_v52 }
 0x1c5   : > { %v3800_v6 = vpack.c.bf16 %v5369_v9, %v5369_v9  ;;  %v5380_v0 = vmax.f32 %v3987_v38, 0.0  ;;  %v3195_v46 = vsel %vm1104_vm6, %v5369_v9, 0.0 }
 0x1c6   : > { %v3798_v1 = vpack.c.bf16 %v5376_v45, %v5376_v45  ;;  %v5384_v29 = vmax.f32 %v3988_v31, 0.0  ;;  %v3192_v20 = vsel %vm1104_vm6, %v5376_v45, 0.0 }
 0x1c7   : > { %3162 = vst.msk [vmem:[%s5374_s26 + $0x8] sm:$0xf] %vm3159_vm8, %v3800_v6  ;;  %v3801_v12 = vpack.c.bf16 %v5380_v0, %v5380_v0  ;;  %v3197_v33 = vsel %vm1104_vm6, %v5380_v0, 0.0 }
 0x1c8   : > { %3160 = vst.msk [vmem:[%s5374_s26] sm:$0xf] %vm3159_vm8, %v3798_v1  ;;  %v3799_v63 = vpack.c.bf16 %v5384_v29, %v5384_v29  ;;  %v3193_v34 = vsel %vm1104_vm6, %v5384_v29, 0.0 }
 0x1c9   : > { %3163 = vst.msk [vmem:[%s5374_s26 + $0xc] sm:$0xf] %vm3159_vm8, %v3801_v12  ;;  %v3194_v26 = vadd.f32 %v3193_v34, %v3192_v20 }
 0x1ca   : > { %3161 = vst.msk [vmem:[%s5374_s26 + $0x4] sm:$0xf] %vm3159_vm8, %v3799_v63 }
 0x1cb   : > { %v3196_v55 = vadd.f32 %v3195_v46, %v3194_v26 }
 0x1cd   : > { %v3198_v39 = vadd.f32 %v3197_v33, %v3196_v55 }
 0x1d0   : > { %v3957_v60 = vpop.f32.mrb[4].mxu0 }
 0x1d1   : > { %v3989_v21 = vadd.f32 %v3957_v60, %v3889_v10  ;;  %v2856_v59 = vpop.f32.mrb[5].mxu0 }
 0x1d2   : > { %v3990_v5 = vadd.f32 %v2856_v59, %v1842_v50  ;;  %v3958_v30 = vpop.f32.mrb[6].mxu0 }
 0x1d3   : > { %v5398_v7 = vmax.f32 %v3989_v21, 0.0  ;;  %v3991_v18 = vadd.f32 %v3958_v30, %v3890_v23  ;;  %v2859_v62 = vpop.f32.mrb[7].mxu0 }
 0x1d4   : > { %v5400_v25 = vmax.f32 %v3990_v5, 0.0  ;;  %v3992_v13 = vadd.f32 %v2859_v62, %v1845_v43 }
 0x1d5   : > { %v3804_v51 = vpack.c.bf16 %v5398_v7, %v5398_v7  ;;  %v5406_v49 = vmax.f32 %v3991_v18, 0.0 }
 0x1d6   : > { %v3802_v35 = vpack.c.bf16 %v5400_v25, %v5400_v25  ;;  %v5410_v57 = vmax.f32 %v3992_v13, 0.0  ;;  %v3199_v17 = vsel %vm1104_vm6, %v5400_v25, 0.0 }
 0x1d7   : > { %3166 = vst.msk [vmem:[%s5374_s26 + $0x18] sm:$0xf] %vm3159_vm8, %v3804_v51  ;;  %v3805_v42 = vpack.c.bf16 %v5406_v49, %v5406_v49  ;;  %v3200_v48 = vadd.f32 %v3199_v17, %v3198_v39  ;;  %v3205_v36 = vsel %vm1104_vm6, %v5406_v49, 0.0 }
 0x1d8   : > { %3164 = vst.msk [vmem:[%s5374_s26 + $0x10] sm:$0xf] %vm3159_vm8, %v3802_v35  ;;  %v3803_v47 = vpack.c.bf16 %v5410_v57, %v5410_v57  ;;  %v3201_v16 = vsel %vm1104_vm6, %v5410_v57, 0.0 }
 0x1d9   : > { %3167 = vst.msk [vmem:[%s5374_s26 + $0x1c] sm:$0xf] %vm3159_vm8, %v3805_v42  ;;  %v3202_v23 = vadd.f32 %v3201_v16, %v3200_v48 }
 0x1da   : > { %3165 = vst.msk [vmem:[%s5374_s26 + $0x14] sm:$0xf] %vm3159_vm8, %v3803_v47 }
 0x1e0   : > { %v3961_v11 = vpop.f32.mrb[8].mxu0 }
 0x1e1   : > { %v3993_v32 = vadd.f32 %v3961_v11, %v5352_v61  ;;  %v2872_v41 = vpop.f32.mrb[9].mxu0 }
 0x1e2   : > { %v3994_v56 = vadd.f32 %v2872_v41, %v5354_v4  ;;  %v3962_v8 = vpop.f32.mrb[10].mxu0 }
 0x1e3   : > { %v5436_v28 = vmax.f32 %v3993_v32, 0.0  ;;  %v3995_v24 = vadd.f32 %v3962_v8, %v5356_v22  ;;  %v2875_v3 = vpop.f32.mrb[11].mxu0 }
 0x1e4   : > { %v5439_v19 = vmax.f32 %v3994_v56, 0.0  ;;  %v3996_v52 = vadd.f32 %v2875_v3, %v5358_v40  ;;  %v3203_v40 = vsel %vm1104_vm6, %v5398_v7, 0.0 }
 0x1e5   : > { %v3808_v10 = vpack.c.bf16 %v5436_v28, %v5436_v28  ;;  %v5444_v50 = vmax.f32 %v3995_v24, 0.0  ;;  %v3204_v14 = vadd.f32 %v3203_v40, %v3202_v23 }
 0x1e6   : > { %v3806_v43 = vpack.c.bf16 %v5439_v19, %v5439_v19  ;;  %v5448_v61 = vmax.f32 %v3996_v52, 0.0  ;;  %v3207_v2 = vsel %vm1104_vm6, %v5439_v19, 0.0 }
 0x1e7   : > { %3170 = vst.msk [vmem:[%s5374_s26 + $0x28] sm:$0xf] %vm3159_vm8, %v3808_v10  ;;  %v3809_v4 = vpack.c.bf16 %v5444_v50, %v5444_v50  ;;  %v3206_v53 = vadd.f32 %v3205_v36, %v3204_v14  ;;  %v3213_v51 = vsel %vm1104_vm6, %v5444_v50, 0.0 }
 0x1e8   : > { %3168 = vst.msk [vmem:[%s5374_s26 + $0x20] sm:$0xf] %vm3159_vm8, %v3806_v43  ;;  %v3807_v22 = vpack.c.bf16 %v5448_v61, %v5448_v61  ;;  %v3209_v54 = vsel %vm1104_vm6, %v5448_v61, 0.0 }
 0x1e9   : > { %3171 = vst.msk [vmem:[%s5374_s26 + $0x2c] sm:$0xf] %vm3159_vm8, %v3809_v4  ;;  %v3208_v37 = vadd.f32 %v3207_v2, %v3206_v53 }
 0x1ea   : > { %3169 = vst.msk [vmem:[%s5374_s26 + $0x24] sm:$0xf] %vm3159_vm8, %v3807_v22 }
 0x1eb   : > { %v3210_v59 = vadd.f32 %v3209_v54, %v3208_v37 }
 0x1f0   : > { %v3965_v38 = vpop.f32.mrb[12].mxu0 }
 0x1f1   : > { %v3997_v31 = vadd.f32 %v3965_v38, %v5360_v27  ;;  %v2888_v6 = vpop.f32.mrb[13].mxu0 }
 0x1f2   : > { %v3998_v1 = vadd.f32 %v2888_v6, %v5362_v58  ;;  %v3966_v12 = vpop.f32.mrb[14].mxu0 }
 0x1f3   : > { %v5472_v63 = vmax.f32 %v3997_v31, 0.0  ;;  %v3999_v60 = vadd.f32 %v3966_v12, %v5364_v44  ;;  %v2891_v21 = vpop.f32.mrb[15].mxu0  ;;  %v3211_v44 = vsel %vm1104_vm6, %v5436_v28, 0.0 }
 0x1f4   : > { %v5475_v5 = vmax.f32 %v3998_v1, 0.0  ;;  %v4000_v30 = vadd.f32 %v2891_v21, %v5366_v15  ;;  %v3212_v34 = vadd.f32 %v3211_v44, %v3210_v59 }
 0x1f5   : > { %v3812_v27 = vpack.c.bf16 %v5472_v63, %v5472_v63  ;;  %v5480_v18 = vmax.f32 %v3999_v60, 0.0  ;;  %v3219_v41 = vsel %vm1104_vm6, %v5472_v63, 0.0 }
 0x1f6   : > { %v3810_v58 = vpack.c.bf16 %v5475_v5, %v5475_v5  ;;  %v5484_v62 = vmax.f32 %v4000_v30, 0.0  ;;  %v3215_v35 = vsel %vm1104_vm6, %v5475_v5, 0.0  ;;  %v3214_v20 = vadd.f32 %v3213_v51, %v3212_v34 }
 0x1f7   : > { %3174 = vst.msk [vmem:[%s5374_s26 + $0x38] sm:$0xf] %vm3159_vm8, %v3812_v27  ;;  %v3813_v13 = vpack.c.bf16 %v5480_v18, %v5480_v18  ;;  %v3221_v4 = vsel %vm1104_vm6, %v5480_v18, 0.0 }
 0x1f8   : > { %3172 = vst.msk [vmem:[%s5374_s26 + $0x30] sm:$0xf] %vm3159_vm8, %v3810_v58  ;;  %v3811_v15 = vpack.c.bf16 %v5484_v62, %v5484_v62  ;;  %v3216_v42 = vadd.f32 %v3215_v35, %v3214_v20  ;;  %v3217_v26 = vsel %vm1104_vm6, %v5484_v62, 0.0 }
 0x1f9   : > { %3175 = vst.msk [vmem:[%s5374_s26 + $0x3c] sm:$0xf] %vm3159_vm8, %v3813_v13 }
 0x1fa   : > { %3173 = vst.msk [vmem:[%s5374_s26 + $0x34] sm:$0xf] %vm3159_vm8, %v3811_v15  ;;  %v3218_v55 = vadd.f32 %v3217_v26, %v3216_v42 }
 0x1fc   : > { %v3220_v8 = vadd.f32 %v3219_v41, %v3218_v55 }
 0x1fe   : > { %v3222_v36 = vadd.f32 %v3221_v4, %v3220_v8 }
 0x200   : > { %v3969_v47 = vpop.f32.mrb[16].mxu0 }
 0x201   : > { %v2904_v46 = vpop.f32.mrb[17].mxu0 }
 0x202   : > { %v3970_v33 = vpop.f32.mrb[18].mxu0  ;;  %v3935_v17 = vpop.f32.mrb[16].mxu1 }
 0x203   : > { %v2907_v39 = vpop.f32.mrb[19].mxu0  ;;  %v4001_v11 = vadd.f32 %v3969_v47, %v3935_v17  ;;  %v2091_v32 = vpop.f32.mrb[17].mxu1 }
 0x204   : > { %v4002_v48 = vadd.f32 %v2904_v46, %v2091_v32  ;;  %v3936_v56 = vpop.f32.mrb[18].mxu1 }
 0x205   : > { %v5508_v16 = vmax.f32 %v4001_v11, 0.0  ;;  %v4003_v24 = vadd.f32 %v3970_v33, %v3936_v56  ;;  %v2094_v3 = vpop.f32.mrb[19].mxu1 }
 0x206   : > { %v5510_v52 = vmax.f32 %v4002_v48, 0.0  ;;  %v4004_v10 = vadd.f32 %v2907_v39, %v2094_v3 }
 0x207   : > { %v3816_v23 = vpack.c.bf16 %v5508_v16, %v5508_v16  ;;  %v5514_v43 = vmax.f32 %v4003_v24, 0.0  ;;  %v3227_v12 = vsel %vm1104_vm6, %v5508_v16, 0.0 }
 0x208   : > { %v3814_v22 = vpack.c.bf16 %v5510_v52, %v5510_v52  ;;  %v3223_v40 = vsel %vm1104_vm6, %v5510_v52, 0.0  ;;  %v5522_v14 = vmax.f32 %v4004_v10, 0.0 }
 0x209   : > { %3178 = vst.msk [vmem:[%s5374_s26 + $0x48] sm:$0xf] %vm3159_vm8, %v3816_v23  ;;  %v3817_v2 = vpack.c.bf16 %v5514_v43, %v5514_v43  ;;  %v3224_v37 = vadd.f32 %v3223_v40, %v3222_v36  ;;  %v3229_v51 = vsel %vm1104_vm6, %v5514_v43, 0.0 }
 0x20a   : > { %3176 = vst.msk [vmem:[%s5374_s26 + $0x40] sm:$0xf] %vm3159_vm8, %v3814_v22  ;;  %v3815_v53 = vpack.c.bf16 %v5522_v14, %v5522_v14  ;;  %v3225_v38 = vsel %vm1104_vm6, %v5522_v14, 0.0 }
 0x20b   : > { %3179 = vst.msk [vmem:[%s5374_s26 + $0x4c] sm:$0xf] %vm3159_vm8, %v3817_v2  ;;  %v3226_v54 = vadd.f32 %v3225_v38, %v3224_v37 }
 0x20c   : > { %3177 = vst.msk [vmem:[%s5374_s26 + $0x44] sm:$0xf] %vm3159_vm8, %v3815_v53 }
 0x20d   : > { %v3228_v59 = vadd.f32 %v3227_v12, %v3226_v54 }
 0x20f   : > { %v3230_v26 = vadd.f32 %v3229_v51, %v3228_v59 }
 0x210   : > { %v3973_v31 = vpop.f32.mrb[20].mxu0 }
 0x211   : > { %v2920_v6 = vpop.f32.mrb[21].mxu0 }
 0x212   : > { %v3974_v1 = vpop.f32.mrb[22].mxu0  ;;  %v3939_v60 = vpop.f32.mrb[20].mxu1 }
 0x213   : > { %v2923_v21 = vpop.f32.mrb[23].mxu0  ;;  %v4005_v30 = vadd.f32 %v3973_v31, %v3939_v60  ;;  %v2107_v27 = vpop.f32.mrb[21].mxu1 }
 0x214   : > { %v4006_v58 = vadd.f32 %v2920_v6, %v2107_v27  ;;  %v3940_v44 = vpop.f32.mrb[22].mxu1 }
 0x215   : > { %v5540_v13 = vmax.f32 %v4005_v30, 0.0  ;;  %v4007_v34 = vadd.f32 %v3974_v1, %v3940_v44  ;;  %v2110_v15 = vpop.f32.mrb[23].mxu1 }
 0x216   : > { %v5544_v35 = vmax.f32 %v4006_v58, 0.0  ;;  %v4008_v20 = vadd.f32 %v2923_v21, %v2110_v15 }
 0x217   : > { %v3820_v42 = vpack.c.bf16 %v5540_v13, %v5540_v13  ;;  %v5548_v47 = vmax.f32 %v4007_v34, 0.0  ;;  %v3235_v48 = vsel %vm1104_vm6, %v5540_v13, 0.0 }
 0x218   : > { %v3818_v46 = vpack.c.bf16 %v5544_v35, %v5544_v35  ;;  %v3231_v55 = vsel %vm1104_vm6, %v5544_v35, 0.0  ;;  %v5554_v33 = vmax.f32 %v4008_v20, 0.0 }
 0x219   : > { %3182 = vst.msk [vmem:[%s5374_s26 + $0x58] sm:$0xf] %vm3159_vm8, %v3820_v42  ;;  %v3232_v17 = vadd.f32 %v3231_v55, %v3230_v26  ;;  %v3821_v39 = vpack.c.bf16 %v5548_v47, %v5548_v47  ;;  %v3237_v8 = vsel %vm1104_vm6, %v5548_v47, 0.0 }
 0x21a   : > { %3180 = vst.msk [vmem:[%s5374_s26 + $0x50] sm:$0xf] %vm3159_vm8, %v3818_v46  ;;  %v3819_v11 = vpack.c.bf16 %v5554_v33, %v5554_v33  ;;  %v3233_v32 = vsel %vm1104_vm6, %v5554_v33, 0.0 }
 0x21b   : > { %3183 = vst.msk [vmem:[%s5374_s26 + $0x5c] sm:$0xf] %vm3159_vm8, %v3821_v39  ;;  %v3234_v41 = vadd.f32 %v3233_v32, %v3232_v17 }
 0x21c   : > { %3181 = vst.msk [vmem:[%s5374_s26 + $0x54] sm:$0xf] %vm3159_vm8, %v3819_v11 }
 0x21d   : > { %v3236_v56 = vadd.f32 %v3235_v48, %v3234_v41 }
 0x21f   : > { %v3238_v3 = vadd.f32 %v3237_v8, %v3236_v56 }
 0x220   : > { %v3977_v24 = vpop.f32.mrb[24].mxu0 }
 0x221   : > { %v2936_v10 = vpop.f32.mrb[25].mxu0 }
 0x222   : > { %v3978_v23 = vpop.f32.mrb[26].mxu0  ;;  %v3943_v4 = vpop.f32.mrb[24].mxu1 }
 0x223   : > { %v2939_v22 = vpop.f32.mrb[27].mxu0  ;;  %v4009_v40 = vadd.f32 %v3977_v24, %v3943_v4  ;;  %v2123_v36 = vpop.f32.mrb[25].mxu1 }
 0x224   : > { %v4010_v2 = vadd.f32 %v2936_v10, %v2123_v36  ;;  %v3944_v53 = vpop.f32.mrb[26].mxu1 }
 0x225   : > { %v5574_v37 = vmax.f32 %v4009_v40, 0.0  ;;  %v4011_v38 = vadd.f32 %v3978_v23, %v3944_v53  ;;  %v2126_v54 = vpop.f32.mrb[27].mxu1 }
 0x226   : > { %v5576_v31 = vmax.f32 %v4010_v2, 0.0  ;;  %v4012_v6 = vadd.f32 %v2939_v22, %v2126_v54 }
 0x227   : > { %v3824_v1 = vpack.c.bf16 %v5574_v37, %v5574_v37  ;;  %v5580_v12 = vmax.f32 %v4011_v38, 0.0  ;;  %v3243_v15 = vsel %vm1104_vm6, %v5574_v37, 0.0 }
 0x228   : > { %v3822_v60 = vpack.c.bf16 %v5576_v31, %v5576_v31  ;;  %v3239_v21 = vsel %vm1104_vm6, %v5576_v31, 0.0  ;;  %v5586_v59 = vmax.f32 %v4012_v6, 0.0 }
 0x229   : > { %3186 = vst.msk [vmem:[%s5374_s26 + $0x68] sm:$0xf] %vm3159_vm8, %v3824_v1  ;;  %v3240_v30 = vadd.f32 %v3239_v21, %v3238_v3  ;;  %v3825_v27 = vpack.c.bf16 %v5580_v12, %v5580_v12  ;;  %v3245_v20 = vsel %vm1104_vm6, %v5580_v12, 0.0 }
 0x22a   : > { %3184 = vst.msk [vmem:[%s5374_s26 + $0x60] sm:$0xf] %vm3159_vm8, %v3822_v60  ;;  %v3823_v58 = vpack.c.bf16 %v5586_v59, %v5586_v59  ;;  %v3241_v44 = vsel %vm1104_vm6, %v5586_v59, 0.0 }
 0x22b   : > { %3187 = vst.msk [vmem:[%s5374_s26 + $0x6c] sm:$0xf] %vm3159_vm8, %v3825_v27  ;;  %v3242_v34 = vadd.f32 %v3241_v44, %v3240_v30 }
 0x22c   : > { %3185 = vst.msk [vmem:[%s5374_s26 + $0x64] sm:$0xf] %vm3159_vm8, %v3823_v58 }
 0x22d   : > { %v3244_v51 = vadd.f32 %v3243_v15, %v3242_v34 }
 0x22f   : > { %v3246_v26 = vadd.f32 %v3245_v20, %v3244_v51 }
 0x230   : > { %v3981_v42 = vpop.f32.mrb[28].mxu0 }
 0x231   : > { %v2952_v46 = vpop.f32.mrb[29].mxu0 }
 0x232   : > { %v3982_v55 = vpop.f32.mrb[30].mxu0  ;;  %v3947_v17 = vpop.f32.mrb[28].mxu1 }
 0x233   : > { %v2955_v39 = vpop.f32.mrb[31].mxu0  ;;  %v4013_v11 = vadd.f32 %v3981_v42, %v3947_v17  ;;  %v2139_v32 = vpop.f32.mrb[29].mxu1 }
 0x234   : > { %v4014_v41 = vadd.f32 %v2952_v46, %v2139_v32  ;;  %v3948_v48 = vpop.f32.mrb[30].mxu1 }
 0x235   : > { %v5606_v56 = vmax.f32 %v4013_v11, 0.0  ;;  %v4015_v8 = vadd.f32 %v3982_v55, %v3948_v48  ;;  %v2142_v24 = vpop.f32.mrb[31].mxu1 }
 0x236   : > { %v5608_v3 = vmax.f32 %v4014_v41, 0.0  ;;  %v4016_v10 = vadd.f32 %v2955_v39, %v2142_v24 }
 0x237   : > { %v3828_v23 = vpack.c.bf16 %v5606_v56, %v5606_v56  ;;  %v5612_v4 = vmax.f32 %v4015_v8, 0.0  ;;  %v3251_v1 = vsel %vm1104_vm6, %v5606_v56, 0.0 }
 0x238   : > { %v3826_v22 = vpack.c.bf16 %v5608_v3, %v5608_v3  ;;  %v3247_v40 = vsel %vm1104_vm6, %v5608_v3, 0.0  ;;  %v5618_v36 = vmax.f32 %v4016_v10, 0.0 }
 0x239   : > { %3190 = vst.msk [vmem:[%s5374_s26 + $0x78] sm:$0xf] %vm3159_vm8, %v3828_v23  ;;  %v3248_v2 = vadd.f32 %v3247_v40, %v3246_v26  ;;  %v3829_v53 = vpack.c.bf16 %v5612_v4, %v5612_v4  ;;  %v3253_v21 = vsel %vm1104_vm6, %v5612_v4, 0.0 }
 0x23a   : > { %3188 = vst.msk [vmem:[%s5374_s26 + $0x70] sm:$0xf] %vm3159_vm8, %v3826_v22  ;;  %v3827_v38 = vpack.c.bf16 %v5618_v36, %v5618_v36  ;;  %v3249_v54 = vsel %vm1104_vm6, %v5618_v36, 0.0 }
 0x23b   : > { %3191 = vst.msk [vmem:[%s5374_s26 + $0x7c] sm:$0xf] %vm3159_vm8, %v3829_v53  ;;  %v3250_v6 = vadd.f32 %v3249_v54, %v3248_v2 }
 0x23c   : > { %3189 = vst.msk [vmem:[%s5374_s26 + $0x74] sm:$0xf] %vm3159_vm8, %v3827_v38 }
 0x23d   : > { %v3252_v60 = vadd.f32 %v3251_v1, %v3250_v6 }
 0x23f   : > { %v3254_v30 = vadd.f32 %v3253_v21, %v3252_v60 }
 0x241   : > { %v3255_v27 = vrot.slane %v3254_v30, 4 }
 0x243   : > { %v3256_v58 = vadd.f32 %v3255_v27, %v3254_v30 }
 0x245   : > { %v3257_v44 = vrot.slane %v3256_v58, 2 }
 0x247   : > { %v3258_v34 = vadd.f32 %v3257_v44, %v3256_v58 }
 0x249   : > { %v3259_v15 = vrot.slane %v3258_v34, 1 }
 0x24b   : > { %v5638_v51 = vadd.f32 %v3259_v15, %v3258_v34 }
 0x24d   : > { %v5641_v20 = vmul.f32 0.00390625, %v5638_v51 }
 0x24f   : > { %v3262_v42 = vsub.f32 %v5376_v45, %v5641_v20  ;;  %v3263_v26 = vsub.f32 %v5384_v29, %v5641_v20  ;;  %v3264_v46 = vsub.f32 %v5369_v9, %v5641_v20  ;;  %v3265_v55 = vsub.f32 %v5380_v0, %v5641_v20 }
 0x250   : > { %v3266_v11 = vsub.f32 %v5400_v25, %v5641_v20  ;;  %v3267_v41 = vsub.f32 %v5410_v57, %v5641_v20  ;;  %v3268_v9 = vsub.f32 %v5398_v7, %v5641_v20  ;;  %v3269_v25 = vsub.f32 %v5406_v49, %v5641_v20 }
 0x251   : > { %v3294_v17 = vmul.f32 %v3262_v42, %v3262_v42  ;;  %v3295_v39 = vmul.f32 %v3263_v26, %v3263_v26  ;;  %v3296_v32 = vmul.f32 %v3264_v46, %v3264_v46  ;;  %v3297_v48 = vmul.f32 %v3265_v55, %v3265_v55 }
 0x252   : > { %v3298_v24 = vmul.f32 %v3266_v11, %v3266_v11  ;;  %v3299_v23 = vmul.f32 %v3267_v41, %v3267_v41  ;;  %v3270_v40 = vsub.f32 %v5439_v19, %v5641_v20  ;;  %v3300_v2 = vmul.f32 %v3268_v9, %v3268_v9 }
 0x253   : > { %v3326_v45 = vsel %vm1104_vm6, %v3294_v17, 0.0  ;;  %v3327_v29 = vsel %vm1104_vm6, %v3295_v39, 0.0  ;;  %v3329_v0 = vsel %vm1104_vm6, %v3296_v32, 0.0  ;;  %v3331_v22 = vsel %vm1104_vm6, %v3297_v48, 0.0 }
 0x254   : > { %v3328_v8 = vadd.f32 %v3327_v29, %v3326_v45  ;;  %v3333_v53 = vsel %vm1104_vm6, %v3298_v24, 0.0  ;;  %v3271_v7 = vsub.f32 %v5448_v61, %v5641_v20  ;;  %v3301_v54 = vmul.f32 %v3269_v25, %v3269_v25 }
 0x255   : > { %v3335_v6 = vsel %vm1104_vm6, %v3299_v23, 0.0  ;;  %v3272_v49 = vsub.f32 %v5436_v28, %v5641_v20  ;;  %v3302_v60 = vmul.f32 %v3270_v40, %v3270_v40  ;;  %v3337_v21 = vsel %vm1104_vm6, %v3300_v2, 0.0 }
 0x256   : > { %v3330_v10 = vadd.f32 %v3329_v0, %v3328_v8  ;;  %v3273_v19 = vsub.f32 %v5444_v50, %v5641_v20  ;;  %v3303_v27 = vmul.f32 %v3271_v7, %v3271_v7  ;;  %v3339_v58 = vsel %vm1104_vm6, %v3301_v54, 0.0 }
 0x257   : > { %v3274_v61 = vsub.f32 %v5475_v5, %v5641_v20  ;;  %v3304_v34 = vmul.f32 %v3272_v49, %v3272_v49  ;;  %v3341_v15 = vsel %vm1104_vm6, %v3302_v60, 0.0  ;;  %v3275_v28 = vsub.f32 %v5484_v62, %v5641_v20 }
 0x258   : > { %v3332_v57 = vadd.f32 %v3331_v22, %v3330_v10  ;;  %v3305_v26 = vmul.f32 %v3273_v19, %v3273_v19  ;;  %v3343_v46 = vsel %vm1104_vm6, %v3303_v27, 0.0  ;;  %v3276_v50 = vsub.f32 %v5472_v63, %v5641_v20 }
 0x259   : > { %v3306_v17 = vmul.f32 %v3274_v61, %v3274_v61  ;;  %v3345_v39 = vsel %vm1104_vm6, %v3304_v34, 0.0  ;;  %v3277_v5 = vsub.f32 %v5480_v18, %v5641_v20  ;;  %v3307_v32 = vmul.f32 %v3275_v28, %v3275_v28 }
 0x25a   : > { %v3334_v38 = vadd.f32 %v3333_v53, %v3332_v57  ;;  %v3347_v41 = vsel %vm1104_vm6, %v3305_v26, 0.0  ;;  %v3278_v62 = vsub.f32 %v5510_v52, %v5641_v20  ;;  %v3308_v45 = vmul.f32 %v3276_v50, %v3276_v50 }
 0x25b   : > { %v3349_v29 = vsel %vm1104_vm6, %v3306_v17, 0.0  ;;  %v3279_v63 = vsub.f32 %v5522_v14, %v5641_v20  ;;  %v3309_v9 = vmul.f32 %v3277_v5, %v3277_v5  ;;  %v3351_v24 = vsel %vm1104_vm6, %v3307_v32, 0.0 }
 0x25c   : > { %v3336_v1 = vadd.f32 %v3335_v6, %v3334_v38  ;;  %v3280_v18 = vsub.f32 %v5508_v16, %v5641_v20  ;;  %v3310_v10 = vmul.f32 %v3278_v62, %v3278_v62  ;;  %v3353_v25 = vsel %vm1104_vm6, %v3308_v45, 0.0 }
 0x25d   : > { %v3281_v52 = vsub.f32 %v5514_v43, %v5641_v20  ;;  %v3311_v22 = vmul.f32 %v3279_v63, %v3279_v63  ;;  %v3355_v57 = vsel %vm1104_vm6, %v3309_v9, 0.0  ;;  %v3282_v14 = vsub.f32 %v5544_v35, %v5641_v20 }
 0x25e   : > { %v3338_v30 = vadd.f32 %v3337_v21, %v3336_v1  ;;  %v3312_v2 = vmul.f32 %v3280_v18, %v3280_v18  ;;  %v3357_v53 = vsel %vm1104_vm6, %v3310_v10, 0.0  ;;  %v3283_v16 = vsub.f32 %v5554_v33, %v5641_v20 }
 0x25f   : > { %v3313_v7 = vmul.f32 %v3281_v52, %v3281_v52  ;;  %v3359_v54 = vsel %vm1104_vm6, %v3311_v22, 0.0  ;;  %v3284_v43 = vsub.f32 %v5540_v13, %v5641_v20  ;;  %v3314_v1 = vmul.f32 %v3282_v14, %v3282_v14 }
 0x260   : > { %v3340_v44 = vadd.f32 %v3339_v58, %v3338_v30  ;;  %v3361_v49 = vsel %vm1104_vm6, %v3312_v2, 0.0  ;;  %v3285_v35 = vsub.f32 %v5548_v47, %v5641_v20  ;;  %v3315_v21 = vmul.f32 %v3283_v16, %v3283_v16 }
 0x261   : > { %v3363_v30 = vsel %vm1104_vm6, %v3313_v7, 0.0  ;;  %v3286_v33 = vsub.f32 %v5576_v31, %v5641_v20  ;;  %v3316_v27 = vmul.f32 %v3284_v43, %v3284_v43  ;;  %v3365_v58 = vsel %vm1104_vm6, %v3314_v1, 0.0 }
 0x262   : > { %v3342_v42 = vadd.f32 %v3341_v15, %v3340_v44  ;;  %v3287_v13 = vsub.f32 %v5586_v59, %v5641_v20  ;;  %v3317_v61 = vmul.f32 %v3285_v35, %v3285_v35  ;;  %v3367_v34 = vsel %vm1104_vm6, %v3315_v21, 0.0 }
 0x263   : > { %v3288_v47 = vsub.f32 %v5574_v37, %v5641_v20  ;;  %v3369_v28 = vsel %vm1104_vm6, %v3316_v27, 0.0  ;;  %v3289_v31 = vsub.f32 %v5580_v12, %v5641_v20  ;;  %v3290_v59 = vsub.f32 %v5608_v3, %v5641_v20 }
 0x264   : > { %v3344_v55 = vadd.f32 %v3343_v46, %v3342_v42  ;;  %v3318_v42 = vmul.f32 %v3286_v33, %v3286_v33  ;;  %v3319_v46 = vmul.f32 %v3287_v13, %v3287_v13  ;;  %v3291_v37 = vsub.f32 %v5618_v36, %v5641_v20 }
 0x265   : > { %v3320_v17 = vmul.f32 %v3288_v47, %v3288_v47  ;;  %v3321_v5 = vmul.f32 %v3289_v31, %v3289_v31  ;;  %v3292_v12 = vsub.f32 %v5606_v56, %v5641_v20  ;;  %v3293_v3 = vsub.f32 %v5612_v4, %v5641_v20 }
 0x266   : > { %v3346_v11 = vadd.f32 %v3345_v39, %v3344_v55  ;;  %v3371_v55 = vsel %vm1104_vm6, %v3317_v61, 0.0  ;;  %v3373_v39 = vsel %vm1104_vm6, %v3318_v42, 0.0  ;;  %v3375_v32 = vsel %vm1104_vm6, %v3319_v46, 0.0 }
 0x267   : > { %v3377_v62 = vsel %vm1104_vm6, %v3320_v17, 0.0  ;;  %v3324_v36 = vmul.f32 %v3292_v12, %v3292_v12 }
 0x268   : > { %v3348_v48 = vadd.f32 %v3347_v41, %v3346_v11 }
 0x269   : > { %v3385_v10 = vsel %vm1104_vm6, %v3324_v36, 0.0 }
 0x26a   : > { %v3350_v8 = vadd.f32 %v3349_v29, %v3348_v48  ;;  %v3322_v48 = vmul.f32 %v3290_v59, %v3290_v59  ;;  %v3323_v29 = vmul.f32 %v3291_v37, %v3291_v37 }
 0x26c   : > { %v3352_v0 = vadd.f32 %v3351_v24, %v3350_v8  ;;  %v3379_v8 = vsel %vm1104_vm6, %v3321_v5, 0.0  ;;  %v3381_v9 = vsel %vm1104_vm6, %v3322_v48, 0.0  ;;  %v3383_v18 = vsel %vm1104_vm6, %v3323_v29, 0.0 }
 0x26e   : > { %v3354_v23 = vadd.f32 %v3353_v25, %v3352_v0  ;;  %v3325_v0 = vmul.f32 %v3293_v3, %v3293_v3 }
 0x270   : > { %v3356_v40 = vadd.f32 %v3355_v57, %v3354_v23  ;;  %v3387_v23 = vsel %vm1104_vm6, %v3325_v0, 0.0 }
 0x272   : > { %v3358_v38 = vadd.f32 %v3357_v53, %v3356_v40 }
 0x274   : > { %v3360_v6 = vadd.f32 %v3359_v54, %v3358_v38 }
 0x276   : > { %v3362_v60 = vadd.f32 %v3361_v49, %v3360_v6 }
 0x278   : > { %v3364_v19 = vadd.f32 %v3363_v30, %v3362_v60 }
 0x27a   : > { %v3366_v44 = vadd.f32 %v3365_v58, %v3364_v19 }
 0x27c   : > { %v3368_v15 = vadd.f32 %v3367_v34, %v3366_v44 }
 0x27e   : > { %v3370_v26 = vadd.f32 %v3369_v28, %v3368_v15 }
 0x280   : > { %v3372_v50 = vadd.f32 %v3371_v55, %v3370_v26 }
 0x282   : > { %v3374_v11 = vadd.f32 %v3373_v39, %v3372_v50 }
 0x284   : > { %v3376_v41 = vadd.f32 %v3375_v32, %v3374_v11 }
 0x286   : > { %v3378_v45 = vadd.f32 %v3377_v62, %v3376_v41 }
 0x288   : > { %v3380_v63 = vadd.f32 %v3379_v8, %v3378_v45 }
 0x28a   : > { %v3382_v24 = vadd.f32 %v3381_v9, %v3380_v63 }
 0x28c   : > { %v3384_v56 = vadd.f32 %v3383_v18, %v3382_v24 }
 0x28e   : > { %v3386_v25 = vadd.f32 %v3385_v10, %v3384_v56 }
 0x290   : > { %v3388_v52 = vadd.f32 %v3387_v23, %v3386_v25 }
 0x292   : > { %v3389_v4 = vrot.slane %v3388_v52, 4 }
 0x294   : > { %v3390_v20 = vadd.f32 %v3389_v4, %v3388_v52 }
 0x296   : > { %v3391_v22 = vrot.slane %v3390_v20, 2 }
 0x298   : > { %v3392_v57 = vadd.f32 %v3391_v22, %v3390_v20 }
 0x29a   : > { %v3393_v40 = vrot.slane %v3392_v57, 1 }
 0x29c   : > { %v3394_v14 = vadd.f32 %v3393_v40, %v3392_v57 }
 0x29e   : > { %v3396_v2 = vsel %vm3395_vm9, %v5638_v51, %v3394_v14 }
 0x29f   : > { %3398 = vst.msk [vmem:[%s400_s29] sm:$0x3] %vm3397_vm10, %v3396_v2 }
 0x2a0 PF: > { %s16_s20 = sadd.s32 1, %s4235_s20   ;;  %s5810_s18 = smov %s4231_s19 }
 0x2a1   : > { %p13_p6 = scmp.ge.s32.totalorder %s16_s20, 4   ;;  %s5811_s19 = smov %s5813_s21 }
 0x2a3   :  { %15 = sbr.rel (!%p13_p6) target bundleno = 2 (0x2), region = 93 }

</bundles_post_ra>
